<compile_context>
chip_gen: v7x
topology: tpu7x:2x2x1
jax: 0.10.0
libtpu: 0.0.40
codegen_flags: <defaults>
</compile_context>

<pallas_src>
import math
import functools

import numpy as np
import jax
import jax.numpy as jnp
from jax import lax
from jax.experimental import pallas as pl
from jax.experimental.pallas import tpu as pltpu

NEG_INF = -1e30  # stand-in for float('-inf') in masked_fill; identical after softmax


# ----------------------------- in-kernel helpers -----------------------------

def _layer_norm(x, scale, bias, eps=1e-6):
    mu = jnp.mean(x, axis=-1, keepdims=True)
    var = jnp.mean(jnp.square(x - mu), axis=-1, keepdims=True)
    return (x - mu) / jnp.sqrt(var + eps) * scale + bias


# --------------------------------- the kernel --------------------------------

def _decoder_kernel(num_heads, head_size,
                    trg_ref, mem_ref, tpad_ref, spad_ref, pe_ref,
                    lns_ref, lnb_ref, qkvw_ref, qkvb_ref, ow_ref, ob_ref,
                    w1_ref, b1_ref, w2_ref, b2_ref,
                    fs_ref, fb_ref,
                    out_ref, x_ref):
    """Grid = (batch, layer). One decoder layer per grid step; x carried in VMEM scratch."""
    l = pl.program_id(1)

    @pl.when(l == 0)
    def _():
        # PositionalEncoding add; emb_dropout is identity in eval mode.
        x_ref[...] = trg_ref[0] + pe_ref[...]

    x = x_ref[...]                               # (T, H) f32 carry
    mem = mem_ref[0].astype(jnp.bfloat16)        # (S, H)

    T = x.shape[0]
    # Build the combined causal+padding mask in-kernel as an additive bias
    # (no O(B*T^2) HBM traffic; iota+compare co-issues on the VPU).
    row = lax.broadcasted_iota(jnp.int32, (T, T), 0)
    col = lax.broadcasted_iota(jnp.int32, (T, T), 1)
    tpad = tpad_ref[0] > 0.0                     # (1, T)
    self_bias = jnp.where((row >= col) & tpad, 0.0, NEG_INF)    # (T, T)
    src_bias = jnp.where(spad_ref[0] > 0.0, 0.0, NEG_INF)       # (1, S)

    inv_sqrt_d = 1.0 / math.sqrt(head_size)

    def mha(q_in, kv_bf16, att_idx, bias):
        """joeynmt MultiHeadedAttention (eval). q_in f32 (Tq,H), kv_bf16 (Tk,H)."""
        # Full-width projections: one (Tq,H)x(H,H) MXU matmul each, bf16 in, f32 acc.
        q = jnp.dot(q_in.astype(jnp.bfloat16), qkvw_ref[0, att_idx, 0],
                    preferred_element_type=jnp.float32) + qkvb_ref[0, att_idx, 0]
        k = jnp.dot(kv_bf16, qkvw_ref[0, att_idx, 1],
                    preferred_element_type=jnp.float32) + qkvb_ref[0, att_idx, 1]
        v = jnp.dot(kv_bf16, qkvw_ref[0, att_idx, 2],
                    preferred_element_type=jnp.float32) + qkvb_ref[0, att_idx, 2]
        q = q * inv_sqrt_d
        acc = None
        for h in range(num_heads):
            sl = slice(h * head_size, (h + 1) * head_size)
            qh = q[:, sl].astype(jnp.bfloat16)
            kh = k[:, sl].astype(jnp.bfloat16)
            vh = v[:, sl].astype(jnp.bfloat16)
            # scores = qh @ kh^T  (contract over head_size), f32 accumulation
            s = lax.dot_general(qh, kh, (((1,), (1,)), ((), ())),
                                preferred_element_type=jnp.float32) + bias
            m = jnp.max(s, axis=-1, keepdims=True)
            e = jnp.exp(s - m)
            p = e * pl.reciprocal(jnp.sum(e, axis=-1, keepdims=True), approx=True)
            ctx = jnp.dot(p.astype(jnp.bfloat16), vh,
                          preferred_element_type=jnp.float32)
            # Output projection folded per head; Wo stored head-major so the head
            # select is a free leading-axis index (no lane-slicing of (H,H) weights).
            contrib = jnp.dot(ctx.astype(jnp.bfloat16), ow_ref[0, att_idx, h],
                              preferred_element_type=jnp.float32)
            acc = contrib if acc is None else acc + contrib
        return acc + ob_ref[0, att_idx]

    # --- masked self-attention (pre-LN) + residual ---
    xn = _layer_norm(x, lns_ref[0, 0], lnb_ref[0, 0])
    h1 = x + mha(xn, xn.astype(jnp.bfloat16), 0, self_bias)
    # --- source-target attention (pre-LN) + residual ---
    h1n = _layer_norm(h1, lns_ref[0, 1], lnb_ref[0, 1])
    h2 = h1 + mha(h1n, mem, 1, src_bias)
    # --- position-wise feed-forward (pre-LN) + residual ---
    fn = _layer_norm(h2, lns_ref[0, 2], lnb_ref[0, 2])
    ff = jnp.dot(fn.astype(jnp.bfloat16), w1_ref[0],
                 preferred_element_type=jnp.float32) + b1_ref[0]
    ff = jnp.maximum(ff, 0.0)
    ff = jnp.dot(ff.astype(jnp.bfloat16), w2_ref[0],
                 preferred_element_type=jnp.float32) + b2_ref[0]
    x_new = h2 + ff

    x_ref[...] = x_new                           # carry to next layer

    @pl.when(l == pl.num_programs(1) - 1)
    def _():
        # final decoder LayerNorm (eps=1e-6)
        out_ref[0] = _layer_norm(x_new, fs_ref[...], fb_ref[...])


# ----------------------------------- glue ------------------------------------

def positional_encoding(T, H):
    position = np.arange(T)[:, None].astype(np.float32)
    div_term = np.exp(np.arange(0, H, 2).astype(np.float32) * -(math.log(10000.0) / H))
    pe = np.zeros((T, H), np.float32)
    pe[:, 0::2] = np.sin(position * div_term)
    pe[:, 1::2] = np.cos(position * div_term)
    return jnp.asarray(pe)


def init_params(key, num_layers, hidden, ff, num_heads):
    assert hidden % num_heads == 0
    head_size = hidden // num_heads
    ks = jax.random.split(key, 4)
    std = 0.02
    qkv_w = std * jax.random.normal(ks[0], (num_layers, 2, 3, hidden, hidden), jnp.float32)
    out_w = std * jax.random.normal(ks[1], (num_layers, 2, hidden, hidden), jnp.float32)
    return {
        # per-layer layer norms: [x_layer_norm, dec_layer_norm, ff.layer_norm]
        "ln_scale": jnp.ones((num_layers, 3, 1, hidden), jnp.float32),
        "ln_bias": jnp.zeros((num_layers, 3, 1, hidden), jnp.float32),
        # [layer][self/cross][Wq,Wk,Wv], input-major (H_in, H_out), bf16 for the MXU
        "attn_qkv_w": qkv_w.astype(jnp.bfloat16),
        "attn_qkv_b": jnp.zeros((num_layers, 2, 3, 1, hidden), jnp.float32),
        # output projection stored head-major: (L, 2, num_heads, head_size, H)
        "attn_out_w": out_w.reshape(num_layers, 2, num_heads, head_size,
                                    hidden).astype(jnp.bfloat16),
        "attn_out_b": jnp.zeros((num_layers, 2, 1, hidden), jnp.float32),
        "ff_w1": (std * jax.random.normal(ks[2], (num_layers, hidden, ff),
                                          jnp.float32)).astype(jnp.bfloat16),
        "ff_b1": jnp.zeros((num_layers, 1, ff), jnp.float32),
        "ff_w2": (std * jax.random.normal(ks[3], (num_layers, ff, hidden),
                                          jnp.float32)).astype(jnp.bfloat16),
        "ff_b2": jnp.zeros((num_layers, 1, hidden), jnp.float32),
        "final_ln_scale": jnp.ones((1, hidden), jnp.float32),
        "final_ln_bias": jnp.zeros((1, hidden), jnp.float32),
    }


def transformer_decoder_forward(params, trg_embed, encoder_output, src_mask,
                                trg_mask, kb_mask=None, num_heads=4):
    """Mirrors TransformerDecoder.forward; returns (None, None, x, kb_probs, None, None)."""
    B, T, H = trg_embed.shape
    S = encoder_output.shape[1]
    L = params["ln_scale"].shape[0]
    F = params["ff_w1"].shape[-1]
    head_size = H // num_heads

    # kb_mask expansion from the reference forward (unused when kb_task=False)
    if kb_mask is not None:
        _ = jnp.repeat(kb_mask[:, None, :], T, axis=1).astype(bool)

    # causal part of the target mask is built inside the kernel; pass padding masks only
    tpad = trg_mask.astype(jnp.float32).reshape(B, 1, T)
    spad = src_mask.astype(jnp.float32).reshape(B, 1, S)

    pe = positional_encoding(T, H)

    kernel = functools.partial(_decoder_kernel, num_heads, head_size)

    grid_spec = pltpu.PrefetchScalarGridSpec(
        num_scalar_prefetch=0,
        grid=(B, L),  # layer axis innermost -> x carried in scratch across it
        in_specs=[
            pl.BlockSpec((1, T, H), lambda b, l: (b, 0, 0)),              # trg_embed
            pl.BlockSpec((1, S, H), lambda b, l: (b, 0, 0)),              # encoder_output
            pl.BlockSpec((1, 1, T), lambda b, l: (b, 0, 0)),              # trg padding mask
            pl.BlockSpec((1, 1, S), lambda b, l: (b, 0, 0)),              # src padding mask
            pl.BlockSpec((T, H), lambda b, l: (0, 0)),                    # positional encoding
            pl.BlockSpec((1, 3, 1, H), lambda b, l: (l, 0, 0, 0)),        # ln scales (layer l)
            pl.BlockSpec((1, 3, 1, H), lambda b, l: (l, 0, 0, 0)),        # ln biases
            pl.BlockSpec((1, 2, 3, H, H), lambda b, l: (l, 0, 0, 0, 0)),  # qkv W (bf16)
            pl.BlockSpec((1, 2, 3, 1, H), lambda b, l: (l, 0, 0, 0, 0)),  # qkv b
            pl.BlockSpec((1, 2, num_heads, head_size, H),
                         lambda b, l: (l, 0, 0, 0, 0)),                   # out W (bf16, head-major)
            pl.BlockSpec((1, 2, 1, H), lambda b, l: (l, 0, 0, 0)),        # out b
            pl.BlockSpec((1, H, F), lambda b, l: (l, 0, 0)),              # ff W1 (bf16)
            pl.BlockSpec((1, 1, F), lambda b, l: (l, 0, 0)),              # ff b1
            pl.BlockSpec((1, F, H), lambda b, l: (l, 0, 0)),              # ff W2 (bf16)
            pl.BlockSpec((1, 1, H), lambda b, l: (l, 0, 0)),              # ff b2
            pl.BlockSpec((1, H), lambda b, l: (0, 0)),                    # final LN scale
            pl.BlockSpec((1, H), lambda b, l: (0, 0)),                    # final LN bias
        ],
        out_specs=pl.BlockSpec((1, T, H), lambda b, l: (b, 0, 0)),
        scratch_shapes=[pltpu.VMEM((T, H), jnp.float32)],                 # x carry
    )

    # VMEM budget: one layer's weights (double-buffered) + activations/masks.
    def nbytes(a):
        return int(np.prod(a.shape)) * a.dtype.itemsize
    per_layer_w = sum(nbytes(params[k]) for k in
                      ("attn_qkv_w", "attn_qkv_b", "attn_out_w", "attn_out_b",
                       "ff_w1", "ff_b1", "ff_w2", "ff_b2", "ln_scale", "ln_bias")) // L
    act_bytes = 4 * (6 * T * H + 2 * S * H + T * max(T, S) + T * F + T + S)
    vmem_limit = int(min(100 * 2 ** 20, max(16 * 2 ** 20, 3 * per_layer_w + 4 * act_bytes)))

    x = pl.pallas_call(
        kernel,
        out_shape=jax.ShapeDtypeStruct((B, T, H), jnp.float32),
        grid_spec=grid_spec,
        compiler_params=pltpu.CompilerParams(
            dimension_semantics=("parallel", "arbitrary"),
            vmem_limit_bytes=vmem_limit),
    )(trg_embed.astype(jnp.float32), encoder_output.astype(jnp.float32),
      tpad, spad, pe,
      params["ln_scale"], params["ln_bias"],
      params["attn_qkv_w"], params["attn_qkv_b"],
      params["attn_out_w"], params["attn_out_b"],
      params["ff_w1"], params["ff_b1"], params["ff_w2"], params["ff_b2"],
      params["final_ln_scale"], params["final_ln_bias"])

    kb_probs = None  # kb_task=False
    return None, None, x, kb_probs, None, None


# ----------------------------------- main ------------------------------------

if __name__ == "__main__":
    B, T, S, H, NH, FF, L, KB = 2, 8, 16, 32, 4, 64, 2, 4

    key = jax.random.PRNGKey(0)
    k_trg, k_enc, k_par = jax.random.split(key, 3)

    trg_embed = jax.random.normal(k_trg, (B, T, H), jnp.float32)
    encoder_output = jax.random.normal(k_enc, (B, S, H), jnp.float32)

    trg_lens = jnp.array([T, 6])
    src_lens = jnp.array([S, 12])
    trg_mask = jnp.arange(T)[None, None, :] < trg_lens[:, None, None]   # (B, 1, T) bool
    src_mask = jnp.arange(S)[None, None, :] < src_lens[:, None, None]   # (B, 1, S) bool
    kb_mask = jnp.ones((B, KB), dtype=bool)                             # unused (kb_task=False)

    params = init_params(k_par, L, H, FF, NH)

    _, _, x, kb_probs, _, _ = transformer_decoder_forward(
        params, trg_embed, encoder_output, src_mask, trg_mask, kb_mask, num_heads=NH)
    x = jax.block_until_ready(x)

    assert x.shape == (B, T, H)
    assert bool(jnp.all(jnp.isfinite(x)))
    print("KERNEL_OK")
</pallas_src>

<mosaic_0001>
module attributes {stable_mosaic.version = 11 : i64} {
  func.func @_decoder_kernel(%arg0: i32, %arg1: i32, %arg2: memref<1x8x32xf32, #tpu.memory_space<vmem>>, %arg3: memref<1x16x32xf32, #tpu.memory_space<vmem>>, %arg4: memref<1x1x8xf32, #tpu.memory_space<vmem>>, %arg5: memref<1x1x16xf32, #tpu.memory_space<vmem>>, %arg6: memref<8x32xf32, #tpu.memory_space<vmem>>, %arg7: memref<1x3x1x32xf32, #tpu.memory_space<vmem>>, %arg8: memref<1x3x1x32xf32, #tpu.memory_space<vmem>>, %arg9: memref<1x2x3x32x32xbf16, #tpu.memory_space<vmem>>, %arg10: memref<1x2x3x1x32xf32, #tpu.memory_space<vmem>>, %arg11: memref<1x2x4x8x32xbf16, #tpu.memory_space<vmem>>, %arg12: memref<1x2x1x32xf32, #tpu.memory_space<vmem>>, %arg13: memref<1x32x64xbf16, #tpu.memory_space<vmem>>, %arg14: memref<1x1x64xf32, #tpu.memory_space<vmem>>, %arg15: memref<1x64x32xbf16, #tpu.memory_space<vmem>>, %arg16: memref<1x1x32xf32, #tpu.memory_space<vmem>>, %arg17: memref<1x32xf32, #tpu.memory_space<vmem>>, %arg18: memref<1x32xf32, #tpu.memory_space<vmem>>, %arg19: memref<1x8x32xf32, #tpu.memory_space<vmem>>, %arg20: memref<8x32xf32, #tpu.memory_space<vmem>>) attributes {dimension_semantics = [#tpu.dimension_semantics<parallel>, #tpu.dimension_semantics<arbitrary>], iteration_bounds = array<i64: 2, 2>, scalar_prefetch = 0 : i64, scratch_operands = 1 : i64, tpu.core_type = #tpu.core_type<tc>, window_params = [{transform_indices = @transform_0, window_bounds = array<i64: 1, 8, 32>}, {transform_indices = @transform_1, window_bounds = array<i64: 1, 16, 32>}, {transform_indices = @transform_2, window_bounds = array<i64: 1, 1, 8>}, {transform_indices = @transform_3, window_bounds = array<i64: 1, 1, 16>}, {pipeline_mode = #tpu.pipeline_mode<synchronous>, transform_indices = @transform_4, window_bounds = array<i64: 8, 32>}, {transform_indices = @transform_5, window_bounds = array<i64: 1, 3, 1, 32>}, {transform_indices = @transform_6, window_bounds = array<i64: 1, 3, 1, 32>}, {transform_indices = @transform_7, window_bounds = array<i64: 1, 2, 3, 32, 32>}, {transform_indices = @transform_8, window_bounds = array<i64: 1, 2, 3, 1, 32>}, {transform_indices = @transform_9, window_bounds = array<i64: 1, 2, 4, 8, 32>}, {transform_indices = @transform_10, window_bounds = array<i64: 1, 2, 1, 32>}, {transform_indices = @transform_11, window_bounds = array<i64: 1, 32, 64>}, {transform_indices = @transform_12, window_bounds = array<i64: 1, 1, 64>}, {transform_indices = @transform_13, window_bounds = array<i64: 1, 64, 32>}, {transform_indices = @transform_14, window_bounds = array<i64: 1, 1, 32>}, {pipeline_mode = #tpu.pipeline_mode<synchronous>, transform_indices = @transform_15, window_bounds = array<i64: 1, 32>}, {pipeline_mode = #tpu.pipeline_mode<synchronous>, transform_indices = @transform_16, window_bounds = array<i64: 1, 32>}, {transform_indices = @transform_17, window_bounds = array<i64: 1, 8, 32>}]} {
    %c0_i32 = arith.constant 0 : i32
    %0 = arith.cmpi eq, %arg1, %c0_i32 : i32
    %1 = arith.extui %0 : i1 to i32
    %c0_i32_0 = arith.constant 0 : i32
    %2 = arith.cmpi ne, %1, %c0_i32_0 : i32
    scf.if %2 {
      %c0_226 = arith.constant 0 : index
      %c0_227 = arith.constant 0 : index
      %c0_228 = arith.constant 0 : index
      %388 = vector.load %arg2[%c0_226, %c0_227, %c0_228] : memref<1x8x32xf32, #tpu.memory_space<vmem>>, vector<1x8x32xf32>
      %389 = vector.shape_cast %388 : vector<1x8x32xf32> to vector<8x32xf32>
      %c0_229 = arith.constant 0 : index
      %c0_230 = arith.constant 0 : index
      %390 = vector.load %arg6[%c0_229, %c0_230] : memref<8x32xf32, #tpu.memory_space<vmem>>, vector<8x32xf32>
      %391 = arith.addf %389, %390 : vector<8x32xf32>
      %c0_231 = arith.constant 0 : index
      %c0_232 = arith.constant 0 : index
      %392 = vector.load %arg20[%c0_231, %c0_232] : memref<8x32xf32, #tpu.memory_space<vmem>>, vector<8x32xf32>
      tpu.vector_store %arg20[%c0_231, %c0_232], %391 {strides = array<i32>} : memref<8x32xf32, #tpu.memory_space<vmem>>, vector<8x32xf32>,
    } else {
    }
    %c0 = arith.constant 0 : index
    %c0_1 = arith.constant 0 : index
    %3 = vector.load %arg20[%c0, %c0_1] : memref<8x32xf32, #tpu.memory_space<vmem>>, vector<8x32xf32>
    %c0_2 = arith.constant 0 : index
    %c0_3 = arith.constant 0 : index
    %c0_4 = arith.constant 0 : index
    %4 = vector.load %arg3[%c0_2, %c0_3, %c0_4] : memref<1x16x32xf32, #tpu.memory_space<vmem>>, vector<1x16x32xf32>
    %5 = vector.shape_cast %4 : vector<1x16x32xf32> to vector<16x32xf32>
    %6 = arith.truncf %5 : vector<16x32xf32> to vector<16x32xbf16>
    %7 = tpu.iota {dimensions = array<i32: 0>} : vector<8x8xi32>
    %8 = tpu.iota {dimensions = array<i32: 1>} : vector<8x8xi32>
    %c0_5 = arith.constant 0 : index
    %c0_6 = arith.constant 0 : index
    %c0_7 = arith.constant 0 : index
    %9 = vector.load %arg4[%c0_5, %c0_6, %c0_7] : memref<1x1x8xf32, #tpu.memory_space<vmem>>, vector<1x1x8xf32>
    %10 = vector.shape_cast %9 : vector<1x1x8xf32> to vector<1x8xf32>
    %cst = arith.constant 0.000000e+00 : f32
    %11 = vector.broadcast %cst : f32 to vector<1x8xf32>
    %12 = arith.cmpf ogt, %10, %11 : vector<1x8xf32>
    %13 = arith.cmpi sge, %7, %8 : vector<8x8xi32>
    %14 = vector.broadcast %12 : vector<1x8xi1> to vector<8x8xi1>
    %15 = arith.andi %13, %14 : vector<8x8xi1>
    %cst_8 = arith.constant 0.000000e+00 : f32
    %cst_9 = arith.constant -1.000000e+30 : f32
    %16 = vector.broadcast %cst_8 : f32 to vector<8x8xf32>
    %17 = vector.broadcast %cst_9 : f32 to vector<8x8xf32>
    %18 = arith.select %15, %16, %17 : vector<8x8xi1>, vector<8x8xf32>
    %c0_10 = arith.constant 0 : index
    %c0_11 = arith.constant 0 : index
    %c0_12 = arith.constant 0 : index
    %19 = vector.load %arg5[%c0_10, %c0_11, %c0_12] : memref<1x1x16xf32, #tpu.memory_space<vmem>>, vector<1x1x16xf32>
    %20 = vector.shape_cast %19 : vector<1x1x16xf32> to vector<1x16xf32>
    %cst_13 = arith.constant 0.000000e+00 : f32
    %21 = vector.broadcast %cst_13 : f32 to vector<1x16xf32>
    %22 = arith.cmpf ogt, %20, %21 : vector<1x16xf32>
    %cst_14 = arith.constant 0.000000e+00 : f32
    %cst_15 = arith.constant -1.000000e+30 : f32
    %23 = vector.broadcast %cst_14 : f32 to vector<1x16xf32>
    %24 = vector.broadcast %cst_15 : f32 to vector<1x16xf32>
    %25 = arith.select %22, %23, %24 : vector<1x16xi1>, vector<1x16xf32>
    %c0_16 = arith.constant 0 : index
    %c0_17 = arith.constant 0 : index
    %c0_18 = arith.constant 0 : index
    %c0_19 = arith.constant 0 : index
    %26 = vector.load %arg7[%c0_16, %c0_17, %c0_18, %c0_19] : memref<1x3x1x32xf32, #tpu.memory_space<vmem>>, vector<1x1x1x32xf32>
    %27 = vector.shape_cast %26 : vector<1x1x1x32xf32> to vector<1x32xf32>
    %c0_20 = arith.constant 0 : index
    %c0_21 = arith.constant 0 : index
    %c0_22 = arith.constant 0 : index
    %c0_23 = arith.constant 0 : index
    %28 = vector.load %arg8[%c0_20, %c0_21, %c0_22, %c0_23] : memref<1x3x1x32xf32, #tpu.memory_space<vmem>>, vector<1x1x1x32xf32>
    %29 = vector.shape_cast %28 : vector<1x1x1x32xf32> to vector<1x32xf32>
    %cst_24 = arith.constant dense<0.000000e+00> : vector<8xf32>
    %30 = vector.multi_reduction <add>, %3, %cst_24 [1] : vector<8x32xf32> to vector<8xf32>
    %31 = vector.shape_cast %30 : vector<8xf32> to vector<8x1xf32>
    %cst_25 = arith.constant 3.200000e+01 : f32
    %32 = vector.broadcast %cst_25 : f32 to vector<8x1xf32>
    %33 = arith.divf %31, %32 : vector<8x1xf32>
    %34 = vector.broadcast %33 : vector<8x1xf32> to vector<8x32xf32>
    %35 = arith.subf %3, %34 : vector<8x32xf32>
    %36 = arith.mulf %35, %35 : vector<8x32xf32>
    %cst_26 = arith.constant dense<0.000000e+00> : vector<8xf32>
    %37 = vector.multi_reduction <add>, %36, %cst_26 [1] : vector<8x32xf32> to vector<8xf32>
    %38 = vector.shape_cast %37 : vector<8xf32> to vector<8x1xf32>
    %cst_27 = arith.constant 3.200000e+01 : f32
    %39 = vector.broadcast %cst_27 : f32 to vector<8x1xf32>
    %40 = arith.divf %38, %39 : vector<8x1xf32>
    %41 = vector.broadcast %33 : vector<8x1xf32> to vector<8x32xf32>
    %42 = arith.subf %3, %41 : vector<8x32xf32>
    %cst_28 = arith.constant 9.99999997E-7 : f32
    %43 = vector.broadcast %cst_28 : f32 to vector<8x1xf32>
    %44 = arith.addf %40, %43 : vector<8x1xf32>
    %45 = math.sqrt %44 : vector<8x1xf32>
    %46 = vector.broadcast %45 : vector<8x1xf32> to vector<8x32xf32>
    %47 = arith.divf %42, %46 : vector<8x32xf32>
    %48 = vector.broadcast %27 : vector<1x32xf32> to vector<8x32xf32>
    %49 = arith.mulf %47, %48 : vector<8x32xf32>
    %50 = vector.broadcast %29 : vector<1x32xf32> to vector<8x32xf32>
    %51 = arith.addf %49, %50 : vector<8x32xf32>
    %52 = arith.truncf %51 : vector<8x32xf32> to vector<8x32xbf16>
    %53 = arith.truncf %51 : vector<8x32xf32> to vector<8x32xbf16>
    %c0_29 = arith.constant 0 : index
    %c0_30 = arith.constant 0 : index
    %c0_31 = arith.constant 0 : index
    %c0_32 = arith.constant 0 : index
    %c0_33 = arith.constant 0 : index
    %54 = vector.load %arg9[%c0_29, %c0_30, %c0_31, %c0_32, %c0_33] : memref<1x2x3x32x32xbf16, #tpu.memory_space<vmem>>, vector<1x1x1x32x32xbf16>
    %55 = vector.shape_cast %54 : vector<1x1x1x32x32xbf16> to vector<32x32xbf16>
    %cst_34 = arith.constant dense<0.000000e+00> : vector<8x32xf32>
    %56 = tpu.matmul %53, %55, %cst_34 {dimension_numbers = #tpu.dot_dimension_numbers<[1], [0], [0], [1], [0, 0, 1, 1], [], []>} : vector<8x32xbf16>, vector<32x32xbf16>, vector<8x32xf32> -> vector<8x32xf32>
    %c0_35 = arith.constant 0 : index
    %c0_36 = arith.constant 0 : index
    %c0_37 = arith.constant 0 : index
    %c0_38 = arith.constant 0 : index
    %c0_39 = arith.constant 0 : index
    %57 = vector.load %arg10[%c0_35, %c0_36, %c0_37, %c0_38, %c0_39] : memref<1x2x3x1x32xf32, #tpu.memory_space<vmem>>, vector<1x1x1x1x32xf32>
    %58 = vector.shape_cast %57 : vector<1x1x1x1x32xf32> to vector<1x32xf32>
    %59 = vector.broadcast %58 : vector<1x32xf32> to vector<8x32xf32>
    %60 = arith.addf %56, %59 : vector<8x32xf32>
    %c0_40 = arith.constant 0 : index
    %c0_41 = arith.constant 0 : index
    %c1 = arith.constant 1 : index
    %c0_42 = arith.constant 0 : index
    %c0_43 = arith.constant 0 : index
    %61 = vector.load %arg9[%c0_40, %c0_41, %c1, %c0_42, %c0_43] : memref<1x2x3x32x32xbf16, #tpu.memory_space<vmem>>, vector<1x1x1x32x32xbf16>
    %62 = vector.shape_cast %61 : vector<1x1x1x32x32xbf16> to vector<32x32xbf16>
    %cst_44 = arith.constant dense<0.000000e+00> : vector<8x32xf32>
    %63 = tpu.matmul %52, %62, %cst_44 {dimension_numbers = #tpu.dot_dimension_numbers<[1], [0], [0], [1], [0, 0, 1, 1], [], []>} : vector<8x32xbf16>, vector<32x32xbf16>, vector<8x32xf32> -> vector<8x32xf32>
    %c0_45 = arith.constant 0 : index
    %c0_46 = arith.constant 0 : index
    %c1_47 = arith.constant 1 : index
    %c0_48 = arith.constant 0 : index
    %c0_49 = arith.constant 0 : index
    %64 = vector.load %arg10[%c0_45, %c0_46, %c1_47, %c0_48, %c0_49] : memref<1x2x3x1x32xf32, #tpu.memory_space<vmem>>, vector<1x1x1x1x32xf32>
    %65 = vector.shape_cast %64 : vector<1x1x1x1x32xf32> to vector<1x32xf32>
    %66 = vector.broadcast %65 : vector<1x32xf32> to vector<8x32xf32>
    %67 = arith.addf %63, %66 : vector<8x32xf32>
    %c0_50 = arith.constant 0 : index
    %c0_51 = arith.constant 0 : index
    %c2 = arith.constant 2 : index
    %c0_52 = arith.constant 0 : index
    %c0_53 = arith.constant 0 : index
    %68 = vector.load %arg9[%c0_50, %c0_51, %c2, %c0_52, %c0_53] : memref<1x2x3x32x32xbf16, #tpu.memory_space<vmem>>, vector<1x1x1x32x32xbf16>
    %69 = vector.shape_cast %68 : vector<1x1x1x32x32xbf16> to vector<32x32xbf16>
    %cst_54 = arith.constant dense<0.000000e+00> : vector<8x32xf32>
    %70 = tpu.matmul %52, %69, %cst_54 {dimension_numbers = #tpu.dot_dimension_numbers<[1], [0], [0], [1], [0, 0, 1, 1], [], []>} : vector<8x32xbf16>, vector<32x32xbf16>, vector<8x32xf32> -> vector<8x32xf32>
    %c0_55 = arith.constant 0 : index
    %c0_56 = arith.constant 0 : index
    %c2_57 = arith.constant 2 : index
    %c0_58 = arith.constant 0 : index
    %c0_59 = arith.constant 0 : index
    %71 = vector.load %arg10[%c0_55, %c0_56, %c2_57, %c0_58, %c0_59] : memref<1x2x3x1x32xf32, #tpu.memory_space<vmem>>, vector<1x1x1x1x32xf32>
    %72 = vector.shape_cast %71 : vector<1x1x1x1x32xf32> to vector<1x32xf32>
    %73 = vector.broadcast %72 : vector<1x32xf32> to vector<8x32xf32>
    %74 = arith.addf %70, %73 : vector<8x32xf32>
    %cst_60 = arith.constant 0.353553385 : f32
    %75 = vector.broadcast %cst_60 : f32 to vector<8x32xf32>
    %76 = arith.mulf %60, %75 : vector<8x32xf32>
    %77 = vector.extract_strided_slice %76 {offsets = [0, 0], sizes = [8, 8], strides = [1, 1]} : vector<8x32xf32> to vector<8x8xf32>
    %78 = arith.truncf %77 : vector<8x8xf32> to vector<8x8xbf16>
    %79 = vector.extract_strided_slice %67 {offsets = [0, 0], sizes = [8, 8], strides = [1, 1]} : vector<8x32xf32> to vector<8x8xf32>
    %80 = arith.truncf %79 : vector<8x8xf32> to vector<8x8xbf16>
    %81 = vector.extract_strided_slice %74 {offsets = [0, 0], sizes = [8, 8], strides = [1, 1]} : vector<8x32xf32> to vector<8x8xf32>
    %82 = arith.truncf %81 : vector<8x8xf32> to vector<8x8xbf16>
    %cst_61 = arith.constant dense<0.000000e+00> : vector<8x8xf32>
    %83 = tpu.matmul %78, %80, %cst_61 {dimension_numbers = #tpu.dot_dimension_numbers<[1], [1], [0], [0], [0, 0, 1, 0], [], []>} : vector<8x8xbf16>, vector<8x8xbf16>, vector<8x8xf32> -> vector<8x8xf32>
    %84 = arith.addf %83, %18 : vector<8x8xf32>
    %cst_62 = arith.constant dense<0xFF800000> : vector<8xf32>
    %85 = vector.multi_reduction <maximumf>, %84, %cst_62 [1] : vector<8x8xf32> to vector<8xf32>
    %86 = vector.shape_cast %85 : vector<8xf32> to vector<8x1xf32>
    %87 = vector.broadcast %86 : vector<8x1xf32> to vector<8x8xf32>
    %88 = arith.subf %84, %87 : vector<8x8xf32>
    %89 = math.exp %88 : vector<8x8xf32>
    %cst_63 = arith.constant dense<0.000000e+00> : vector<8xf32>
    %90 = vector.multi_reduction <add>, %89, %cst_63 [1] : vector<8x8xf32> to vector<8xf32>
    %91 = vector.shape_cast %90 : vector<8xf32> to vector<8x1xf32>
    %92 = tpu.reciprocal %91 {approx = true} : vector<8x1xf32> -> vector<8x1xf32>
    %93 = vector.broadcast %92 : vector<8x1xf32> to vector<8x8xf32>
    %94 = arith.mulf %89, %93 : vector<8x8xf32>
    %95 = arith.truncf %94 : vector<8x8xf32> to vector<8x8xbf16>
    %cst_64 = arith.constant dense<0.000000e+00> : vector<8x8xf32>
    %96 = tpu.matmul %95, %82, %cst_64 {dimension_numbers = #tpu.dot_dimension_numbers<[1], [0], [0], [1], [0, 0, 1, 1], [], []>} : vector<8x8xbf16>, vector<8x8xbf16>, vector<8x8xf32> -> vector<8x8xf32>
    %97 = arith.truncf %96 : vector<8x8xf32> to vector<8x8xbf16>
    %c0_65 = arith.constant 0 : index
    %c0_66 = arith.constant 0 : index
    %c0_67 = arith.constant 0 : index
    %c0_68 = arith.constant 0 : index
    %c0_69 = arith.constant 0 : index
    %98 = vector.load %arg11[%c0_65, %c0_66, %c0_67, %c0_68, %c0_69] : memref<1x2x4x8x32xbf16, #tpu.memory_space<vmem>>, vector<1x1x1x8x32xbf16>
    %99 = vector.shape_cast %98 : vector<1x1x1x8x32xbf16> to vector<8x32xbf16>
    %cst_70 = arith.constant dense<0.000000e+00> : vector<8x32xf32>
    %100 = tpu.matmul %97, %99, %cst_70 {dimension_numbers = #tpu.dot_dimension_numbers<[1], [0], [0], [1], [0, 0, 1, 1], [], []>} : vector<8x8xbf16>, vector<8x32xbf16>, vector<8x32xf32> -> vector<8x32xf32>
    %101 = vector.extract_strided_slice %76 {offsets = [0, 8], sizes = [8, 8], strides = [1, 1]} : vector<8x32xf32> to vector<8x8xf32>
    %102 = arith.truncf %101 : vector<8x8xf32> to vector<8x8xbf16>
    %103 = vector.extract_strided_slice %67 {offsets = [0, 8], sizes = [8, 8], strides = [1, 1]} : vector<8x32xf32> to vector<8x8xf32>
    %104 = arith.truncf %103 : vector<8x8xf32> to vector<8x8xbf16>
    %105 = vector.extract_strided_slice %74 {offsets = [0, 8], sizes = [8, 8], strides = [1, 1]} : vector<8x32xf32> to vector<8x8xf32>
    %106 = arith.truncf %105 : vector<8x8xf32> to vector<8x8xbf16>
    %cst_71 = arith.constant dense<0.000000e+00> : vector<8x8xf32>
    %107 = tpu.matmul %102, %104, %cst_71 {dimension_numbers = #tpu.dot_dimension_numbers<[1], [1], [0], [0], [0, 0, 1, 0], [], []>} : vector<8x8xbf16>, vector<8x8xbf16>, vector<8x8xf32> -> vector<8x8xf32>
    %108 = arith.addf %107, %18 : vector<8x8xf32>
    %cst_72 = arith.constant dense<0xFF800000> : vector<8xf32>
    %109 = vector.multi_reduction <maximumf>, %108, %cst_72 [1] : vector<8x8xf32> to vector<8xf32>
    %110 = vector.shape_cast %109 : vector<8xf32> to vector<8x1xf32>
    %111 = vector.broadcast %110 : vector<8x1xf32> to vector<8x8xf32>
    %112 = arith.subf %108, %111 : vector<8x8xf32>
    %113 = math.exp %112 : vector<8x8xf32>
    %cst_73 = arith.constant dense<0.000000e+00> : vector<8xf32>
    %114 = vector.multi_reduction <add>, %113, %cst_73 [1] : vector<8x8xf32> to vector<8xf32>
    %115 = vector.shape_cast %114 : vector<8xf32> to vector<8x1xf32>
    %116 = tpu.reciprocal %115 {approx = true} : vector<8x1xf32> -> vector<8x1xf32>
    %117 = vector.broadcast %116 : vector<8x1xf32> to vector<8x8xf32>
    %118 = arith.mulf %113, %117 : vector<8x8xf32>
    %119 = arith.truncf %118 : vector<8x8xf32> to vector<8x8xbf16>
    %cst_74 = arith.constant dense<0.000000e+00> : vector<8x8xf32>
    %120 = tpu.matmul %119, %106, %cst_74 {dimension_numbers = #tpu.dot_dimension_numbers<[1], [0], [0], [1], [0, 0, 1, 1], [], []>} : vector<8x8xbf16>, vector<8x8xbf16>, vector<8x8xf32> -> vector<8x8xf32>
    %121 = arith.truncf %120 : vector<8x8xf32> to vector<8x8xbf16>
    %c0_75 = arith.constant 0 : index
    %c0_76 = arith.constant 0 : index
    %c1_77 = arith.constant 1 : index
    %c0_78 = arith.constant 0 : index
    %c0_79 = arith.constant 0 : index
    %122 = vector.load %arg11[%c0_75, %c0_76, %c1_77, %c0_78, %c0_79] : memref<1x2x4x8x32xbf16, #tpu.memory_space<vmem>>, vector<1x1x1x8x32xbf16>
    %123 = vector.shape_cast %122 : vector<1x1x1x8x32xbf16> to vector<8x32xbf16>
    %cst_80 = arith.constant dense<0.000000e+00> : vector<8x32xf32>
    %124 = tpu.matmul %121, %123, %cst_80 {dimension_numbers = #tpu.dot_dimension_numbers<[1], [0], [0], [1], [0, 0, 1, 1], [], []>} : vector<8x8xbf16>, vector<8x32xbf16>, vector<8x32xf32> -> vector<8x32xf32>
    %125 = arith.addf %100, %124 : vector<8x32xf32>
    %126 = vector.extract_strided_slice %76 {offsets = [0, 16], sizes = [8, 8], strides = [1, 1]} : vector<8x32xf32> to vector<8x8xf32>
    %127 = arith.truncf %126 : vector<8x8xf32> to vector<8x8xbf16>
    %128 = vector.extract_strided_slice %67 {offsets = [0, 16], sizes = [8, 8], strides = [1, 1]} : vector<8x32xf32> to vector<8x8xf32>
    %129 = arith.truncf %128 : vector<8x8xf32> to vector<8x8xbf16>
    %130 = vector.extract_strided_slice %74 {offsets = [0, 16], sizes = [8, 8], strides = [1, 1]} : vector<8x32xf32> to vector<8x8xf32>
    %131 = arith.truncf %130 : vector<8x8xf32> to vector<8x8xbf16>
    %cst_81 = arith.constant dense<0.000000e+00> : vector<8x8xf32>
    %132 = tpu.matmul %127, %129, %cst_81 {dimension_numbers = #tpu.dot_dimension_numbers<[1], [1], [0], [0], [0, 0, 1, 0], [], []>} : vector<8x8xbf16>, vector<8x8xbf16>, vector<8x8xf32> -> vector<8x8xf32>
    %133 = arith.addf %132, %18 : vector<8x8xf32>
    %cst_82 = arith.constant dense<0xFF800000> : vector<8xf32>
    %134 = vector.multi_reduction <maximumf>, %133, %cst_82 [1] : vector<8x8xf32> to vector<8xf32>
    %135 = vector.shape_cast %134 : vector<8xf32> to vector<8x1xf32>
    %136 = vector.broadcast %135 : vector<8x1xf32> to vector<8x8xf32>
    %137 = arith.subf %133, %136 : vector<8x8xf32>
    %138 = math.exp %137 : vector<8x8xf32>
    %cst_83 = arith.constant dense<0.000000e+00> : vector<8xf32>
    %139 = vector.multi_reduction <add>, %138, %cst_83 [1] : vector<8x8xf32> to vector<8xf32>
    %140 = vector.shape_cast %139 : vector<8xf32> to vector<8x1xf32>
    %141 = tpu.reciprocal %140 {approx = true} : vector<8x1xf32> -> vector<8x1xf32>
    %142 = vector.broadcast %141 : vector<8x1xf32> to vector<8x8xf32>
    %143 = arith.mulf %138, %142 : vector<8x8xf32>
    %144 = arith.truncf %143 : vector<8x8xf32> to vector<8x8xbf16>
    %cst_84 = arith.constant dense<0.000000e+00> : vector<8x8xf32>
    %145 = tpu.matmul %144, %131, %cst_84 {dimension_numbers = #tpu.dot_dimension_numbers<[1], [0], [0], [1], [0, 0, 1, 1], [], []>} : vector<8x8xbf16>, vector<8x8xbf16>, vector<8x8xf32> -> vector<8x8xf32>
    %146 = arith.truncf %145 : vector<8x8xf32> to vector<8x8xbf16>
    %c0_85 = arith.constant 0 : index
    %c0_86 = arith.constant 0 : index
    %c2_87 = arith.constant 2 : index
    %c0_88 = arith.constant 0 : index
    %c0_89 = arith.constant 0 : index
    %147 = vector.load %arg11[%c0_85, %c0_86, %c2_87, %c0_88, %c0_89] : memref<1x2x4x8x32xbf16, #tpu.memory_space<vmem>>, vector<1x1x1x8x32xbf16>
    %148 = vector.shape_cast %147 : vector<1x1x1x8x32xbf16> to vector<8x32xbf16>
    %cst_90 = arith.constant dense<0.000000e+00> : vector<8x32xf32>
    %149 = tpu.matmul %146, %148, %cst_90 {dimension_numbers = #tpu.dot_dimension_numbers<[1], [0], [0], [1], [0, 0, 1, 1], [], []>} : vector<8x8xbf16>, vector<8x32xbf16>, vector<8x32xf32> -> vector<8x32xf32>
    %150 = arith.addf %125, %149 : vector<8x32xf32>
    %151 = vector.extract_strided_slice %76 {offsets = [0, 24], sizes = [8, 8], strides = [1, 1]} : vector<8x32xf32> to vector<8x8xf32>
    %152 = arith.truncf %151 : vector<8x8xf32> to vector<8x8xbf16>
    %153 = vector.extract_strided_slice %67 {offsets = [0, 24], sizes = [8, 8], strides = [1, 1]} : vector<8x32xf32> to vector<8x8xf32>
    %154 = arith.truncf %153 : vector<8x8xf32> to vector<8x8xbf16>
    %155 = vector.extract_strided_slice %74 {offsets = [0, 24], sizes = [8, 8], strides = [1, 1]} : vector<8x32xf32> to vector<8x8xf32>
    %156 = arith.truncf %155 : vector<8x8xf32> to vector<8x8xbf16>
    %cst_91 = arith.constant dense<0.000000e+00> : vector<8x8xf32>
    %157 = tpu.matmul %152, %154, %cst_91 {dimension_numbers = #tpu.dot_dimension_numbers<[1], [1], [0], [0], [0, 0, 1, 0], [], []>} : vector<8x8xbf16>, vector<8x8xbf16>, vector<8x8xf32> -> vector<8x8xf32>
    %158 = arith.addf %157, %18 : vector<8x8xf32>
    %cst_92 = arith.constant dense<0xFF800000> : vector<8xf32>
    %159 = vector.multi_reduction <maximumf>, %158, %cst_92 [1] : vector<8x8xf32> to vector<8xf32>
    %160 = vector.shape_cast %159 : vector<8xf32> to vector<8x1xf32>
    %161 = vector.broadcast %160 : vector<8x1xf32> to vector<8x8xf32>
    %162 = arith.subf %158, %161 : vector<8x8xf32>
    %163 = math.exp %162 : vector<8x8xf32>
    %cst_93 = arith.constant dense<0.000000e+00> : vector<8xf32>
    %164 = vector.multi_reduction <add>, %163, %cst_93 [1] : vector<8x8xf32> to vector<8xf32>
    %165 = vector.shape_cast %164 : vector<8xf32> to vector<8x1xf32>
    %166 = tpu.reciprocal %165 {approx = true} : vector<8x1xf32> -> vector<8x1xf32>
    %167 = vector.broadcast %166 : vector<8x1xf32> to vector<8x8xf32>
    %168 = arith.mulf %163, %167 : vector<8x8xf32>
    %169 = arith.truncf %168 : vector<8x8xf32> to vector<8x8xbf16>
    %cst_94 = arith.constant dense<0.000000e+00> : vector<8x8xf32>
    %170 = tpu.matmul %169, %156, %cst_94 {dimension_numbers = #tpu.dot_dimension_numbers<[1], [0], [0], [1], [0, 0, 1, 1], [], []>} : vector<8x8xbf16>, vector<8x8xbf16>, vector<8x8xf32> -> vector<8x8xf32>
    %171 = arith.truncf %170 : vector<8x8xf32> to vector<8x8xbf16>
    %c0_95 = arith.constant 0 : index
    %c0_96 = arith.constant 0 : index
    %c3 = arith.constant 3 : index
    %c0_97 = arith.constant 0 : index
    %c0_98 = arith.constant 0 : index
    %172 = vector.load %arg11[%c0_95, %c0_96, %c3, %c0_97, %c0_98] : memref<1x2x4x8x32xbf16, #tpu.memory_space<vmem>>, vector<1x1x1x8x32xbf16>
    %173 = vector.shape_cast %172 : vector<1x1x1x8x32xbf16> to vector<8x32xbf16>
    %cst_99 = arith.constant dense<0.000000e+00> : vector<8x32xf32>
    %174 = tpu.matmul %171, %173, %cst_99 {dimension_numbers = #tpu.dot_dimension_numbers<[1], [0], [0], [1], [0, 0, 1, 1], [], []>} : vector<8x8xbf16>, vector<8x32xbf16>, vector<8x32xf32> -> vector<8x32xf32>
    %175 = arith.addf %150, %174 : vector<8x32xf32>
    %c0_100 = arith.constant 0 : index
    %c0_101 = arith.constant 0 : index
    %c0_102 = arith.constant 0 : index
    %c0_103 = arith.constant 0 : index
    %176 = vector.load %arg12[%c0_100, %c0_101, %c0_102, %c0_103] : memref<1x2x1x32xf32, #tpu.memory_space<vmem>>, vector<1x1x1x32xf32>
    %177 = vector.shape_cast %176 : vector<1x1x1x32xf32> to vector<1x32xf32>
    %178 = vector.broadcast %177 : vector<1x32xf32> to vector<8x32xf32>
    %179 = arith.addf %175, %178 : vector<8x32xf32>
    %180 = arith.addf %3, %179 : vector<8x32xf32>
    %c0_104 = arith.constant 0 : index
    %c1_105 = arith.constant 1 : index
    %c0_106 = arith.constant 0 : index
    %c0_107 = arith.constant 0 : index
    %181 = vector.load %arg7[%c0_104, %c1_105, %c0_106, %c0_107] : memref<1x3x1x32xf32, #tpu.memory_space<vmem>>, vector<1x1x1x32xf32>
    %182 = vector.shape_cast %181 : vector<1x1x1x32xf32> to vector<1x32xf32>
    %c0_108 = arith.constant 0 : index
    %c1_109 = arith.constant 1 : index
    %c0_110 = arith.constant 0 : index
    %c0_111 = arith.constant 0 : index
    %183 = vector.load %arg8[%c0_108, %c1_109, %c0_110, %c0_111] : memref<1x3x1x32xf32, #tpu.memory_space<vmem>>, vector<1x1x1x32xf32>
    %184 = vector.shape_cast %183 : vector<1x1x1x32xf32> to vector<1x32xf32>
    %cst_112 = arith.constant dense<0.000000e+00> : vector<8xf32>
    %185 = vector.multi_reduction <add>, %180, %cst_112 [1] : vector<8x32xf32> to vector<8xf32>
    %186 = vector.shape_cast %185 : vector<8xf32> to vector<8x1xf32>
    %cst_113 = arith.constant 3.200000e+01 : f32
    %187 = vector.broadcast %cst_113 : f32 to vector<8x1xf32>
    %188 = arith.divf %186, %187 : vector<8x1xf32>
    %189 = vector.broadcast %188 : vector<8x1xf32> to vector<8x32xf32>
    %190 = arith.subf %180, %189 : vector<8x32xf32>
    %191 = arith.mulf %190, %190 : vector<8x32xf32>
    %cst_114 = arith.constant dense<0.000000e+00> : vector<8xf32>
    %192 = vector.multi_reduction <add>, %191, %cst_114 [1] : vector<8x32xf32> to vector<8xf32>
    %193 = vector.shape_cast %192 : vector<8xf32> to vector<8x1xf32>
    %cst_115 = arith.constant 3.200000e+01 : f32
    %194 = vector.broadcast %cst_115 : f32 to vector<8x1xf32>
    %195 = arith.divf %193, %194 : vector<8x1xf32>
    %196 = vector.broadcast %188 : vector<8x1xf32> to vector<8x32xf32>
    %197 = arith.subf %180, %196 : vector<8x32xf32>
    %cst_116 = arith.constant 9.99999997E-7 : f32
    %198 = vector.broadcast %cst_116 : f32 to vector<8x1xf32>
    %199 = arith.addf %195, %198 : vector<8x1xf32>
    %200 = math.sqrt %199 : vector<8x1xf32>
    %201 = vector.broadcast %200 : vector<8x1xf32> to vector<8x32xf32>
    %202 = arith.divf %197, %201 : vector<8x32xf32>
    %203 = vector.broadcast %182 : vector<1x32xf32> to vector<8x32xf32>
    %204 = arith.mulf %202, %203 : vector<8x32xf32>
    %205 = vector.broadcast %184 : vector<1x32xf32> to vector<8x32xf32>
    %206 = arith.addf %204, %205 : vector<8x32xf32>
    %207 = arith.truncf %206 : vector<8x32xf32> to vector<8x32xbf16>
    %c0_117 = arith.constant 0 : index
    %c1_118 = arith.constant 1 : index
    %c0_119 = arith.constant 0 : index
    %c0_120 = arith.constant 0 : index
    %c0_121 = arith.constant 0 : index
    %208 = vector.load %arg9[%c0_117, %c1_118, %c0_119, %c0_120, %c0_121] : memref<1x2x3x32x32xbf16, #tpu.memory_space<vmem>>, vector<1x1x1x32x32xbf16>
    %209 = vector.shape_cast %208 : vector<1x1x1x32x32xbf16> to vector<32x32xbf16>
    %cst_122 = arith.constant dense<0.000000e+00> : vector<8x32xf32>
    %210 = tpu.matmul %207, %209, %cst_122 {dimension_numbers = #tpu.dot_dimension_numbers<[1], [0], [0], [1], [0, 0, 1, 1], [], []>} : vector<8x32xbf16>, vector<32x32xbf16>, vector<8x32xf32> -> vector<8x32xf32>
    %c0_123 = arith.constant 0 : index
    %c1_124 = arith.constant 1 : index
    %c0_125 = arith.constant 0 : index
    %c0_126 = arith.constant 0 : index
    %c0_127 = arith.constant 0 : index
    %211 = vector.load %arg10[%c0_123, %c1_124, %c0_125, %c0_126, %c0_127] : memref<1x2x3x1x32xf32, #tpu.memory_space<vmem>>, vector<1x1x1x1x32xf32>
    %212 = vector.shape_cast %211 : vector<1x1x1x1x32xf32> to vector<1x32xf32>
    %213 = vector.broadcast %212 : vector<1x32xf32> to vector<8x32xf32>
    %214 = arith.addf %210, %213 : vector<8x32xf32>
    %c0_128 = arith.constant 0 : index
    %c1_129 = arith.constant 1 : index
    %c1_130 = arith.constant 1 : index
    %c0_131 = arith.constant 0 : index
    %c0_132 = arith.constant 0 : index
    %215 = vector.load %arg9[%c0_128, %c1_129, %c1_130, %c0_131, %c0_132] : memref<1x2x3x32x32xbf16, #tpu.memory_space<vmem>>, vector<1x1x1x32x32xbf16>
    %216 = vector.shape_cast %215 : vector<1x1x1x32x32xbf16> to vector<32x32xbf16>
    %cst_133 = arith.constant dense<0.000000e+00> : vector<16x32xf32>
    %217 = tpu.matmul %6, %216, %cst_133 {dimension_numbers = #tpu.dot_dimension_numbers<[1], [0], [0], [1], [0, 0, 1, 1], [], []>} : vector<16x32xbf16>, vector<32x32xbf16>, vector<16x32xf32> -> vector<16x32xf32>
    %c0_134 = arith.constant 0 : index
    %c1_135 = arith.constant 1 : index
    %c1_136 = arith.constant 1 : index
    %c0_137 = arith.constant 0 : index
    %c0_138 = arith.constant 0 : index
    %218 = vector.load %arg10[%c0_134, %c1_135, %c1_136, %c0_137, %c0_138] : memref<1x2x3x1x32xf32, #tpu.memory_space<vmem>>, vector<1x1x1x1x32xf32>
    %219 = vector.shape_cast %218 : vector<1x1x1x1x32xf32> to vector<1x32xf32>
    %220 = vector.broadcast %219 : vector<1x32xf32> to vector<16x32xf32>
    %221 = arith.addf %217, %220 : vector<16x32xf32>
    %c0_139 = arith.constant 0 : index
    %c1_140 = arith.constant 1 : index
    %c2_141 = arith.constant 2 : index
    %c0_142 = arith.constant 0 : index
    %c0_143 = arith.constant 0 : index
    %222 = vector.load %arg9[%c0_139, %c1_140, %c2_141, %c0_142, %c0_143] : memref<1x2x3x32x32xbf16, #tpu.memory_space<vmem>>, vector<1x1x1x32x32xbf16>
    %223 = vector.shape_cast %222 : vector<1x1x1x32x32xbf16> to vector<32x32xbf16>
    %cst_144 = arith.constant dense<0.000000e+00> : vector<16x32xf32>
    %224 = tpu.matmul %6, %223, %cst_144 {dimension_numbers = #tpu.dot_dimension_numbers<[1], [0], [0], [1], [0, 0, 1, 1], [], []>} : vector<16x32xbf16>, vector<32x32xbf16>, vector<16x32xf32> -> vector<16x32xf32>
    %c0_145 = arith.constant 0 : index
    %c1_146 = arith.constant 1 : index
    %c2_147 = arith.constant 2 : index
    %c0_148 = arith.constant 0 : index
    %c0_149 = arith.constant 0 : index
    %225 = vector.load %arg10[%c0_145, %c1_146, %c2_147, %c0_148, %c0_149] : memref<1x2x3x1x32xf32, #tpu.memory_space<vmem>>, vector<1x1x1x1x32xf32>
    %226 = vector.shape_cast %225 : vector<1x1x1x1x32xf32> to vector<1x32xf32>
    %227 = vector.broadcast %226 : vector<1x32xf32> to vector<16x32xf32>
    %228 = arith.addf %224, %227 : vector<16x32xf32>
    %cst_150 = arith.constant 0.353553385 : f32
    %229 = vector.broadcast %cst_150 : f32 to vector<8x32xf32>
    %230 = arith.mulf %214, %229 : vector<8x32xf32>
    %231 = vector.extract_strided_slice %230 {offsets = [0, 0], sizes = [8, 8], strides = [1, 1]} : vector<8x32xf32> to vector<8x8xf32>
    %232 = arith.truncf %231 : vector<8x8xf32> to vector<8x8xbf16>
    %233 = vector.extract_strided_slice %221 {offsets = [0, 0], sizes = [16, 8], strides = [1, 1]} : vector<16x32xf32> to vector<16x8xf32>
    %234 = arith.truncf %233 : vector<16x8xf32> to vector<16x8xbf16>
    %235 = vector.extract_strided_slice %228 {offsets = [0, 0], sizes = [16, 8], strides = [1, 1]} : vector<16x32xf32> to vector<16x8xf32>
    %236 = arith.truncf %235 : vector<16x8xf32> to vector<16x8xbf16>
    %cst_151 = arith.constant dense<0.000000e+00> : vector<8x16xf32>
    %237 = tpu.matmul %232, %234, %cst_151 {dimension_numbers = #tpu.dot_dimension_numbers<[1], [1], [0], [0], [0, 0, 1, 0], [], []>} : vector<8x8xbf16>, vector<16x8xbf16>, vector<8x16xf32> -> vector<8x16xf32>
    %238 = vector.broadcast %25 : vector<1x16xf32> to vector<8x16xf32>
    %239 = arith.addf %237, %238 : vector<8x16xf32>
    %cst_152 = arith.constant dense<0xFF800000> : vector<8xf32>
    %240 = vector.multi_reduction <maximumf>, %239, %cst_152 [1] : vector<8x16xf32> to vector<8xf32>
    %241 = vector.shape_cast %240 : vector<8xf32> to vector<8x1xf32>
    %242 = vector.broadcast %241 : vector<8x1xf32> to vector<8x16xf32>
    %243 = arith.subf %239, %242 : vector<8x16xf32>
    %244 = math.exp %243 : vector<8x16xf32>
    %cst_153 = arith.constant dense<0.000000e+00> : vector<8xf32>
    %245 = vector.multi_reduction <add>, %244, %cst_153 [1] : vector<8x16xf32> to vector<8xf32>
    %246 = vector.shape_cast %245 : vector<8xf32> to vector<8x1xf32>
    %247 = tpu.reciprocal %246 {approx = true} : vector<8x1xf32> -> vector<8x1xf32>
    %248 = vector.broadcast %247 : vector<8x1xf32> to vector<8x16xf32>
    %249 = arith.mulf %244, %248 : vector<8x16xf32>
    %250 = arith.truncf %249 : vector<8x16xf32> to vector<8x16xbf16>
    %cst_154 = arith.constant dense<0.000000e+00> : vector<8x8xf32>
    %251 = tpu.matmul %250, %236, %cst_154 {dimension_numbers = #tpu.dot_dimension_numbers<[1], [0], [0], [1], [0, 0, 1, 1], [], []>} : vector<8x16xbf16>, vector<16x8xbf16>, vector<8x8xf32> -> vector<8x8xf32>
    %252 = arith.truncf %251 : vector<8x8xf32> to vector<8x8xbf16>
    %c0_155 = arith.constant 0 : index
    %c1_156 = arith.constant 1 : index
    %c0_157 = arith.constant 0 : index
    %c0_158 = arith.constant 0 : index
    %c0_159 = arith.constant 0 : index
    %253 = vector.load %arg11[%c0_155, %c1_156, %c0_157, %c0_158, %c0_159] : memref<1x2x4x8x32xbf16, #tpu.memory_space<vmem>>, vector<1x1x1x8x32xbf16>
    %254 = vector.shape_cast %253 : vector<1x1x1x8x32xbf16> to vector<8x32xbf16>
    %cst_160 = arith.constant dense<0.000000e+00> : vector<8x32xf32>
    %255 = tpu.matmul %252, %254, %cst_160 {dimension_numbers = #tpu.dot_dimension_numbers<[1], [0], [0], [1], [0, 0, 1, 1], [], []>} : vector<8x8xbf16>, vector<8x32xbf16>, vector<8x32xf32> -> vector<8x32xf32>
    %256 = vector.extract_strided_slice %230 {offsets = [0, 8], sizes = [8, 8], strides = [1, 1]} : vector<8x32xf32> to vector<8x8xf32>
    %257 = arith.truncf %256 : vector<8x8xf32> to vector<8x8xbf16>
    %258 = vector.extract_strided_slice %221 {offsets = [0, 8], sizes = [16, 8], strides = [1, 1]} : vector<16x32xf32> to vector<16x8xf32>
    %259 = arith.truncf %258 : vector<16x8xf32> to vector<16x8xbf16>
    %260 = vector.extract_strided_slice %228 {offsets = [0, 8], sizes = [16, 8], strides = [1, 1]} : vector<16x32xf32> to vector<16x8xf32>
    %261 = arith.truncf %260 : vector<16x8xf32> to vector<16x8xbf16>
    %cst_161 = arith.constant dense<0.000000e+00> : vector<8x16xf32>
    %262 = tpu.matmul %257, %259, %cst_161 {dimension_numbers = #tpu.dot_dimension_numbers<[1], [1], [0], [0], [0, 0, 1, 0], [], []>} : vector<8x8xbf16>, vector<16x8xbf16>, vector<8x16xf32> -> vector<8x16xf32>
    %263 = vector.broadcast %25 : vector<1x16xf32> to vector<8x16xf32>
    %264 = arith.addf %262, %263 : vector<8x16xf32>
    %cst_162 = arith.constant dense<0xFF800000> : vector<8xf32>
    %265 = vector.multi_reduction <maximumf>, %264, %cst_162 [1] : vector<8x16xf32> to vector<8xf32>
    %266 = vector.shape_cast %265 : vector<8xf32> to vector<8x1xf32>
    %267 = vector.broadcast %266 : vector<8x1xf32> to vector<8x16xf32>
    %268 = arith.subf %264, %267 : vector<8x16xf32>
    %269 = math.exp %268 : vector<8x16xf32>
    %cst_163 = arith.constant dense<0.000000e+00> : vector<8xf32>
    %270 = vector.multi_reduction <add>, %269, %cst_163 [1] : vector<8x16xf32> to vector<8xf32>
    %271 = vector.shape_cast %270 : vector<8xf32> to vector<8x1xf32>
    %272 = tpu.reciprocal %271 {approx = true} : vector<8x1xf32> -> vector<8x1xf32>
    %273 = vector.broadcast %272 : vector<8x1xf32> to vector<8x16xf32>
    %274 = arith.mulf %269, %273 : vector<8x16xf32>
    %275 = arith.truncf %274 : vector<8x16xf32> to vector<8x16xbf16>
    %cst_164 = arith.constant dense<0.000000e+00> : vector<8x8xf32>
    %276 = tpu.matmul %275, %261, %cst_164 {dimension_numbers = #tpu.dot_dimension_numbers<[1], [0], [0], [1], [0, 0, 1, 1], [], []>} : vector<8x16xbf16>, vector<16x8xbf16>, vector<8x8xf32> -> vector<8x8xf32>
    %277 = arith.truncf %276 : vector<8x8xf32> to vector<8x8xbf16>
    %c0_165 = arith.constant 0 : index
    %c1_166 = arith.constant 1 : index
    %c1_167 = arith.constant 1 : index
    %c0_168 = arith.constant 0 : index
    %c0_169 = arith.constant 0 : index
    %278 = vector.load %arg11[%c0_165, %c1_166, %c1_167, %c0_168, %c0_169] : memref<1x2x4x8x32xbf16, #tpu.memory_space<vmem>>, vector<1x1x1x8x32xbf16>
    %279 = vector.shape_cast %278 : vector<1x1x1x8x32xbf16> to vector<8x32xbf16>
    %cst_170 = arith.constant dense<0.000000e+00> : vector<8x32xf32>
    %280 = tpu.matmul %277, %279, %cst_170 {dimension_numbers = #tpu.dot_dimension_numbers<[1], [0], [0], [1], [0, 0, 1, 1], [], []>} : vector<8x8xbf16>, vector<8x32xbf16>, vector<8x32xf32> -> vector<8x32xf32>
    %281 = arith.addf %255, %280 : vector<8x32xf32>
    %282 = vector.extract_strided_slice %230 {offsets = [0, 16], sizes = [8, 8], strides = [1, 1]} : vector<8x32xf32> to vector<8x8xf32>
    %283 = arith.truncf %282 : vector<8x8xf32> to vector<8x8xbf16>
    %284 = vector.extract_strided_slice %221 {offsets = [0, 16], sizes = [16, 8], strides = [1, 1]} : vector<16x32xf32> to vector<16x8xf32>
    %285 = arith.truncf %284 : vector<16x8xf32> to vector<16x8xbf16>
    %286 = vector.extract_strided_slice %228 {offsets = [0, 16], sizes = [16, 8], strides = [1, 1]} : vector<16x32xf32> to vector<16x8xf32>
    %287 = arith.truncf %286 : vector<16x8xf32> to vector<16x8xbf16>
    %cst_171 = arith.constant dense<0.000000e+00> : vector<8x16xf32>
    %288 = tpu.matmul %283, %285, %cst_171 {dimension_numbers = #tpu.dot_dimension_numbers<[1], [1], [0], [0], [0, 0, 1, 0], [], []>} : vector<8x8xbf16>, vector<16x8xbf16>, vector<8x16xf32> -> vector<8x16xf32>
    %289 = vector.broadcast %25 : vector<1x16xf32> to vector<8x16xf32>
    %290 = arith.addf %288, %289 : vector<8x16xf32>
    %cst_172 = arith.constant dense<0xFF800000> : vector<8xf32>
    %291 = vector.multi_reduction <maximumf>, %290, %cst_172 [1] : vector<8x16xf32> to vector<8xf32>
    %292 = vector.shape_cast %291 : vector<8xf32> to vector<8x1xf32>
    %293 = vector.broadcast %292 : vector<8x1xf32> to vector<8x16xf32>
    %294 = arith.subf %290, %293 : vector<8x16xf32>
    %295 = math.exp %294 : vector<8x16xf32>
    %cst_173 = arith.constant dense<0.000000e+00> : vector<8xf32>
    %296 = vector.multi_reduction <add>, %295, %cst_173 [1] : vector<8x16xf32> to vector<8xf32>
    %297 = vector.shape_cast %296 : vector<8xf32> to vector<8x1xf32>
    %298 = tpu.reciprocal %297 {approx = true} : vector<8x1xf32> -> vector<8x1xf32>
    %299 = vector.broadcast %298 : vector<8x1xf32> to vector<8x16xf32>
    %300 = arith.mulf %295, %299 : vector<8x16xf32>
    %301 = arith.truncf %300 : vector<8x16xf32> to vector<8x16xbf16>
    %cst_174 = arith.constant dense<0.000000e+00> : vector<8x8xf32>
    %302 = tpu.matmul %301, %287, %cst_174 {dimension_numbers = #tpu.dot_dimension_numbers<[1], [0], [0], [1], [0, 0, 1, 1], [], []>} : vector<8x16xbf16>, vector<16x8xbf16>, vector<8x8xf32> -> vector<8x8xf32>
    %303 = arith.truncf %302 : vector<8x8xf32> to vector<8x8xbf16>
    %c0_175 = arith.constant 0 : index
    %c1_176 = arith.constant 1 : index
    %c2_177 = arith.constant 2 : index
    %c0_178 = arith.constant 0 : index
    %c0_179 = arith.constant 0 : index
    %304 = vector.load %arg11[%c0_175, %c1_176, %c2_177, %c0_178, %c0_179] : memref<1x2x4x8x32xbf16, #tpu.memory_space<vmem>>, vector<1x1x1x8x32xbf16>
    %305 = vector.shape_cast %304 : vector<1x1x1x8x32xbf16> to vector<8x32xbf16>
    %cst_180 = arith.constant dense<0.000000e+00> : vector<8x32xf32>
    %306 = tpu.matmul %303, %305, %cst_180 {dimension_numbers = #tpu.dot_dimension_numbers<[1], [0], [0], [1], [0, 0, 1, 1], [], []>} : vector<8x8xbf16>, vector<8x32xbf16>, vector<8x32xf32> -> vector<8x32xf32>
    %307 = arith.addf %281, %306 : vector<8x32xf32>
    %308 = vector.extract_strided_slice %230 {offsets = [0, 24], sizes = [8, 8], strides = [1, 1]} : vector<8x32xf32> to vector<8x8xf32>
    %309 = arith.truncf %308 : vector<8x8xf32> to vector<8x8xbf16>
    %310 = vector.extract_strided_slice %221 {offsets = [0, 24], sizes = [16, 8], strides = [1, 1]} : vector<16x32xf32> to vector<16x8xf32>
    %311 = arith.truncf %310 : vector<16x8xf32> to vector<16x8xbf16>
    %312 = vector.extract_strided_slice %228 {offsets = [0, 24], sizes = [16, 8], strides = [1, 1]} : vector<16x32xf32> to vector<16x8xf32>
    %313 = arith.truncf %312 : vector<16x8xf32> to vector<16x8xbf16>
    %cst_181 = arith.constant dense<0.000000e+00> : vector<8x16xf32>
    %314 = tpu.matmul %309, %311, %cst_181 {dimension_numbers = #tpu.dot_dimension_numbers<[1], [1], [0], [0], [0, 0, 1, 0], [], []>} : vector<8x8xbf16>, vector<16x8xbf16>, vector<8x16xf32> -> vector<8x16xf32>
    %315 = vector.broadcast %25 : vector<1x16xf32> to vector<8x16xf32>
    %316 = arith.addf %314, %315 : vector<8x16xf32>
    %cst_182 = arith.constant dense<0xFF800000> : vector<8xf32>
    %317 = vector.multi_reduction <maximumf>, %316, %cst_182 [1] : vector<8x16xf32> to vector<8xf32>
    %318 = vector.shape_cast %317 : vector<8xf32> to vector<8x1xf32>
    %319 = vector.broadcast %318 : vector<8x1xf32> to vector<8x16xf32>
    %320 = arith.subf %316, %319 : vector<8x16xf32>
    %321 = math.exp %320 : vector<8x16xf32>
    %cst_183 = arith.constant dense<0.000000e+00> : vector<8xf32>
    %322 = vector.multi_reduction <add>, %321, %cst_183 [1] : vector<8x16xf32> to vector<8xf32>
    %323 = vector.shape_cast %322 : vector<8xf32> to vector<8x1xf32>
    %324 = tpu.reciprocal %323 {approx = true} : vector<8x1xf32> -> vector<8x1xf32>
    %325 = vector.broadcast %324 : vector<8x1xf32> to vector<8x16xf32>
    %326 = arith.mulf %321, %325 : vector<8x16xf32>
    %327 = arith.truncf %326 : vector<8x16xf32> to vector<8x16xbf16>
    %cst_184 = arith.constant dense<0.000000e+00> : vector<8x8xf32>
    %328 = tpu.matmul %327, %313, %cst_184 {dimension_numbers = #tpu.dot_dimension_numbers<[1], [0], [0], [1], [0, 0, 1, 1], [], []>} : vector<8x16xbf16>, vector<16x8xbf16>, vector<8x8xf32> -> vector<8x8xf32>
    %329 = arith.truncf %328 : vector<8x8xf32> to vector<8x8xbf16>
    %c0_185 = arith.constant 0 : index
    %c1_186 = arith.constant 1 : index
    %c3_187 = arith.constant 3 : index
    %c0_188 = arith.constant 0 : index
    %c0_189 = arith.constant 0 : index
    %330 = vector.load %arg11[%c0_185, %c1_186, %c3_187, %c0_188, %c0_189] : memref<1x2x4x8x32xbf16, #tpu.memory_space<vmem>>, vector<1x1x1x8x32xbf16>
    %331 = vector.shape_cast %330 : vector<1x1x1x8x32xbf16> to vector<8x32xbf16>
    %cst_190 = arith.constant dense<0.000000e+00> : vector<8x32xf32>
    %332 = tpu.matmul %329, %331, %cst_190 {dimension_numbers = #tpu.dot_dimension_numbers<[1], [0], [0], [1], [0, 0, 1, 1], [], []>} : vector<8x8xbf16>, vector<8x32xbf16>, vector<8x32xf32> -> vector<8x32xf32>
    %333 = arith.addf %307, %332 : vector<8x32xf32>
    %c0_191 = arith.constant 0 : index
    %c1_192 = arith.constant 1 : index
    %c0_193 = arith.constant 0 : index
    %c0_194 = arith.constant 0 : index
    %334 = vector.load %arg12[%c0_191, %c1_192, %c0_193, %c0_194] : memref<1x2x1x32xf32, #tpu.memory_space<vmem>>, vector<1x1x1x32xf32>
    %335 = vector.shape_cast %334 : vector<1x1x1x32xf32> to vector<1x32xf32>
    %336 = vector.broadcast %335 : vector<1x32xf32> to vector<8x32xf32>
    %337 = arith.addf %333, %336 : vector<8x32xf32>
    %338 = arith.addf %180, %337 : vector<8x32xf32>
    %c0_195 = arith.constant 0 : index
    %c2_196 = arith.constant 2 : index
    %c0_197 = arith.constant 0 : index
    %c0_198 = arith.constant 0 : index
    %339 = vector.load %arg7[%c0_195, %c2_196, %c0_197, %c0_198] : memref<1x3x1x32xf32, #tpu.memory_space<vmem>>, vector<1x1x1x32xf32>
    %340 = vector.shape_cast %339 : vector<1x1x1x32xf32> to vector<1x32xf32>
    %c0_199 = arith.constant 0 : index
    %c2_200 = arith.constant 2 : index
    %c0_201 = arith.constant 0 : index
    %c0_202 = arith.constant 0 : index
    %341 = vector.load %arg8[%c0_199, %c2_200, %c0_201, %c0_202] : memref<1x3x1x32xf32, #tpu.memory_space<vmem>>, vector<1x1x1x32xf32>
    %342 = vector.shape_cast %341 : vector<1x1x1x32xf32> to vector<1x32xf32>
    %cst_203 = arith.constant dense<0.000000e+00> : vector<8xf32>
    %343 = vector.multi_reduction <add>, %338, %cst_203 [1] : vector<8x32xf32> to vector<8xf32>
    %344 = vector.shape_cast %343 : vector<8xf32> to vector<8x1xf32>
    %cst_204 = arith.constant 3.200000e+01 : f32
    %345 = vector.broadcast %cst_204 : f32 to vector<8x1xf32>
    %346 = arith.divf %344, %345 : vector<8x1xf32>
    %347 = vector.broadcast %346 : vector<8x1xf32> to vector<8x32xf32>
    %348 = arith.subf %338, %347 : vector<8x32xf32>
    %349 = arith.mulf %348, %348 : vector<8x32xf32>
    %cst_205 = arith.constant dense<0.000000e+00> : vector<8xf32>
    %350 = vector.multi_reduction <add>, %349, %cst_205 [1] : vector<8x32xf32> to vector<8xf32>
    %351 = vector.shape_cast %350 : vector<8xf32> to vector<8x1xf32>
    %cst_206 = arith.constant 3.200000e+01 : f32
    %352 = vector.broadcast %cst_206 : f32 to vector<8x1xf32>
    %353 = arith.divf %351, %352 : vector<8x1xf32>
    %354 = vector.broadcast %346 : vector<8x1xf32> to vector<8x32xf32>
    %355 = arith.subf %338, %354 : vector<8x32xf32>
    %cst_207 = arith.constant 9.99999997E-7 : f32
    %356 = vector.broadcast %cst_207 : f32 to vector<8x1xf32>
    %357 = arith.addf %353, %356 : vector<8x1xf32>
    %358 = math.sqrt %357 : vector<8x1xf32>
    %359 = vector.broadcast %358 : vector<8x1xf32> to vector<8x32xf32>
    %360 = arith.divf %355, %359 : vector<8x32xf32>
    %361 = vector.broadcast %340 : vector<1x32xf32> to vector<8x32xf32>
    %362 = arith.mulf %360, %361 : vector<8x32xf32>
    %363 = vector.broadcast %342 : vector<1x32xf32> to vector<8x32xf32>
    %364 = arith.addf %362, %363 : vector<8x32xf32>
    %365 = arith.truncf %364 : vector<8x32xf32> to vector<8x32xbf16>
    %c0_208 = arith.constant 0 : index
    %c0_209 = arith.constant 0 : index
    %c0_210 = arith.constant 0 : index
    %366 = vector.load %arg13[%c0_208, %c0_209, %c0_210] : memref<1x32x64xbf16, #tpu.memory_space<vmem>>, vector<1x32x64xbf16>
    %367 = vector.shape_cast %366 : vector<1x32x64xbf16> to vector<32x64xbf16>
    %cst_211 = arith.constant dense<0.000000e+00> : vector<8x64xf32>
    %368 = tpu.matmul %365, %367, %cst_211 {dimension_numbers = #tpu.dot_dimension_numbers<[1], [0], [0], [1], [0, 0, 1, 1], [], []>} : vector<8x32xbf16>, vector<32x64xbf16>, vector<8x64xf32> -> vector<8x64xf32>
    %c0_212 = arith.constant 0 : index
    %c0_213 = arith.constant 0 : index
    %c0_214 = arith.constant 0 : index
    %369 = vector.load %arg14[%c0_212, %c0_213, %c0_214] : memref<1x1x64xf32, #tpu.memory_space<vmem>>, vector<1x1x64xf32>
    %370 = vector.shape_cast %369 : vector<1x1x64xf32> to vector<1x64xf32>
    %371 = vector.broadcast %370 : vector<1x64xf32> to vector<8x64xf32>
    %372 = arith.addf %368, %371 : vector<8x64xf32>
    %cst_215 = arith.constant 0.000000e+00 : f32
    %373 = vector.broadcast %cst_215 : f32 to vector<8x64xf32>
    %374 = arith.maximumf %372, %373 : vector<8x64xf32>
    %375 = arith.truncf %374 : vector<8x64xf32> to vector<8x64xbf16>
    %c0_216 = arith.constant 0 : index
    %c0_217 = arith.constant 0 : index
    %c0_218 = arith.constant 0 : index
    %376 = vector.load %arg15[%c0_216, %c0_217, %c0_218] : memref<1x64x32xbf16, #tpu.memory_space<vmem>>, vector<1x64x32xbf16>
    %377 = vector.shape_cast %376 : vector<1x64x32xbf16> to vector<64x32xbf16>
    %cst_219 = arith.constant dense<0.000000e+00> : vector<8x32xf32>
    %378 = tpu.matmul %375, %377, %cst_219 {dimension_numbers = #tpu.dot_dimension_numbers<[1], [0], [0], [1], [0, 0, 1, 1], [], []>} : vector<8x64xbf16>, vector<64x32xbf16>, vector<8x32xf32> -> vector<8x32xf32>
    %c0_220 = arith.constant 0 : index
    %c0_221 = arith.constant 0 : index
    %c0_222 = arith.constant 0 : index
    %379 = vector.load %arg16[%c0_220, %c0_221, %c0_222] : memref<1x1x32xf32, #tpu.memory_space<vmem>>, vector<1x1x32xf32>
    %380 = vector.shape_cast %379 : vector<1x1x32xf32> to vector<1x32xf32>
    %381 = vector.broadcast %380 : vector<1x32xf32> to vector<8x32xf32>
    %382 = arith.addf %378, %381 : vector<8x32xf32>
    %383 = arith.addf %338, %382 : vector<8x32xf32>
    %c0_223 = arith.constant 0 : index
    %c0_224 = arith.constant 0 : index
    %384 = vector.load %arg20[%c0_223, %c0_224] : memref<8x32xf32, #tpu.memory_space<vmem>>, vector<8x32xf32>
    tpu.vector_store %arg20[%c0_223, %c0_224], %383 {strides = array<i32>} : memref<8x32xf32, #tpu.memory_space<vmem>>, vector<8x32xf32>,
    %c1_i32 = arith.constant 1 : i32
    %385 = arith.cmpi eq, %arg1, %c1_i32 : i32
    %386 = arith.extui %385 : i1 to i32
    %c0_i32_225 = arith.constant 0 : i32
    %387 = arith.cmpi ne, %386, %c0_i32_225 : i32
    scf.if %387 {
      %c0_226 = arith.constant 0 : index
      %c0_227 = arith.constant 0 : index
      %388 = vector.load %arg17[%c0_226, %c0_227] : memref<1x32xf32, #tpu.memory_space<vmem>>, vector<1x32xf32>
      %c0_228 = arith.constant 0 : index
      %c0_229 = arith.constant 0 : index
      %389 = vector.load %arg18[%c0_228, %c0_229] : memref<1x32xf32, #tpu.memory_space<vmem>>, vector<1x32xf32>
      %cst_230 = arith.constant dense<0.000000e+00> : vector<8xf32>
      %390 = vector.multi_reduction <add>, %383, %cst_230 [1] : vector<8x32xf32> to vector<8xf32>
      %391 = vector.shape_cast %390 : vector<8xf32> to vector<8x1xf32>
      %cst_231 = arith.constant 3.200000e+01 : f32
      %392 = vector.broadcast %cst_231 : f32 to vector<8x1xf32>
      %393 = arith.divf %391, %392 : vector<8x1xf32>
      %394 = vector.broadcast %393 : vector<8x1xf32> to vector<8x32xf32>
      %395 = arith.subf %383, %394 : vector<8x32xf32>
      %396 = arith.mulf %395, %395 : vector<8x32xf32>
      %cst_232 = arith.constant dense<0.000000e+00> : vector<8xf32>
      %397 = vector.multi_reduction <add>, %396, %cst_232 [1] : vector<8x32xf32> to vector<8xf32>
      %398 = vector.shape_cast %397 : vector<8xf32> to vector<8x1xf32>
      %cst_233 = arith.constant 3.200000e+01 : f32
      %399 = vector.broadcast %cst_233 : f32 to vector<8x1xf32>
      %400 = arith.divf %398, %399 : vector<8x1xf32>
      %401 = vector.broadcast %393 : vector<8x1xf32> to vector<8x32xf32>
      %402 = arith.subf %383, %401 : vector<8x32xf32>
      %cst_234 = arith.constant 9.99999997E-7 : f32
      %403 = vector.broadcast %cst_234 : f32 to vector<8x1xf32>
      %404 = arith.addf %400, %403 : vector<8x1xf32>
      %405 = math.sqrt %404 : vector<8x1xf32>
      %406 = vector.broadcast %405 : vector<8x1xf32> to vector<8x32xf32>
      %407 = arith.divf %402, %406 : vector<8x32xf32>
      %408 = vector.broadcast %388 : vector<1x32xf32> to vector<8x32xf32>
      %409 = arith.mulf %407, %408 : vector<8x32xf32>
      %410 = vector.broadcast %389 : vector<1x32xf32> to vector<8x32xf32>
      %411 = arith.addf %409, %410 : vector<8x32xf32>
      %c0_235 = arith.constant 0 : index
      %c0_236 = arith.constant 0 : index
      %c0_237 = arith.constant 0 : index
      %412 = vector.load %arg19[%c0_235, %c0_236, %c0_237] : memref<1x8x32xf32, #tpu.memory_space<vmem>>, vector<1x8x32xf32>
      %413 = vector.shape_cast %412 : vector<1x8x32xf32> to vector<8x32xf32>
      %414 = vector.shape_cast %411 : vector<8x32xf32> to vector<1x8x32xf32>
      tpu.vector_store %arg19[%c0_235, %c0_236, %c0_237], %414 {strides = array<i32>} : memref<1x8x32xf32, #tpu.memory_space<vmem>>, vector<1x8x32xf32>,
    } else {
    }
    return
  }
  func.func @transform_0(%arg0: i32, %arg1: i32) -> (i32, i32, i32) {
    %c0_i32 = arith.constant 0 : i32
    %c0_i32_0 = arith.constant 0 : i32
    %c0_i32_1 = arith.constant 0 : i32
    return %arg0, %c0_i32, %c0_i32_0 : i32, i32, i32
  }
  func.func @transform_1(%arg0: i32, %arg1: i32) -> (i32, i32, i32) {
    %c0_i32 = arith.constant 0 : i32
    %c0_i32_0 = arith.constant 0 : i32
    %c0_i32_1 = arith.constant 0 : i32
    return %arg0, %c0_i32, %c0_i32_0 : i32, i32, i32
  }
  func.func @transform_2(%arg0: i32, %arg1: i32) -> (i32, i32, i32) {
    %c0_i32 = arith.constant 0 : i32
    %c0_i32_0 = arith.constant 0 : i32
    %c0_i32_1 = arith.constant 0 : i32
    return %arg0, %c0_i32, %c0_i32_0 : i32, i32, i32
  }
  func.func @transform_3(%arg0: i32, %arg1: i32) -> (i32, i32, i32) {
    %c0_i32 = arith.constant 0 : i32
    %c0_i32_0 = arith.constant 0 : i32
    %c0_i32_1 = arith.constant 0 : i32
    return %arg0, %c0_i32, %c0_i32_0 : i32, i32, i32
  }
  func.func @transform_4(%arg0: i32, %arg1: i32) -> (i32, i32) {
    %c0_i32 = arith.constant 0 : i32
    %c0_i32_0 = arith.constant 0 : i32
    %c0_i32_1 = arith.constant 0 : i32
    return %c0_i32, %c0_i32_0 : i32, i32
  }
  func.func @transform_5(%arg0: i32, %arg1: i32) -> (i32, i32, i32, i32) {
    %c0_i32 = arith.constant 0 : i32
    %c0_i32_0 = arith.constant 0 : i32
    %c0_i32_1 = arith.constant 0 : i32
    %c0_i32_2 = arith.constant 0 : i32
    return %arg1, %c0_i32, %c0_i32_0, %c0_i32_1 : i32, i32, i32, i32
  }
  func.func @transform_6(%arg0: i32, %arg1: i32) -> (i32, i32, i32, i32) {
    %c0_i32 = arith.constant 0 : i32
    %c0_i32_0 = arith.constant 0 : i32
    %c0_i32_1 = arith.constant 0 : i32
    %c0_i32_2 = arith.constant 0 : i32
    return %arg1, %c0_i32, %c0_i32_0, %c0_i32_1 : i32, i32, i32, i32
  }
  func.func @transform_7(%arg0: i32, %arg1: i32) -> (i32, i32, i32, i32, i32) {
    %c0_i32 = arith.constant 0 : i32
    %c0_i32_0 = arith.constant 0 : i32
    %c0_i32_1 = arith.constant 0 : i32
    %c0_i32_2 = arith.constant 0 : i32
    %c0_i32_3 = arith.constant 0 : i32
    return %arg1, %c0_i32, %c0_i32_0, %c0_i32_1, %c0_i32_2 : i32, i32, i32, i32, i32
  }
  func.func @transform_8(%arg0: i32, %arg1: i32) -> (i32, i32, i32, i32, i32) {
    %c0_i32 = arith.constant 0 : i32
    %c0_i32_0 = arith.constant 0 : i32
    %c0_i32_1 = arith.constant 0 : i32
    %c0_i32_2 = arith.constant 0 : i32
    %c0_i32_3 = arith.constant 0 : i32
    return %arg1, %c0_i32, %c0_i32_0, %c0_i32_1, %c0_i32_2 : i32, i32, i32, i32, i32
  }
  func.func @transform_9(%arg0: i32, %arg1: i32) -> (i32, i32, i32, i32, i32) {
    %c0_i32 = arith.constant 0 : i32
    %c0_i32_0 = arith.constant 0 : i32
    %c0_i32_1 = arith.constant 0 : i32
    %c0_i32_2 = arith.constant 0 : i32
    %c0_i32_3 = arith.constant 0 : i32
    return %arg1, %c0_i32, %c0_i32_0, %c0_i32_1, %c0_i32_2 : i32, i32, i32, i32, i32
  }
  func.func @transform_10(%arg0: i32, %arg1: i32) -> (i32, i32, i32, i32) {
    %c0_i32 = arith.constant 0 : i32
    %c0_i32_0 = arith.constant 0 : i32
    %c0_i32_1 = arith.constant 0 : i32
    %c0_i32_2 = arith.constant 0 : i32
    return %arg1, %c0_i32, %c0_i32_0, %c0_i32_1 : i32, i32, i32, i32
  }
  func.func @transform_11(%arg0: i32, %arg1: i32) -> (i32, i32, i32) {
    %c0_i32 = arith.constant 0 : i32
    %c0_i32_0 = arith.constant 0 : i32
    %c0_i32_1 = arith.constant 0 : i32
    return %arg1, %c0_i32, %c0_i32_0 : i32, i32, i32
  }
  func.func @transform_12(%arg0: i32, %arg1: i32) -> (i32, i32, i32) {
    %c0_i32 = arith.constant 0 : i32
    %c0_i32_0 = arith.constant 0 : i32
    %c0_i32_1 = arith.constant 0 : i32
    return %arg1, %c0_i32, %c0_i32_0 : i32, i32, i32
  }
  func.func @transform_13(%arg0: i32, %arg1: i32) -> (i32, i32, i32) {
    %c0_i32 = arith.constant 0 : i32
    %c0_i32_0 = arith.constant 0 : i32
    %c0_i32_1 = arith.constant 0 : i32
    return %arg1, %c0_i32, %c0_i32_0 : i32, i32, i32
  }
  func.func @transform_14(%arg0: i32, %arg1: i32) -> (i32, i32, i32) {
    %c0_i32 = arith.constant 0 : i32
    %c0_i32_0 = arith.constant 0 : i32
    %c0_i32_1 = arith.constant 0 : i32
    return %arg1, %c0_i32, %c0_i32_0 : i32, i32, i32
  }
  func.func @transform_15(%arg0: i32, %arg1: i32) -> (i32, i32) {
    %c0_i32 = arith.constant 0 : i32
    %c0_i32_0 = arith.constant 0 : i32
    %c0_i32_1 = arith.constant 0 : i32
    return %c0_i32, %c0_i32_0 : i32, i32
  }
  func.func @transform_16(%arg0: i32, %arg1: i32) -> (i32, i32) {
    %c0_i32 = arith.constant 0 : i32
    %c0_i32_0 = arith.constant 0 : i32
    %c0_i32_1 = arith.constant 0 : i32
    return %c0_i32, %c0_i32_0 : i32, i32
  }
  func.func @transform_17(%arg0: i32, %arg1: i32) -> (i32, i32, i32) {
    %c0_i32 = arith.constant 0 : i32
    %c0_i32_0 = arith.constant 0 : i32
    %c0_i32_1 = arith.constant 0 : i32
    return %arg0, %c0_i32, %c0_i32_0 : i32, i32, i32
  }
}

</mosaic_0001>

<bundles_post_ra>
// kernel: tpu_custom_call.1
= control target key start
LH: loop header
LB: loop body
LE: loop exit
PB: predicated region body
PF: predicated region fallthrough
CT: control target
= control target key end

     0   :  { %s5559_s0 = inlined_call_operand.vmem [shape: f32[2,8,32], index: 0, kind: input, shape index: {}]   ;;  %s5560_s1 = inlined_call_operand.vmem [shape: f32[2,16,32], index: 1, kind: input, shape index: {}]   ;;  %s5561_s2 = inlined_call_operand.hbm [shape: f32[2,1,8], index: 2, kind: input, shape index: {}]   ;;  %s5562_s3 = inlined_call_operand.hbm [shape: f32[2,1,16], index: 3, kind: input, shape index: {}]   ;;  %s5563_s4 = inlined_call_operand.hbm [shape: f32[8,32], index: 4, kind: input, shape index: {}]   ;;  %s5564_s5 = inlined_call_operand.hbm [shape: f32[2,3,1,32], index: 5, kind: input, shape index: {}]   ;;  %s5565_s6 = inlined_call_operand.hbm [shape: f32[2,3,1,32], index: 6, kind: input, shape index: {}]   ;;  %s5566_s7 = inlined_call_operand.hbm [shape: bf16[2,2,3,32,32], index: 7, kind: input, shape index: {}]   ;;  %s5567_s8 = inlined_call_operand.hbm [shape: f32[2,2,3,1,32], index: 8, kind: input, shape index: {}]   ;;  %s5568_s9 = inlined_call_operand.vmem [shape: bf16[2,2,4,8,32], index: 9, kind: input, shape index: {}]   ;;  %s5569_s10 = inlined_call_operand.hbm [shape: f32[2,2,1,32], index: 10, kind: input, shape index: {}]   ;;  %s5570_s11 = inlined_call_operand.hbm [shape: bf16[2,32,64], index: 11, kind: input, shape index: {}]   ;;  %s5571_s12 = inlined_call_operand.hbm [shape: f32[2,1,64], index: 12, kind: input, shape index: {}]   ;;  %s5572_s13 = inlined_call_operand.vmem [shape: bf16[2,64,32], index: 13, kind: input, shape index: {}]   ;;  %s5573_s14 = inlined_call_operand.vmem [shape: f32[2,1,32], index: 14, kind: input, shape index: {}]   ;;  %s5574_s15 = inlined_call_operand.vmem [shape: f32[1,32], index: 15, kind: input, shape index: {}]   ;;  %s5575_s16 = inlined_call_operand.vmem [shape: f32[1,32], index: 16, kind: input, shape index: {}]   ;;  %s5576_s17 = inlined_call_operand.hbm [shape: f32[2,8,32], index: 17, kind: output, shape index: {}]  }
   0x1   :  { %5629 = sst [smem:[#allocation50_spill]] %s5559_s0 }
   0x2   :  { %5630 = sst [smem:[#allocation51_spill]] %s5560_s1 }
   0x3   :  { %5631 = sst [smem:[#allocation52_spill]] %s5561_s2 }
   0x4   :  { %5632 = sst [smem:[#allocation53_spill]] %s5562_s3 }
   0x5   :  { %5633 = sst [smem:[#allocation54_spill]] %s5563_s4 }
   0x6   :  { %5634 = sst [smem:[#allocation55_spill]] %s5564_s5 }
   0x7   :  { %5635 = sst [smem:[#allocation56_spill]] %s5565_s6 }
   0x8   :  { %5636 = sst [smem:[#allocation57_spill]] %s5566_s7 }
   0x9   :  { %5637 = sst [smem:[#allocation58_spill]] %s5567_s8 }
   0xa   :  { %5638 = sst [smem:[#allocation59_spill]] %s5568_s9 }
   0xb   :  { %5639 = sst [smem:[#allocation60_spill]] %s5569_s10 }
   0xc   :  { %5640 = sst [smem:[#allocation61_spill]] %s5570_s11 }
   0xd   :  { %5641 = sst [smem:[#allocation62_spill]] %s5571_s12 }
   0xe   :  { %5642 = sst [smem:[#allocation63_spill]] %s5572_s13 }
   0xf   :  { %5643 = sst [smem:[#allocation64_spill]] %s5573_s14 }
  0x10   :  { %5644 = sst [smem:[#allocation65_spill]] %s5574_s15 }
  0x11   :  { %5645 = sst [smem:[#allocation66_spill]] %s5575_s16 }
  0x12   :  { %5646 = sst [smem:[#allocation67_spill]] %s5576_s17 }
  0x13   :  { %22 = vsyncpa [#allocation4], 0 }
  0x14   :  { %24 = vsyncpa [#allocation4 + $0x1], 0 }
  0x15   :  { %25 = vsyncpa [#allocation7], 0 }
  0x16   :  { %27 = vsyncpa [#allocation7 + $0x1], 0 }
  0x17   :  { %28 = vsyncpa [#allocation10], 0 }
  0x18   :  { %30 = vsyncpa [#allocation10 + $0x1], 0 }
  0x19   :  { %31 = vsyncpa [#allocation13], 0 }
  0x1a   :  { %33 = vsyncpa [#allocation13 + $0x1], 0 }
  0x1b   :  { %34 = vsyncpa [#allocation16], 0 }
  0x1c   :  { %36 = vsyncpa [#allocation16 + $0x1], 0 }
  0x1d   :  { %37 = vsyncpa [#allocation19], 0 }
  0x1e   :  { %39 = vsyncpa [#allocation19 + $0x1], 0 }
  0x1f   :  { %40 = vsyncpa [#allocation5], 0 }
  0x20   :  { %42 = vsyncpa [#allocation5 + $0x1], 0  ;;  %s4571_s24 = smov 0   ;;  %s4573_s25 = smov 0  }
  0x21   :  { %s4575_s26 = smov 0   ;;  %s4577_s27 = smov 0  }
  0x22   :  { %s4579_s28 = smov 0   ;;  %s4581_s29 = smov 0  }
  0x23   :  { %s4583_s0 = smov 0   ;;  %s4585_s30 = smov 0  }
  0x24   :  { %s4587_s18 = smov 0   ;;  %s4589_s19 = smov 0  }
  0x25   :  { %s4591_s1 = smov 0  }
  0x26 LB: > { %5647 = sst [smem:[#allocation29_spill]] %s4421_s25  ;;  %s4625_s20 = sadd.s32 4294967295, %s4457_s1   ;;  %s4457_s1 = sphi %s4591_s1, %s48_s1   ;;  %s4453_s19 = sphi %s4589_s19, %s5749_s19   ;;  %s4449_s18 = sphi %s4587_s18, %s5748_s18   ;;  %s4445_s30 = sphi %s4585_s30, %s5747_s30   ;;  %s4441_s0 = sphi %s4583_s0, %s5746_s0   ;;  %s4437_s29 = sphi %s4581_s29, %s5745_s29   ;;  %s4433_s28 = sphi %s4579_s28, %s5744_s28   ;;  %s4429_s27 = sphi %s4577_s27, %s5743_s27   ;;  %s4425_s26 = sphi %s4575_s26, %s5742_s26   ;;  %s4421_s25 = sphi %s4573_s25, %s5741_s25   ;;  %s4417_s24 = sphi %s4571_s24, %s5740_s24  }
  0x27   : > { %5648 = sst [smem:[#allocation30_spill]] %s4425_s26  ;;  %s3341_s21 = sadd.s32 4294967294, %s4457_s1  }
  0x28   : > { %5649 = sst [smem:[#allocation31_spill]] %s4429_s27  ;;  %p5589_p0 = scmp.eq.s32.totalorder %s4457_s1, 0 }
  0x29   : > { %5650 = sst [smem:[#allocation32_spill]] %s4433_s28  ;;  %p132_p1 = scmp.ne.s32.totalorder %s4433_s28, %s4429_s27 }
  0x2a   : > { %5651 = sst [smem:[#allocation33_spill]] %s4437_s29  ;;  %p5585_p2 = scmp.eq.s32.totalorder %s4625_s20, 0 }
  0x2b   : > { %5652 = sst [smem:[#allocation34_spill]] %s4441_s0  ;;  %p199_p3 = scmp.ne.s32.totalorder %s4425_s26, %s4421_s25 }
  0x2c   : > { %5653 = sst [smem:[#allocation35_spill]] %s4445_s30  ;;  %p205_p4 = scmp.ne.s32.totalorder %s4421_s25, %s4417_s24 }
  0x2d   : > { %5654 = sst [smem:[#allocation36_spill]] %s4449_s18  ;;  %p4638_p5 = por %p5585_p2, %p132_p1 }
  0x2e   : > { %5655 = sst [smem:[#allocation37_spill]] %s4453_s19  ;;  %p4645_p7 = por %p199_p3, %p5589_p0 }
  0x2f   : > { %5656 = sst [smem:[#allocation38_spill]] %s4457_s1  ;;  %p4651_p8 = por %p205_p4, %p5585_p2 }
  0x30   : > { %s5657_s23 = scalar_select %p4638_p5, 1, 0 }
  0x31   : > { %s5660_s22 = scalar_select %p4651_p8, 1, 0 }
  0x32   : > { %5658 = sst [smem:[#allocation39_spill]] %s5657_s23  ;;  %p511_p9 = scmp.eq.s32.totalorder %s3341_s21, 3 }
  0x33   : > { %5661 = sst [smem:[#allocation40_spill]] %s5660_s22  ;;  %p3342_p10 = scmp.ge.s32.totalorder %s4457_s1, 1 }
  0x34   : > { %p518_p11 = scmp.lt.s32.totalorder %s4457_s1, 5  ;;  %p4657_p12 = por %p511_p9, %p132_p1 }
  0x35   : > { %s4459_s16 = smov [#allocation8]   ;;  %p5588_p4 = scmp.lt.s32.totalorder %s4457_s1, 4 }
  0x36   : > { %s5662_s24 = scalar_select %p4657_p12, 1, 0 }
  0x37   : > { %p4661_p13 = pnand %p3342_p10, %p518_p11  ;;  %s531_s15 = sshll.u32 %s4459_s16, 4  ;;  %s532_s15 = int_to_ptr.vmem [resolvable:$true] %s531_s15 }
  0x38   : > { %5663 = sst [smem:[#allocation41_spill]] %s5662_s24  ;;  %s4669_s13 = sand.u32 1, %s4425_s26  }
  0x39   : > { %s5664_s27 = scalar_select %p4661_p13, 1, 0 }
  0x3a   : > { %p3807_p3 = pneg %p4661_p13  ;;  %p4681_p1 = pnand %p5588_p4, %p4645_p7 }
  0x3b   : > { %5665 = sst [smem:[#allocation42_spill]] %s5664_s27  ;;  %s4686_s9 = sand.u32 1, %s4457_s1  }
  0x3c   : > { %p4673_p6 = pnand %p3807_p3, %p5585_p2  ;;  %s5668_s4 = sld [smem:[#allocation54_spill]] }
  0x3d   : > { %s5667_s24 = scalar_select %p4681_p1, 1, 0 }
  0x3e   : > { %p4015_p10 = pneg %p4673_p6 }
  0x42   : > { %s4013_s0 = scalar_lea.hbm %s5668_s4, 128 }
  0x43   : > { %p4014_p9 = scmp.ne.s32.totalorder %s5668_s4, %s4013_s0  ;;  %p4020_p7 = scmp.lt.u32.totalorder %s4013_s0, %s5668_s4 }
  0x45   : > { %p4016_p11 = pnand %p4015_p10, %p4014_p9 }
  0x47   : > { %p4017_p3 = pneg %p4016_p11 }
  0x49   : > { %p4022_p2 = pnand %p4020_p7, %p4017_p3 }
  0x4b   : > { %4025 = shalt.err (!%p4022_p2)
}
  0x4c   : > { %s4026_s23 = scalar_lea.vmem %s532_s15, 128  ;;  %p4034_p8 = scmp.lt.s32.totalorder %s532_s15, %s532_s15 }
  0x4d   : > { %p4027_p4 = scmp.ne.s32.totalorder %s532_s15, %s4026_s23  ;;  %p4035_p5 = scmp.lt.s32.totalorder %s4026_s23, %s4026_s23 }
  0x4f   : > { %p4029_p0 = pnand %p4027_p4, %p4015_p10  ;;  %p4036_p13 = por %p4035_p5, %p4034_p8 }
  0x51   : > { %p4030_p12 = pneg %p4029_p0 }
  0x53   : > { %p4037_p1 = pnand %p4036_p13, %p4030_p12 }
  0x55   : > { %4040 = shalt.err (!%p4037_p1)
}
  0x56   : > { %3810 = dma.hbm_to_vmem [thread:$0]  (!%p4673_p6), %s5668_s4, 128, %s532_s15, [#allocation7]  }
  0x57   : > { %s5595_s25 = smul.u32 3, %s4669_s13  ;;  %s5669_s5 = sld [smem:[#allocation55_spill]] }
  0x58   : > { %s5594_s0 = smul.u32 48, %s4449_s18  ;;  %p5670_p2 = scmp.ne.s32.totalorder %s5667_s24, 0 }
  0x59   : > { %s601_s21 = scalar_lea.vmem [#allocation9], %s5595_s25 }
  0x5a   : > { %s608_s17 = sshll.u32 %s601_s21, 4  ;;  %p4722_p5 = pneg %p5670_p2  ;;  %s4715_s17 = int_to_ptr.vmem [resolvable:$true] %s608_s17 }
  0x5c   : > { %s5671_s15 = scalar_select %p4722_p5, 1, 0 }
  0x5d   : > { %s4711_s16 = scalar_lea.hbm %s5669_s5, %s5594_s0  ;;  %s4046_s0 = scalar_lea.hbm %s5669_s5, 96 }
  0x5e   : > { %s4041_s30 = scalar_lea.hbm %s4711_s16, 48  ;;  %p4047_p12 = scmp.lt.u32.totalorder %s4711_s16, %s5669_s5 }
  0x5f   : > { %p4042_p0 = scmp.ne.s32.totalorder %s4711_s16, %s4041_s30  ;;  %p4048_p13 = scmp.lt.u32.totalorder %s4046_s0, %s4041_s30 }
  0x60   : > { %p4050_p1 = scmp.lt.u32.totalorder %s4041_s30, %s4711_s16 }
  0x61   : > { %p4044_p6 = pnand %p4722_p5, %p4042_p0  ;;  %p4049_p4 = por %p4048_p13, %p4047_p12 }
  0x63   : > { %p4045_p8 = pneg %p4044_p6  ;;  %p4051_p9 = por %p4050_p1, %p4049_p4 }
  0x65   : > { %p4052_p10 = pnand %p4051_p9, %p4045_p8 }
  0x67   : > { %4055 = shalt.err (!%p4052_p10)
}
  0x68   : > { %s4056_s14 = scalar_lea.vmem %s4715_s17, 48  ;;  %s4460_s22 = smov [#allocation9]  }
  0x69   : > { %p4057_p11 = scmp.ne.s32.totalorder %s4715_s17, %s4056_s14  ;;  %s4061_s23 = sshll.u32 %s4460_s22, 4  ;;  %s4062_s23 = int_to_ptr.vmem [resolvable:$false] %s4061_s23 }
  0x6a   : > { %s4063_s25 = scalar_lea.vmem %s4062_s23, 96  ;;  %p4064_p0 = scmp.lt.s32.totalorder %s4715_s17, %s4062_s23 }
  0x6b   : > { %p4059_p3 = pnand %p4057_p11, %p4722_p5  ;;  %p4065_p6 = scmp.lt.s32.totalorder %s4063_s25, %s4056_s14 }
  0x6d   : > { %p4060_p7 = pneg %p4059_p3  ;;  %p4066_p12 = por %p4065_p6, %p4064_p0 }
  0x6f   : > { %p4067_p13 = pnand %p4066_p12, %p4060_p7 }
  0x71   : > { %4070 = shalt.err (!%p4067_p13)
}
  0x72   : > { %s5600_s0 = smov 16   ;;  %s5606_s30 = smov 1  }
  0x73   : > { %s5672_s21 = scalar_lea.sflag [#allocation10], %s4686_s9  ;;  %s3776_s14 = smul.u32 96, %s4669_s13 }
  0x74   : > { %3820 = dma.hbm_to_vmem [thread:$0]  (!%p5670_p2), %s4711_s16, 48, %s4715_s17, %s5672_s21, %s5600_s0, %s5600_s0, %s5606_s30  }
  0x75   : > { %s3777_s22 = smul.u32 1536, %s4449_s18  ;;  %s5673_s7 = sld [smem:[#allocation57_spill]] }
  0x76   : > { %s643_s5 = scalar_lea.vmem [#allocation12], %s3776_s14  ;;  %s3351_s12 = sshll.u32 %s4669_s13, 1 }
  0x77   : > { %s650_s27 = sshll.u32 %s643_s5, 4  ;;  %s5605_s11 = scalar_lea.sflag [#allocation13], %s4686_s9  ;;  %s4757_s27 = int_to_ptr.vmem [resolvable:$true] %s650_s27 }
  0x7b   : > { %s4755_s4 = scalar_lea.hbm %s5673_s7, %s3777_s22  ;;  %s4076_s21 = scalar_lea.hbm %s5673_s7, 3072 }
  0x7c   : > { %s4071_s8 = scalar_lea.hbm %s4755_s4, 1536  ;;  %p4077_p9 = scmp.lt.u32.totalorder %s4755_s4, %s5673_s7 }
  0x7d   : > { %p4072_p8 = scmp.ne.s32.totalorder %s4755_s4, %s4071_s8  ;;  %p4078_p10 = scmp.lt.u32.totalorder %s4076_s21, %s4071_s8 }
  0x7e   : > { %p4080_p3 = scmp.lt.u32.totalorder %s4071_s8, %s4755_s4 }
  0x7f   : > { %p4074_p4 = pnand %p4072_p8, %p4722_p5  ;;  %p4079_p11 = por %p4078_p10, %p4077_p9 }
  0x81   : > { %p4075_p1 = pneg %p4074_p4  ;;  %p4081_p7 = por %p4080_p3, %p4079_p11 }
  0x83   : > { %p4082_p0 = pnand %p4081_p7, %p4075_p1 }
  0x85   : > { %4085 = shalt.err (!%p4082_p0)
}
  0x86   : > { %s4086_s5 = scalar_lea.vmem %s4757_s27, 1536  ;;  %s4463_s14 = smov [#allocation12]  }
  0x87   : > { %p4087_p6 = scmp.ne.s32.totalorder %s4757_s27, %s4086_s5  ;;  %s4091_s25 = sshll.u32 %s4463_s14, 4  ;;  %s4092_s25 = int_to_ptr.vmem [resolvable:$false] %s4091_s25 }
  0x88   : > { %s4093_s16 = scalar_lea.vmem %s4092_s25, 3072  ;;  %p4094_p8 = scmp.lt.s32.totalorder %s4757_s27, %s4092_s25 }
  0x89   : > { %p4089_p12 = pnand %p4087_p6, %p4722_p5  ;;  %p4095_p4 = scmp.lt.s32.totalorder %s4093_s16, %s4086_s5 }
  0x8b   : > { %p4090_p13 = pneg %p4089_p12  ;;  %p4096_p9 = por %p4095_p4, %p4094_p8 }
  0x8d   : > { %p4097_p10 = pnand %p4096_p9, %p4090_p13 }
  0x8f   : > { %4100 = shalt.err (!%p4097_p10)
}
  0x90   : > { %s5603_s8 = smov 64   ;;  %s5604_s17 = smov 4  }
  0x91   : > { %3826 = dma.hbm_to_vmem [thread:$0]  (!%p5670_p2), %s4755_s4, 1536, %s4757_s27, %s5605_s11, %s5603_s8, %s5603_s8, %s5604_s17  }
  0x92   : > { %s3481_s21 = sshll.u32 %s4449_s18, 5  ;;  %s5674_s10 = sld [smem:[#allocation60_spill]] }
  0x93   : > { %s693_s14 = scalar_lea.vmem [#allocation15], %s3351_s12  ;;  %s5602_s16 = scalar_lea.sflag [#allocation16], %s4686_s9 }
  0x94   : > { %s700_s25 = sshll.u32 %s693_s14, 4  ;;  %s4795_s25 = int_to_ptr.vmem [resolvable:$true] %s700_s25 }
  0x98   : > { %s4791_s5 = scalar_lea.hbm %s5674_s10, %s3481_s21  ;;  %s4106_s21 = scalar_lea.hbm %s5674_s10, 64 }
  0x99   : > { %s4101_s0 = scalar_lea.hbm %s4791_s5, 32  ;;  %p4107_p7 = scmp.lt.u32.totalorder %s4791_s5, %s5674_s10 }
  0x9a   : > { %p4102_p1 = scmp.ne.s32.totalorder %s4791_s5, %s4101_s0  ;;  %p4108_p0 = scmp.lt.u32.totalorder %s4106_s21, %s4101_s0 }
  0x9b   : > { %p4110_p12 = scmp.lt.u32.totalorder %s4101_s0, %s4791_s5 }
  0x9c   : > { %p4104_p11 = pnand %p4102_p1, %p4722_p5  ;;  %p4109_p6 = por %p4108_p0, %p4107_p7 }
  0x9e   : > { %p4105_p3 = pneg %p4104_p11  ;;  %p4111_p13 = por %p4110_p12, %p4109_p6 }
  0xa0   : > { %p4112_p8 = pnand %p4111_p13, %p4105_p3 }
  0xa2   : > { %4115 = shalt.err (!%p4112_p8)
}
  0xa3   : > { %s4116_s12 = scalar_lea.vmem %s4795_s25, 32  ;;  %s4466_s14 = smov [#allocation15]  }
  0xa4   : > { %p4117_p4 = scmp.ne.s32.totalorder %s4795_s25, %s4116_s12  ;;  %s4121_s4 = sshll.u32 %s4466_s14, 4  ;;  %s4122_s4 = int_to_ptr.vmem [resolvable:$false] %s4121_s4 }
  0xa5   : > { %s4123_s27 = scalar_lea.vmem %s4122_s4, 64  ;;  %p4124_p1 = scmp.lt.s32.totalorder %s4795_s25, %s4122_s4 }
  0xa6   : > { %p4119_p9 = pnand %p4117_p4, %p4722_p5  ;;  %p4125_p11 = scmp.lt.s32.totalorder %s4123_s27, %s4116_s12 }
  0xa8   : > { %p4120_p10 = pneg %p4119_p9  ;;  %p4126_p7 = por %p4125_p11, %p4124_p1 }
  0xaa   : > { %p4127_p0 = pnand %p4126_p7, %p4120_p10 }
  0xac   : > { %4130 = shalt.err (!%p4127_p0)
}
  0xad   : > { %s5675_s0 = smov 16   ;;  %s57_s21 = sadd.s32 1, %s4449_s18 }
  0xae   : > { %3832 = dma.hbm_to_vmem [thread:$0]  (!%p5670_p2), %s4791_s5, 32, %s4795_s25, %s5602_s16, %s5675_s0, %s5675_s0, %s5606_s30  }
  0xaf   : > { %p58_p3 = scmp.ge.s32.totalorder %s57_s21, 2  ;;  %s60_s22 = sadd.s32 1, %s4453_s19 }
  0xb0   : > { %s119_s23 = sadd.s32 1, %s4437_s29  ;;  %p126_p6 = scmp.ne.s32.totalorder %s4437_s29, %s4433_s28 }
  0xb1   : > { %s5751_s21 = smov (%p58_p3, %s57_s21), 0  ;;  %s5753_s22 = smov (!%p58_p3, %s60_s22), %s4453_s19 }
  0xb2   : > { %5676 = sst [smem:[#allocation43_spill]] %s5751_s21  ;;  %p5677_p12 = scmp.eq.s32.totalorder %s4457_s1, 0 }
  0xb3   : > { %s189_s5 = ssub.s32 %s4449_s18, %s5751_s21  ;;  %p62_p8 = scmp.ge.s32.totalorder %s5753_s22, 2 }
  0xb4   : > { %p4834_p13 = por %p5677_p12, %p126_p6  ;;  %p190_p4 = scmp.eq.s32.totalorder %s189_s5, 0 }
  0xb5   : > { %p5679_p9 = scmp.eq.s32.totalorder %s4625_s20, 3  ;;  %s4847_s14 = sand.u32 1, %s4437_s29  }
  0xb6   : > { %s5755_s22 = smov (%p62_p8, %s5753_s22), 0  ;;  %s5683_s4 = sadd.s32 1, %s4425_s26 }
  0xb7   : > { %p4842_p10 = por %p5679_p9, %p126_p6  ;;  %5682 = sst [smem:[#allocation45_spill]] %s5755_s22 }
  0xb8   : > { %s4854_s27 = scalar_select %p190_p4, %s4425_s26, %s5683_s4  }
  0xb9   : > { %s5680_s25 = scalar_select %p4842_p10, 1, 0 }
  0xba   : > { %5684 = sst [smem:[#allocation46_spill]] %s4854_s27  ;;  %s116_s16 = ssub.s32 %s4453_s19, %s5755_s22 }
  0xbb   : > { %5681 = sst [smem:[#allocation44_spill]] %s5680_s25  ;;  %p117_p1 = scmp.eq.s32.totalorder %s116_s16, 0 }
  0xbc   : > { %s3345_s8 = sshll.u32 %s4453_s19, 4  ;;  %s566_s5 = scalar_lea.vmem [#allocation3], %s4847_s14 }
  0xbd   : > { %s573_s17 = sshll.u32 %s566_s5, 4  ;;  %s5686_s2 = sld [smem:[#allocation52_spill]]  ;;  %s4868_s17 = int_to_ptr.vmem [resolvable:$true] %s573_s17 }
  0xbe   : > { %s4861_s11 = scalar_select %p117_p1, %s4437_s29, %s119_s23  }
  0xbf   : > { %p5687_p11 = scmp.lt.s32.totalorder %s4457_s1, 4  ;;  %s5689_s3 = sld [smem:[#allocation53_spill]] }
  0xc0   : > { %5685 = sst [smem:[#allocation47_spill]] %s4861_s11  ;;  %s583_s30 = scalar_lea.vmem [#allocation6], %s4847_s14 }
  0xc1   : > { %p4874_p7 = pnand %p5687_p11, %p4834_p13  ;;  %s4884_s5 = sshll.u32 %s583_s30, 4  ;;  %s591_s5 = int_to_ptr.vmem [resolvable:$true] %s4884_s5 }
  0xc2   : > { %s564_s22 = scalar_lea.sflag [#allocation4], %s4847_s14 }
  0xc3   : > { %s4866_s10 = scalar_lea.hbm %s5686_s2, %s3345_s8  ;;  %p4133_p3 = pneg %p4874_p7 }
  0xc4   : > { %s4131_s21 = scalar_lea.hbm %s4866_s10, 16  ;;  %s4136_s4 = scalar_lea.hbm %s5686_s2, 32 }
  0xc5   : > { %s4881_s7 = scalar_lea.hbm %s5689_s3, %s3345_s8  ;;  %p4132_p0 = scmp.ne.s32.totalorder %s4866_s10, %s4131_s21 }
  0xc6   : > { %p4137_p13 = scmp.lt.u32.totalorder %s4866_s10, %s5686_s2  ;;  %p4138_p8 = scmp.lt.u32.totalorder %s4136_s4, %s4131_s21 }
  0xc7   : > { %p4134_p6 = pnand %p4133_p3, %p4132_p0  ;;  %p4140_p9 = scmp.lt.u32.totalorder %s4131_s21, %s4866_s10 }
  0xc8   : > { %p4139_p4 = por %p4138_p8, %p4137_p13 }
  0xc9   : > { %p4135_p12 = pneg %p4134_p6 }
  0xca   : > { %p4141_p1 = por %p4140_p9, %p4139_p4 }
  0xcc   : > { %p4142_p11 = pnand %p4141_p1, %p4135_p12 }
  0xce   : > { %4145 = shalt.err (!%p4142_p11)
}
  0xcf   : > { %s4146_s8 = scalar_lea.vmem %s4868_s17, 16  ;;  %s4467_s19 = smov [#allocation3]  }
  0xd0   : > { %p4147_p0 = scmp.ne.s32.totalorder %s4868_s17, %s4146_s8  ;;  %s4151_s14 = sshll.u32 %s4467_s19, 4  ;;  %s4152_s14 = int_to_ptr.vmem [resolvable:$false] %s4151_s14 }
  0xd1   : > { %s4153_s11 = scalar_lea.vmem %s4152_s14, 32  ;;  %p4154_p2 = scmp.lt.s32.totalorder %s4868_s17, %s4152_s14 }
  0xd2   : > { %p4149_p6 = pnand %p4147_p0, %p4133_p3  ;;  %p4155_p13 = scmp.lt.s32.totalorder %s4153_s11, %s4146_s8 }
  0xd4   : > { %p4150_p10 = pneg %p4149_p6  ;;  %p4156_p8 = por %p4155_p13, %p4154_p2 }
  0xd6   : > { %p4157_p4 = pnand %p4156_p8, %p4150_p10 }
  0xd8   : > { %4160 = shalt.err (!%p4157_p4)
}
  0xd9   : > { %3814 = dma.hbm_to_vmem [thread:$0]  (!%p4874_p7), %s4866_s10, 16, %s4868_s17, %s564_s22  }
  0xda   : > { %s581_s21 = scalar_lea.sflag [#allocation7], %s4686_s9  ;;  %s4161_s30 = scalar_lea.hbm %s4881_s7, 16 }
  0xdb   : > { %p4162_p12 = scmp.ne.s32.totalorder %s4881_s7, %s4161_s30  ;;  %s4166_s23 = scalar_lea.hbm %s5689_s3, 32 }
  0xdc   : > { %p4167_p9 = scmp.lt.u32.totalorder %s4881_s7, %s5689_s3  ;;  %p4168_p1 = scmp.lt.u32.totalorder %s4166_s23, %s4161_s30 }
  0xdd   : > { %p4164_p2 = pnand %p4162_p12, %p4133_p3  ;;  %p4170_p0 = scmp.lt.u32.totalorder %s4161_s30, %s4881_s7 }
  0xde   : > { %p4169_p11 = por %p4168_p1, %p4167_p9 }
  0xdf   : > { %p4165_p10 = pneg %p4164_p2 }
  0xe0   : > { %p4171_p6 = por %p4170_p0, %p4169_p11 }
  0xe2   : > { %p4172_p13 = pnand %p4171_p6, %p4165_p10 }
  0xe4   : > { %4175 = shalt.err (!%p4172_p13)
}
  0xe5   : > { %s4176_s10 = scalar_lea.vmem %s591_s5, 16  ;;  %s4468_s17 = smov [#allocation6]  }
  0xe6   : > { %p4177_p8 = scmp.ne.s32.totalorder %s591_s5, %s4176_s10  ;;  %s4181_s22 = sshll.u32 %s4468_s17, 4  ;;  %s4182_s22 = int_to_ptr.vmem [resolvable:$false] %s4181_s22 }
  0xe7   : > { %s4183_s14 = scalar_lea.vmem %s4182_s22, 32  ;;  %p4184_p2 = scmp.lt.s32.totalorder %s591_s5, %s4182_s22 }
  0xe8   : > { %p4179_p4 = pnand %p4177_p8, %p4133_p3  ;;  %p4185_p5 = scmp.lt.s32.totalorder %s4183_s14, %s4176_s10 }
  0xea   : > { %p4180_p12 = pneg %p4179_p4  ;;  %p4186_p1 = por %p4185_p5, %p4184_p2 }
  0xec   : > { %p4187_p9 = pnand %p4186_p1, %p4180_p12 }
  0xee   : > { %4190 = shalt.err (!%p4187_p9)
}
  0xef   : > { %3817 = dma.hbm_to_vmem [thread:$0]  (!%p4874_p7), %s4881_s7, 16, %s591_s5, %s581_s21  }
  0xf0   : > { %s5690_s11 = smul.u32 48, %s4449_s18  ;;  %s5691_s6 = sld [smem:[#allocation56_spill]] }
  0xf1   : > { %s5692_s23 = smul.u32 3, %s4669_s13  ;;  %p5693_p3 = scmp.ne.s32.totalorder %s5671_s15, 0 }
  0xf2   : > { %s3778_s16 = smul.u32 6, %s4669_s13 }
  0xf3   : > { %s622_s8 = scalar_lea.vmem [#allocation11], %s5692_s23 }
  0xf4   : > { %s629_s19 = sshll.u32 %s622_s8, 4  ;;  %s4942_s19 = int_to_ptr.vmem [resolvable:$true] %s629_s19 }
  0xf6   : > { %s4938_s4 = scalar_lea.hbm %s5691_s6, %s5690_s11  ;;  %s4196_s21 = scalar_lea.hbm %s5691_s6, 96 }
  0xf7   : > { %s4191_s10 = scalar_lea.hbm %s4938_s4, 48  ;;  %p4197_p11 = scmp.lt.u32.totalorder %s4938_s4, %s5691_s6 }
  0xf8   : > { %p4192_p5 = scmp.ne.s32.totalorder %s4938_s4, %s4191_s10  ;;  %p4198_p0 = scmp.lt.u32.totalorder %s4196_s21, %s4191_s10 }
  0xf9   : > { %p4200_p13 = scmp.lt.u32.totalorder %s4191_s10, %s4938_s4 }
  0xfa   : > { %p4194_p7 = pnand %p4192_p5, %p5693_p3  ;;  %p4199_p6 = por %p4198_p0, %p4197_p11 }
  0xfc   : > { %p4195_p10 = pneg %p4194_p7  ;;  %p4201_p8 = por %p4200_p13, %p4199_p6 }
  0xfe   : > { %p4202_p4 = pnand %p4201_p8, %p4195_p10 }
 0x100   : > { %4205 = shalt.err (!%p4202_p4)
}
 0x101   : > { %s4206_s14 = scalar_lea.vmem %s4942_s19, 48  ;;  %s4469_s11 = smov [#allocation11]  }
 0x102   : > { %p4207_p12 = scmp.ne.s32.totalorder %s4942_s19, %s4206_s14  ;;  %s4211_s30 = sshll.u32 %s4469_s11, 4  ;;  %s4212_s30 = int_to_ptr.vmem [resolvable:$false] %s4211_s30 }
 0x103   : > { %s4213_s12 = scalar_lea.vmem %s4212_s30, 96  ;;  %p4214_p9 = scmp.lt.s32.totalorder %s4942_s19, %s4212_s30 }
 0x104   : > { %p4209_p2 = pnand %p4207_p12, %p5693_p3  ;;  %p4215_p5 = scmp.lt.s32.totalorder %s4213_s12, %s4206_s14 }
 0x106   : > { %p4210_p1 = pneg %p4209_p2  ;;  %p4216_p7 = por %p4215_p5, %p4214_p9 }
 0x108   : > { %p4217_p11 = pnand %p4216_p7, %p4210_p1 }
 0x10a   : > { %4220 = shalt.err (!%p4217_p11)
}
 0x10b   : > { %p5694_p10 = scmp.ne.s32.totalorder %s5667_s24, 0  ;;  %s5695_s23 = smov 1  }
 0x10c   : > { %s5696_s8 = scalar_lea.sflag [#allocation10], %s4686_s9  ;;  %s3779_s10 = smul.u32 96, %s4449_s18 }
 0x10d   : > { %3823 = dma.hbm_to_vmem [thread:$0]  (!%p5694_p10), %s4938_s4, 48, %s4942_s19, %s5696_s8, %s5675_s0, %s5675_s0, %s5695_s23  }
 0x10e   : > { %s664_s7 = scalar_lea.vmem [#allocation14], %s3778_s16  ;;  %s3354_s21 = sshll.u32 %s4669_s13, 4 }
 0x10f   : > { %s671_s5 = sshll.u32 %s664_s7, 4  ;;  %s5697_s14 = sld [smem:[#allocation58_spill]]  ;;  %s4980_s5 = int_to_ptr.vmem [resolvable:$true] %s671_s5 }
 0x115   : > { %s4978_s11 = scalar_lea.hbm %s5697_s14, %s3779_s10  ;;  %s4226_s16 = scalar_lea.hbm %s5697_s14, 192 }
 0x116   : > { %s4221_s30 = scalar_lea.hbm %s4978_s11, 96  ;;  %p4227_p8 = scmp.lt.u32.totalorder %s4978_s11, %s5697_s14 }
 0x117   : > { %p4222_p0 = scmp.ne.s32.totalorder %s4978_s11, %s4221_s30  ;;  %p4228_p4 = scmp.lt.u32.totalorder %s4226_s16, %s4221_s30 }
 0x118   : > { %p4230_p2 = scmp.lt.u32.totalorder %s4221_s30, %s4978_s11 }
 0x119   : > { %p4224_p6 = pnand %p4222_p0, %p5693_p3  ;;  %p4229_p12 = por %p4228_p4, %p4227_p8 }
 0x11b   : > { %p4225_p13 = pneg %p4224_p6  ;;  %p4231_p1 = por %p4230_p2, %p4229_p12 }
 0x11d   : > { %p4232_p9 = pnand %p4231_p1, %p4225_p13 }
 0x11f   : > { %4235 = shalt.err (!%p4232_p9)
}
 0x120   : > { %s4236_s10 = scalar_lea.vmem %s4980_s5, 96  ;;  %s4470_s7 = smov [#allocation14]  }
 0x121   : > { %p4237_p5 = scmp.ne.s32.totalorder %s4980_s5, %s4236_s10  ;;  %s4241_s17 = sshll.u32 %s4470_s7, 4  ;;  %s4242_s17 = int_to_ptr.vmem [resolvable:$false] %s4241_s17 }
 0x122   : > { %s4243_s22 = scalar_lea.vmem %s4242_s17, 192  ;;  %p4244_p0 = scmp.lt.s32.totalorder %s4980_s5, %s4242_s17 }
 0x123   : > { %p4239_p7 = pnand %p4237_p5, %p5693_p3  ;;  %p4245_p6 = scmp.lt.s32.totalorder %s4243_s22, %s4236_s10 }
 0x125   : > { %p4240_p11 = pneg %p4239_p7  ;;  %p4246_p8 = por %p4245_p6, %p4244_p0 }
 0x127   : > { %p4247_p4 = pnand %p4246_p8, %p4240_p11 }
 0x129   : > { %4250 = shalt.err (!%p4247_p4)
}
 0x12a   : > { %s5698_s30 = scalar_lea.sflag [#allocation13], %s4686_s9  ;;  %s3482_s4 = sshll.u32 %s4449_s18, 8 }
 0x12b   : > { %3829 = dma.hbm_to_vmem [thread:$0]  (!%p5694_p10), %s4978_s11, 96, %s4980_s5, %s5698_s30, %s5675_s0, %s5675_s0, %s5695_s23  }
 0x12c   : > { %s5699_s12 = sld [smem:[#allocation61_spill]]  ;;  %s714_s10 = scalar_lea.vmem [#allocation17], %s3354_s21 }
 0x12d   : > { %s721_s7 = sshll.u32 %s714_s10, 4  ;;  %s5016_s7 = int_to_ptr.vmem [resolvable:$true] %s721_s7 }
 0x132   : > { %s5012_s8 = scalar_lea.hbm %s5699_s12, %s3482_s4  ;;  %s4256_s5 = scalar_lea.hbm %s5699_s12, 512 }
 0x133   : > { %s4251_s17 = scalar_lea.hbm %s5012_s8, 256  ;;  %p4257_p1 = scmp.lt.u32.totalorder %s5012_s8, %s5699_s12 }
 0x134   : > { %p4252_p13 = scmp.ne.s32.totalorder %s5012_s8, %s4251_s17  ;;  %p4258_p9 = scmp.lt.u32.totalorder %s4256_s5, %s4251_s17 }
 0x135   : > { %p4260_p7 = scmp.lt.u32.totalorder %s4251_s17, %s5012_s8 }
 0x136   : > { %p4254_p12 = pnand %p4252_p13, %p5693_p3  ;;  %p4259_p5 = por %p4258_p9, %p4257_p1 }
 0x138   : > { %p4255_p2 = pneg %p4254_p12  ;;  %p4261_p11 = por %p4260_p7, %p4259_p5 }
 0x13a   : > { %p4262_p0 = pnand %p4261_p11, %p4255_p2 }
 0x13c   : > { %4265 = shalt.err (!%p4262_p0)
}
 0x13d   : > { %s4266_s21 = scalar_lea.vmem %s5016_s7, 256  ;;  %s4471_s30 = smov [#allocation17]  }
 0x13e   : > { %p4267_p6 = scmp.ne.s32.totalorder %s5016_s7, %s4266_s21  ;;  %s4271_s4 = sshll.u32 %s4471_s30, 4  ;;  %s4272_s4 = int_to_ptr.vmem [resolvable:$false] %s4271_s4 }
 0x13f   : > { %s4273_s19 = scalar_lea.vmem %s4272_s4, 512  ;;  %p4274_p13 = scmp.lt.s32.totalorder %s5016_s7, %s4272_s4 }
 0x140   : > { %p4269_p8 = pnand %p4267_p6, %p5693_p3  ;;  %p4275_p12 = scmp.lt.s32.totalorder %s4273_s19, %s4266_s21 }
 0x142   : > { %p4270_p4 = pneg %p4269_p8  ;;  %p4276_p1 = por %p4275_p12, %p4274_p13 }
 0x144   : > { %p4277_p9 = pnand %p4276_p1, %p4270_p4 }
 0x146   : > { %4280 = shalt.err (!%p4277_p9)
}
 0x147   : > { %s5700_s16 = smov 4   ;;  %s5701_s10 = smov 64  }
 0x148   : > { %s5702_s17 = scalar_lea.sflag [#allocation16], %s4686_s9  ;;  %s3357_s0 = sshll.u32 %s4449_s18, 4 }
 0x149   : > { %3835 = dma.hbm_to_vmem [thread:$0]  (!%p5694_p10), %s5012_s8, 256, %s5016_s7, %s5702_s17, %s5701_s10, %s5701_s10, %s5700_s16  }
 0x14a   : > { %s5703_s11 = sld [smem:[#allocation62_spill]]  ;;  %s734_s21 = scalar_lea.vmem [#allocation18], %s4669_s13 }
 0x14b   : > { %s741_s30 = sshll.u32 %s734_s21, 4  ;;  %s732_s9 = scalar_lea.sflag [#allocation19], %s4669_s13  ;;  %s742_s30 = int_to_ptr.vmem [resolvable:$true] %s741_s30 }
 0x150   : > { %s5048_s22 = scalar_lea.hbm %s5703_s11, %s3357_s0  ;;  %s4286_s19 = scalar_lea.hbm %s5703_s11, 32 }
 0x151   : > { %s4281_s4 = scalar_lea.hbm %s5048_s22, 16  ;;  %p4287_p11 = scmp.lt.u32.totalorder %s5048_s22, %s5703_s11 }
 0x152   : > { %p4282_p2 = scmp.ne.s32.totalorder %s5048_s22, %s4281_s4  ;;  %p4288_p0 = scmp.lt.u32.totalorder %s4286_s19, %s4281_s4 }
 0x153   : > { %p4290_p8 = scmp.lt.u32.totalorder %s4281_s4, %s5048_s22 }
 0x154   : > { %p4284_p5 = pnand %p4282_p2, %p5693_p3  ;;  %p4289_p6 = por %p4288_p0, %p4287_p11 }
 0x156   : > { %p4285_p7 = pneg %p4284_p5  ;;  %p4291_p4 = por %p4290_p8, %p4289_p6 }
 0x158   : > { %p4292_p13 = pnand %p4291_p4, %p4285_p7 }
 0x15a   : > { %4295 = shalt.err (!%p4292_p13)
}
 0x15b   : > { %s4296_s13 = scalar_lea.vmem %s742_s30, 16  ;;  %s4472_s17 = smov [#allocation18]  }
 0x15c   : > { %p4297_p12 = scmp.ne.s32.totalorder %s742_s30, %s4296_s13  ;;  %s4301_s0 = sshll.u32 %s4472_s17, 4  ;;  %s4302_s0 = int_to_ptr.vmem [resolvable:$false] %s4301_s0 }
 0x15d   : > { %s4303_s23 = scalar_lea.vmem %s4302_s0, 32  ;;  %p4304_p2 = scmp.lt.s32.totalorder %s742_s30, %s4302_s0 }
 0x15e   : > { %p4299_p1 = pnand %p4297_p12, %p5693_p3  ;;  %p4305_p5 = scmp.lt.s32.totalorder %s4303_s23, %s4296_s13 }
 0x160   : > { %p4300_p9 = pneg %p4299_p1  ;;  %p4306_p10 = por %p4305_p5, %p4304_p2 }
 0x162   : > { %p4307_p0 = pnand %p4306_p10, %p4300_p9 }
 0x164   : > { %4310 = shalt.err (!%p4307_p0)
}
 0x165   : > { %p5704_p11 = scmp.ne.s32.totalorder %s5667_s24, 0  ;;  %s5705_s5 = sld [smem:[#allocation42_spill]] }
 0x167   : > { %3838 = dma.hbm_to_vmem [thread:$0]  (!%p5704_p11), %s5048_s22, 16, %s742_s30, %s732_s9  }
 0x16b   : > { %p5706_p7 = scmp.ne.s32.totalorder %s5705_s5, 0 }
 0x16d   : > { %764 = sbr.rel (%p5706_p7) target bundleno = 7389 (0x1cdd), region = 88 }
 0x174   : > { %s5707_s15 = sld [smem:[#allocation39_spill]]  ;;  %s5072_s21 = sand.u32 1, %s4433_s28  }
 0x175   : > { %s767_s4 = scalar_lea.sflag [#allocation4], %s5072_s21 }
 0x17a   : > { %p5708_p3 = scmp.ne.s32.totalorder %s5707_s15, 0 }
 0x17c   : > { %4384 = dma.done.wait (%p5708_p3), %s767_s4, 16  }
 0x17d   : > { %4386 = vsyncadd (%p5708_p3), %s767_s4, 4294967280  ;;  %s774_s24 = sand.u32 1, %s4625_s20  }
 0x17e   : > { %s775_s22 = scalar_lea.sflag [#allocation7], %s774_s24 }
 0x17f   : > { %4388 = dma.done.wait (%p5708_p3), %s775_s22, 16  }
 0x180   : > { %4390 = vsyncadd (%p5708_p3), %s775_s22, 4294967280  ;;  %p5709_p10 = scmp.eq.s32.totalorder %s4625_s20, 0 }
 0x182   : > { %4392 = dma.done.wait (%p5709_p10), [#allocation7], 128   ;;  %p5710_p6 = pmov %p5709_p10 }
 0x183   : > { %s5711_s9 = sld [smem:[#allocation29_spill]]  ;;  %s5712_s7 = sld [smem:[#allocation40_spill]] }
 0x184   : > { %4394 = vsyncadd (%p5710_p6), [#allocation7], 4294967168  ;;  %s787_s10 = scalar_lea.sflag [#allocation10], %s774_s24 }
 0x189   : > { %s5091_s19 = sand.u32 1, %s5711_s9   ;;  %p5714_p8 = scmp.ne.s32.totalorder %s5712_s7, 0 }
 0x18a   : > { %5713 = sst [smem:[#allocation48_spill]] %s5091_s19  ;;  %s3780_s16 = smul.u32 3, %s5091_s19 }
 0x18c   : > { %s5094_s13 = scalar_lea.vmem [#allocation9], %s3780_s16 }
 0x18d   : > { %4396 = dma.done.wait (%p5714_p8), %s787_s10, 96  }
 0x18e   : > { %4398 = vsyncadd (%p5714_p8), %s787_s10, 4294967200  ;;  %s3781_s17 = smul.u32 96, %s5091_s19  ;;  %s5101_s0 = scalar_lea.vmem [#allocation11], %s3780_s16 }
 0x18f   : > { %s805_s20 = scalar_lea.sflag [#allocation13], %s774_s24 }
 0x190   : > { %s5103_s23 = scalar_lea.vmem [#allocation12], %s3781_s17 }
 0x191   : > { %4400 = dma.done.wait (%p5714_p8), %s805_s20, 1632  }
 0x192   : > { %4402 = vsyncadd (%p5714_p8), %s805_s20, 4294965664  ;;  %s3782_s5 = smul.u32 6, %s5091_s19  ;;  %s3360_s15 = sshll.u32 %s5091_s19, 1 }
 0x193   : > { %s823_s22 = scalar_lea.sflag [#allocation16], %s774_s24  ;;  %s5113_s9 = scalar_lea.vmem [#allocation15], %s3360_s15 }
 0x194   : > { %s5111_s4 = scalar_lea.vmem [#allocation14], %s3782_s5 }
 0x195   : > { %4404 = dma.done.wait (%p5714_p8), %s823_s22, 288  }
 0x196   : > { %4406 = vsyncadd (%p5714_p8), %s823_s22, 4294967008  ;;  %s3361_s16 = sshll.u32 %s5091_s19, 4  ;;  %s841_s17 = scalar_lea.sflag [#allocation19], %s5091_s19 }
 0x197   : > { %s5120_s10 = scalar_lea.vmem [#allocation17], %s3361_s16 }
 0x198   : > { %5715 = sst [smem:[#allocation49_spill]] %s5120_s10 }
 0x199   : > { %4408 = dma.done.wait (%p5714_p8), %s841_s17, 16  }
 0x19a   : > { %4410 = vsyncadd (%p5714_p8), %s841_s17, 4294967280  ;;  %s5716_s24 = sld [smem:[#allocation35_spill]]  ;;  %s5717_s5 = sld [smem:[#allocation34_spill]] }
 0x19b   : > { %s3362_s15 = sshll.u32 %s5072_s21, 3  ;;  %s5718_s2 = sld [smem:[#allocation50_spill]] }
 0x19c   : > { %s5719_s6 = sld [smem:[#allocation51_spill]]  ;;  %s5720_s29 = sld [smem:[#allocation64_spill]] }
 0x19d   : > { %s5721_s1 = sld [smem:[#allocation59_spill]]  ;;  %s5722_s10 = sld [smem:[#allocation63_spill]] }
 0x1a0   : > { %p953_p4 = scmp.lt.s32.totalorder %s5716_s24, 1  ;;  %p962_p13 = scmp.lt.s32.totalorder %s5717_s5, 1 }
 0x1a1   : > { %p3370_p12 = scmp.ne.s32.totalorder %s5717_s5, 0 }
 0x1a2   : > { %s5757_s24 = smov (!%p953_p4, %s5716_s24), 1  ;;  %v981_v1 = vld [vmem:[#allocation8] sm:$0xff] (!%p3370_p12)  ;;  %vm983_vm0 = vcmask (!%p3370_p12), 261120  }
 0x1a3   : > { %s5133_s22 = scalar_select %p962_p13, %s5717_s5, 1 }
 0x1a4   : > { %s3363_s16 = sshll.u32 %s5757_s24, 3  ;;  %s3483_s20 = sshll.u32 %s5757_s24, 4 }
 0x1a5   : > { %s956_s7 = scalar_lea.vmem %s5718_s2, %s3363_s16  ;;  %s5141_s11 = scalar_lea.vmem %s5719_s6, %s3483_s20 }
 0x1a6   : > { %s3484_s12 = sshll.u32 %s5133_s22, 5  ;;  %s974_s28 = scalar_lea.vmem %s5720_s29, %s5133_s22  ;;  %v980_v0 = vld [vmem:[%s956_s7] sm:$0xff] (!%p3370_p12) }
 0x1a7   : > { %s5151_s25 = scalar_lea.vmem %s5721_s1, %s3484_s12  ;;  %s5156_s8 = scalar_lea.vmem %s5722_s10, %s3484_s12  ;;  %v982_v2 = vadd.f32 (!%p3370_p12), %v981_v1, %v980_v0 }
 0x1a8   : > { %s5158_s2 = scalar_lea.vmem [#allocation20], %s3362_s15  ;;  %979 = sbr.rel (%p3370_p12) target bundleno = 431 (0x1af), region = 132 }
 0x1a9   : > { %984 = vst.msk [vmem:[#allocation2] sm:$0xff] (!%p3370_p12), %vm983_vm0, %v982_v2 }
 0x1af PF: > { %vm1009_vm1 = vcmask 261120   ;;  %v3947_v10 = vld [vmem:[%s5103_s23] sm:$0xff]   ;;  %v3948_v11 = vld [vmem:[%s5103_s23 + $0x10] sm:$0xff]   ;;  %v4473_v12 = vmov 0.0   ;;  %v3949_v13 = vld [vmem:[%s5103_s23 + $0x8] sm:$0xff]   ;;  %vm4474_vm2 = vmmov 0   ;;  %v989_v59 = vlaneseq }
 0x1b0   : > { %v5161_v3 = vld [vmem:[#allocation2] sm:$0xff]  ;;  %3560 = vmatprep.subr.bf16.mxu0 %v4473_v12  ;;  %3568 = vmatprep.subr.bf16.mxu1 %v4473_v12  ;;  %v3950_v14 = vld [vmem:[%s5103_s23 + $0x18] sm:$0xff]   ;;  %v3371_v24 = vld [vmem:[%s5094_s13] ss:$0 sm:$0xff]  ;;  %vm1246_vm5 = vcmask 64512   ;;  %s4475_s3 = smov 120  }
 0x1b1   : > { %v1010_v4 = vsel %vm1009_vm1, %v5161_v3, 0.0  ;;  %3561 = vmatpush3.bf16.msra.mxu0 %v3947_v10  ;;  %3569 = vmatpush3.bf16.msra.mxu1 %v3948_v11  ;;  %v3372_v26 = vld [vmem:[%s5101_s0] ss:$0 sm:$0xff]  ;;  %v3951_v29 = vld [vmem:[%s5103_s23 + $0x20] sm:$0xff]   ;;  %v3952_v31 = vld [vmem:[%s5103_s23 + $0x28] sm:$0xff]   ;;  %vm1308_vm6 = vcmask 1043456  }
 0x1b2   : > { %1011 = vadd.xlane.f32.xlu0 %v1010_v4  ;;  %3562 = vmatprep.subr.bf16.mxu0 %v4473_v12  ;;  %v3373_v32 = vld [vmem:[%s5111_s4] ss:$0 sm:$0xff]  ;;  %v3382_v33 = vld [vmem:[%s5111_s4 + $0x1] ss:$0 sm:$0xff]  ;;  %v3391_v47 = vld [vmem:[%s5111_s4 + $0x2] ss:$0 sm:$0xff] }
 0x1b3   : > { %3570 = vmatprep.subr.bf16.mxu1 %v4473_v12  ;;  %3564 = vmatprep.mubr.msk.bf16.mxu0 %vm4474_vm2, %v4473_v12  ;;  %s5723_s6 = scalar_lea.vmem [#allocation3], %s5072_s21  ;;  %v5226_v61 = vshrl.u32 %v989_v59, 7  ;;  %v4476_v63 = vmov 0   ;;  %v992_v1 = vand.u32 127, %v989_v59  ;;  %v4477_v4 = vmov -1e+30  }
 0x1b4   : > { %3572 = vmatprep.mubr.msk.bf16.mxu1 %vm4474_vm2, %v4473_v12  ;;  %v993_v60 = vld [vmem:[%s5723_s6] sm:$0x1]  ;;  %s4478_s26 = smov 112   ;;  %s4479_s29 = smov 104   ;;  %vm2189_vm14 = vcmask 130048  }
 0x1b5   : > { %3563 = vmatpush3.bf16.msra.mxu0 %v3949_v13  ;;  %3571 = vmatpush3.bf16.msra.mxu1 %v3950_v14  ;;  %vm994_vm7 = vcmp.gt.f32.partialorder %v993_v60, 0.0  ;;  %v999_v62 = vsub.s32 0, %v5226_v61  ;;  %vm995_vm8 = vcmp.ge.s32.totalorder %v5226_v61, %v992_v1  ;;  %s5724_s18 = scalar_lea.vmem [#allocation6], %s5072_s21  ;;  %s5725_s1 = sld [smem:[#allocation49_spill]] }
 0x1b6   : > { %3576 = vmatprep.subr.bf16.mxu0 %v4473_v12  ;;  %3584 = vmatprep.subr.bf16.mxu1 %v4473_v12  ;;  %v996_v0 = vsel %vm994_vm7, 1, %v4476_v63  ;;  %s5729_s30 = sld [smem:[#allocation34_spill]] }
 0x1b7   : > { %v1000_v2 = vrot.slane %v996_v0, %v999_v62 }
 0x1b9   : > { %vm1001_vm9 = vcmp.eq.s32.totalorder %v1000_v2, 1 }
 0x1ba   : > { %vm1002_vm10 = vmand %vm995_vm8, %vm1001_vm9 }
 0x1bc   : > { %p3474_p1 = scmp.ne.s32.totalorder %s5729_s30, 1 }
 0x23f   : > { %v1012_v5 = vpop.xlane.xlu0 %1011 }
 0x240   : > { %v1014_v6 = vmul.f32 0.03125, %v1012_v5  ;;  %v5233_v5 = vsel %vm1002_vm10, 0.0, %v4477_v4 }
 0x242   : > { %v1015_v7 = vsub.f32 %v5161_v3, %v1014_v6 }
 0x244   : > { %v1016_v8 = vmul.f32 %v1015_v7, %v1015_v7 }
 0x246   : > { %v1017_v9 = vsel %vm1009_vm1, %v1016_v8, 0.0 }
 0x247   : > { %1018 = vadd.xlane.f32.xlu0 %v1017_v9 }
 0x2d4   : > { %v1019_v15 = vpop.xlane.xlu0 %1018 }
 0x2d5   : > { %v1020_v16 = vmul.f32 0.03125, %v1019_v15 }
 0x2d7   : > { %v1021_v17 = vadd.f32 1e-06, %v1020_v16 }
 0x2d9   : > { %3965 = vrsqrt.f32 %v1021_v17  ;;  %vm1024_vm3 = vcmp.eq.f32.partialorder %v1021_v17, inf  ;;  %v1027_v20 = vand.u32 2147483648, %v1021_v17  ;;  %vm1026_vm4 = vcmp.eq.f32.partialorder %v1021_v17, 0.0 }
 0x2e3   : > { %v3966_v18 = vpop.eup %3965 }
 0x2e4   : > { %v1023_v19 = vmul.f32 %v3966_v18, %v1021_v17 }
 0x2e6   : > { %v1025_v21 = vsel %vm1024_vm3, %v1021_v17, %v1023_v19 }
 0x2e7   : > { %v1028_v22 = vsel %vm1026_vm4, %v1027_v20, %v1025_v21 }
 0x2e8   : > { %3967 = vrcp.f32 %v1028_v22 }
 0x2f2   : > { %v3968_v23 = vpop.eup %3967 }
 0x2f3   : > { %v1030_v25 = vmul.f32 %v3968_v23, %v1015_v7 }
 0x2f5   : > { %v1037_v27 = vmul.f32 %v3371_v24, %v1030_v25 }
 0x2f7   : > { %v1044_v28 = vadd.f32 %v3372_v26, %v1037_v27 }
 0x2f9   : > { %v1045_v30 = vpack.c.bf16 %v1044_v28, %v1044_v28 }
 0x2fb   : > { %3565 = vmatmul.mubr.msk.bf16.vlgmr.msra.gmra.mrb[0].mxu0 %vm1009_vm1, %v1045_v30  ;;  %3573 = vmatmul.mubr.msk.bf16.vlgmr.msra.gmra.mrb[0].mxu1 %vm1009_vm1, %v1045_v30 }
 0x2fc   : > { %3577 = vmatpush3.bf16.msra.mxu0 %v3951_v29  ;;  %3580 = vmatprep.mubr.msk.bf16.mxu0 %vm4474_vm2, %v4473_v12 }
 0x2fd   : > { %3578 = vmatprep.subr.bf16.mxu0 %v4473_v12  ;;  %3586 = vmatprep.mubr.msk.bf16.mxu1 %vm4474_vm2, %v4473_v12 }
 0x300   : > { %3579 = vmatpush3.bf16.msra.mxu0 %v3952_v31 }
 0x301   : > { %3590 = vmatprep.subr.bf16.mxu0 %v4473_v12 }
 0x303   : > { %3581 = vmatmul.mubr.msk.bf16.vlgmr.msra.gmra.mrb[4].mxu0 %vm1009_vm1, %v1045_v30 }
 0x304   : > { %3592 = vmatprep.mubr.msk.bf16.mxu0 %vm4474_vm2, %v4473_v12 }
 0x3ce   : > { %v1106_v34 = vpop.f32.mrb[0].mxu0  ;;  %v1171_v35 = vpop.f32.mrb[0].mxu1 }
 0x3cf   : > { %v1107_v36 = vadd.f32 %v3373_v32, %v1106_v34  ;;  %v1172_v37 = vadd.f32 %v3382_v33, %v1171_v35  ;;  %v3566_v38 = vpop.f32.mrb[1].mxu0  ;;  %v3574_v39 = vpop.f32.mrb[1].mxu1  ;;  %v3399_v33 = vld [vmem:[%s5151_s25 + $0x4] sm:$0xf] }
 0x3d0   : > { %v1109_v40 = vpop.f32.mrb[2].mxu0  ;;  %v1174_v41 = vpop.f32.mrb[2].mxu1  ;;  %v1474_v34 = vsel %vm1308_vm6, %v3399_v33, 0  ;;  %v1353_v39 = vld [vmem:[%s5151_s25] sm:$0xf] }
 0x3d1   : > { %v1242_v42 = vmul.f32 0.35355338, %v1107_v36  ;;  %v5198_v43 = vpack.c.bf16 %v1172_v37, %v1172_v37  ;;  %v3567_v44 = vpop.f32.mrb[3].mxu0  ;;  %v3575_v45 = vpop.f32.mrb[3].mxu1 }
 0x3d3   : > { %1358 = vrot.lane.b32.xlu1 %v5198_v43, %s4475_s3  ;;  %v1251_v46 = vsel %vm1246_vm5, %v5198_v43, 0  ;;  %v5205_v48 = vpack.c.bf16 %v1242_v42, %v1242_v42  ;;  %v1520_v42 = vsel %vm1308_vm6, %v1353_v39, 0 }
 0x3d4   : > { %3585 = vmatpush3.bf16.xpose.msra.mxu1 %v1251_v46 }
 0x3d5   : > { %3596 = vmatprep.subr.bf16.mxu1 %v4473_v12 }
 0x3d6   : > { %v1236_v49 = vpop.f32.mrb[4].mxu0 }
 0x3d7   : > { %v1237_v50 = vadd.f32 %v3391_v47, %v1236_v49  ;;  %1355 = vrot.lane.b32.xlu1 %v5205_v48, %s4475_s3  ;;  %v3582_v51 = vpop.f32.mrb[5].mxu0 }
 0x3d8   : > { %v1239_v52 = vpop.f32.mrb[6].mxu0 }
 0x3d9   : > { %v5210_v53 = vpack.c.bf16 %v1237_v50, %v1237_v50  ;;  %v3583_v54 = vpop.f32.mrb[7].mxu0 }
 0x3db   : > { %3587 = vmatmul.mubr.msk.bf16.vlgmr.msra.gmra.mrb[4].mxu1 %vm1246_vm5, %v5205_v48  ;;  %v1310_v55 = vsel %vm1308_vm6, %v5210_v53, 0 }
 0x3dc   : > { %3591 = vmatpush3.bf16.msra.mxu0 %v1310_v55  ;;  %3598 = vmatprep.mubr.msk.bf16.mxu1 %vm4474_vm2, %v4473_v12 }
 0x3dd   : > { %3602 = vmatprep.subr.bf16.mxu0 %v4473_v12 }
 0x445   : > { %v1359_v56 = vpop.permute.xlu1 %1358 }
 0x446   : > { %v1364_v57 = vsel %vm1246_vm5, %v1359_v56, 0 }
 0x447   : > { %3597 = vmatpush3.bf16.xpose.msra.mxu1 %v1364_v57 }
 0x448   : > { %3608 = vmatprep.subr.bf16.mxu1 %v4473_v12 }
 0x449   : > { %v1356_v58 = vpop.permute.xlu1 %1355 }
 0x44e   : > { %3599 = vmatmul.mubr.msk.bf16.vlgmr.msra.gmra.mrb[8].mxu1 %vm1246_vm5, %v1356_v58 }
 0x44f   : > { %3610 = vmatprep.mubr.msk.bf16.mxu1 %vm4474_vm2, %v4473_v12  ;;  %3609 = vmatpush3.bf16.msra.mxu1 %v1474_v34 }
 0x450   : > { %3620 = vmatprep.subr.bf16.mxu1 %v4473_v12 }
 0x4ae   : > { %v1287_v6 = vpop.f32.mrb[4].mxu1 }
 0x4af   : > { %v1288_v7 = vadd.f32 %v1287_v6, %v5233_v5  ;;  %v3588_v8 = vpop.f32.mrb[5].mxu1 }
 0x4b0   : > { %v1290_v9 = vpop.f32.mrb[6].mxu1 }
 0x4b1   : > { %v3589_v10 = vpop.f32.mrb[7].mxu1  ;;  %v1293_v11 = vsel %vm1246_vm5, %v1288_v7, -inf }
 0x4b2   : > { %1294 = vmax.xlane.f32.xlu0 %v1293_v11 }
 0x521   : > { %v1400_v13 = vpop.f32.mrb[8].mxu1 }
 0x522   : > { %v1401_v14 = vadd.f32 %v1400_v13, %v5233_v5  ;;  %v3600_v15 = vpop.f32.mrb[9].mxu1 }
 0x523   : > { %v1403_v16 = vpop.f32.mrb[10].mxu1 }
 0x524   : > { %v3601_v17 = vpop.f32.mrb[11].mxu1  ;;  %v1406_v18 = vsel %vm1246_vm5, %v1401_v14, -inf }
 0x525   : > { %1407 = vmax.xlane.f32.xlu1 %v1406_v18 }
 0x536   : > { %1562 = vrot.lane.b32.xlu1 %v5205_v48, %s4478_s26 }
 0x53f   : > { %v1295_v19 = vpop.xlane.xlu0 %1294 }
 0x540   : > { %v1296_v20 = vsub.f32 %v1288_v7, %v1295_v19 }
 0x542   : > { %v1297_v21 = vmul.f32 1.442695, %v1296_v20 }
 0x544   : > { %3969 = vpow2.f32 %v1297_v21 }
 0x54e   : > { %v3970_v22 = vpop.eup %3969 }
 0x54f   : > { %v1299_v23 = vsel %vm1246_vm5, %v3970_v22, 0.0 }
 0x550   : > { %1300 = vadd.xlane.f32.xlu0 %v1299_v23 }
 0x5b2   : > { %v1408_v24 = vpop.xlane.xlu1 %1407 }
 0x5b3   : > { %v1409_v25 = vsub.f32 %v1401_v14, %v1408_v24 }
 0x5b5   : > { %v1410_v26 = vmul.f32 1.442695, %v1409_v25 }
 0x5b6   : > { %v1563_v58 = vpop.permute.xlu1 %1562 }
 0x5b7   : > { %3971 = vpow2.f32 %v1410_v26 }
 0x5c1   : > { %v3972_v27 = vpop.eup %3971 }
 0x5c2   : > { %v1412_v28 = vsel %vm1246_vm5, %v3972_v27, 0.0 }
 0x5c3   : > { %1413 = vadd.xlane.f32.xlu0 %v1412_v28 }
 0x5d9   : > { %1419 = vrot.lane.b32.xlu0 %v5210_v53, %s4475_s3 }
 0x5dd   : > { %v1301_v29 = vpop.xlane.xlu0 %1300  ;;  %1564 = vrot.lane.b32.xlu0 %v5198_v43, %s4478_s26 }
 0x5de   : > { %3973 = vrcp.f32 %v1301_v29 }
 0x5e8   : > { %v3974_v30 = vpop.eup %3973 }
 0x5e9   : > { %v1303_v31 = vmul.f32 %v3974_v30, %v3970_v22 }
 0x5eb   : > { %v1304_v32 = vpack.c.bf16 %v1303_v31, %v1303_v31 }
 0x5ed   : > { %3593 = vmatmul.mubr.msk.bf16.vlgmr.msra.gmra.mrb[8].mxu0 %vm1246_vm5, %v1304_v32 }
 0x5ee   : > { %3604 = vmatprep.mubr.msk.bf16.mxu0 %vm4474_vm2, %v4473_v12 }
 0x650   : > { %v1414_v35 = vpop.xlane.xlu0 %1413 }
 0x651   : > { %3975 = vrcp.f32 %v1414_v35 }
 0x654   : > { %v1420_v36 = vpop.permute.xlu0 %1419 }
 0x655   : > { %v1425_v37 = vsel %vm1308_vm6, %v1420_v36, 0 }
 0x656   : > { %3603 = vmatpush3.bf16.msra.mxu0 %v1425_v37 }
 0x657   : > { %3614 = vmatprep.subr.bf16.mxu0 %v4473_v12 }
 0x658   : > { %v1565_v50 = vpop.permute.xlu0 %1564 }
 0x659   : > { %v1570_v56 = vsel %vm1246_vm5, %v1565_v50, 0 }
 0x65b   : > { %v3976_v38 = vpop.eup %3975 }
 0x65c   : > { %v1416_v40 = vmul.f32 %v3976_v38, %v3972_v27 }
 0x65e   : > { %v1417_v41 = vpack.c.bf16 %v1416_v40, %v1416_v40 }
 0x660   : > { %3605 = vmatmul.mubr.msk.bf16.vlgmr.msra.gmra.mrb[12].mxu0 %vm1246_vm5, %v1417_v41 }
 0x661   : > { %3615 = vmatpush3.bf16.msra.mxu0 %v1520_v42  ;;  %3616 = vmatprep.mubr.msk.bf16.mxu0 %vm4474_vm2, %v4473_v12 }
 0x662   : > { %3626 = vmatprep.subr.bf16.mxu0 %v4473_v12 }
 0x6c0   : > { %v1346_v44 = vpop.f32.mrb[8].mxu0 }
 0x6c1   : > { %v1352_v45 = vpack.c.bf16 %v1346_v44, %v1346_v44  ;;  %v3594_v46 = vpop.f32.mrb[9].mxu0 }
 0x6c2   : > { %v1349_v47 = vpop.f32.mrb[10].mxu0 }
 0x6c3   : > { %v3595_v49 = vpop.f32.mrb[11].mxu0  ;;  %3617 = vmatmul.mubr.msk.bf16.vlgmr.msra.gmra.mrb[16].mxu0 %vm1246_vm5, %v1352_v45 }
 0x6c4   : > { %3628 = vmatprep.mubr.msk.bf16.mxu0 %vm4474_vm2, %v4473_v12  ;;  %v3408_v49 = vld [vmem:[%s5151_s25 + $0xc] sm:$0xf] }
 0x6c5   : > { %v1839_v50 = vsel %vm1308_vm6, %v3408_v49, 0 }
 0x733   : > { %v1461_v51 = vpop.f32.mrb[12].mxu0 }
 0x734   : > { %v1467_v52 = vpack.c.bf16 %v1461_v51, %v1461_v51  ;;  %v3606_v54 = vpop.f32.mrb[13].mxu0 }
 0x735   : > { %v1464_v55 = vpop.f32.mrb[14].mxu0 }
 0x736   : > { %v3607_v57 = vpop.f32.mrb[15].mxu0  ;;  %3611 = vmatmul.mubr.msk.bf16.vlgmr.msra.gmra.mrb[12].mxu1 %vm1246_vm5, %v1467_v52 }
 0x737   : > { %3621 = vmatpush3.bf16.xpose.msra.mxu1 %v1570_v56  ;;  %3622 = vmatprep.mubr.msk.bf16.mxu1 %vm4474_vm2, %v4473_v12 }
 0x738   : > { %3632 = vmatprep.subr.bf16.mxu1 %v4473_v12 }
 0x73e   : > { %3623 = vmatmul.mubr.msk.bf16.vlgmr.msra.gmra.mrb[16].mxu1 %vm1246_vm5, %v1563_v58 }
 0x73f   : > { %3634 = vmatprep.mubr.msk.bf16.mxu1 %vm4474_vm2, %v4473_v12 }
 0x796   : > { %v1556_v59 = vpop.f32.mrb[16].mxu0 }
 0x797   : > { %v3618_v60 = vpop.f32.mrb[17].mxu0 }
 0x798   : > { %v1559_v63 = vpop.f32.mrb[18].mxu0 }
 0x799   : > { %v3619_v0 = vpop.f32.mrb[19].mxu0 }
 0x809   : > { %v1510_v1 = vpop.f32.mrb[12].mxu1 }
 0x80a   : > { %v5272_v2 = vadd.f32 %v1556_v59, %v1510_v1  ;;  %v3612_v6 = vpop.f32.mrb[13].mxu1 }
 0x80b   : > { %v1513_v7 = vpop.f32.mrb[14].mxu1 }
 0x80c   : > { %v3613_v8 = vpop.f32.mrb[15].mxu1  ;;  %v3410_v7 = vld [vmem:[%s5113_s9] ss:$0 sm:$0xff] }
 0x811   : > { %v1606_v9 = vpop.f32.mrb[16].mxu1 }
 0x812   : > { %v1607_v10 = vadd.f32 %v1606_v9, %v5233_v5  ;;  %v3624_v11 = vpop.f32.mrb[17].mxu1 }
 0x813   : > { %v1609_v13 = vpop.f32.mrb[18].mxu1 }
 0x814   : > { %v3625_v14 = vpop.f32.mrb[19].mxu1  ;;  %v1612_v15 = vsel %vm1246_vm5, %v1607_v10, -inf }
 0x815   : > { %1613 = vmax.xlane.f32.xlu0 %v1612_v15 }
 0x82b   : > { %1624 = vrot.lane.b32.xlu0 %v5210_v53, %s4478_s26 }
 0x82f   : > { %1722 = vrot.lane.b32.xlu0 %v5205_v48, %s4479_s29 }
 0x8a2   : > { %v1614_v16 = vpop.xlane.xlu0 %1613 }
 0x8a3   : > { %v1615_v17 = vsub.f32 %v1607_v10, %v1614_v16 }
 0x8a5   : > { %v1616_v18 = vmul.f32 1.442695, %v1615_v17 }
 0x8a6   : > { %v1625_v19 = vpop.permute.xlu0 %1624 }
 0x8a7   : > { %3977 = vpow2.f32 %v1616_v18  ;;  %v1630_v20 = vsel %vm1308_vm6, %v1625_v19, 0 }
 0x8a8   : > { %3627 = vmatpush3.bf16.msra.mxu0 %v1630_v20 }
 0x8a9   : > { %3638 = vmatprep.subr.bf16.mxu0 %v4473_v12 }
 0x8aa   : > { %v1723_v28 = vpop.permute.xlu0 %1722 }
 0x8b1   : > { %v3978_v21 = vpop.eup %3977 }
 0x8b2   : > { %v1618_v22 = vsel %vm1246_vm5, %v3978_v21, 0.0 }
 0x8b3   : > { %1619 = vadd.xlane.f32.xlu1 %v1618_v22  ;;  %v3955_v22 = vld [vmem:[%s5103_s23 + $0x30] sm:$0xff]  }
 0x8c4   : > { %1724 = vrot.lane.b32.xlu1 %v5198_v43, %s4479_s29  ;;  %v3404_v43 = vld [vmem:[%s5151_s25 + $0x8] sm:$0xf] }
 0x8c5   : > { %v1679_v29 = vsel %vm1308_vm6, %v3404_v43, 0 }
 0x8c6   : > { %3633 = vmatpush3.bf16.msra.mxu1 %v1679_v29 }
 0x8c7   : > { %3644 = vmatprep.subr.bf16.mxu1 %v4473_v12 }
 0x940   : > { %v1620_v23 = vpop.xlane.xlu1 %1619 }
 0x941   : > { %3979 = vrcp.f32 %v1620_v23  ;;  %v3954_v23 = vld [vmem:[%s5103_s23 + $0x48] sm:$0xff]  }
 0x944   : > { %v1725_v25 = vpop.permute.xlu1 %1724 }
 0x945   : > { %v1730_v27 = vsel %vm1246_vm5, %v1725_v25, 0 }
 0x94b   : > { %v3980_v48 = vpop.eup %3979 }
 0x94c   : > { %v1622_v24 = vmul.f32 %v3980_v48, %v3978_v21  ;;  %v3953_v21 = vld [vmem:[%s5103_s23 + $0x40] sm:$0xff]  }
 0x94d   : > { %v986_v48 = vld [vmem:[%s5141_s11] sm:$0xff] }
 0x94e   : > { %v1623_v26 = vpack.c.bf16 %v1622_v24, %v1622_v24  ;;  %v3956_v24 = vld [vmem:[%s5103_s23 + $0x38] sm:$0xff]  }
 0x950   : > { %3629 = vmatmul.mubr.msk.bf16.vlgmr.msra.gmra.mrb[20].mxu0 %vm1246_vm5, %v1623_v26 }
 0x951   : > { %3639 = vmatpush3.bf16.xpose.msra.mxu0 %v1730_v27  ;;  %3640 = vmatprep.mubr.msk.bf16.mxu0 %vm4474_vm2, %v4473_v12 }
 0x952   : > { %3650 = vmatprep.subr.bf16.mxu0 %v4473_v12 }
 0x958   : > { %3641 = vmatmul.mubr.msk.bf16.vlgmr.msra.gmra.mrb[24].mxu0 %vm1246_vm5, %v1723_v28 }
 0x959   : > { %3652 = vmatprep.mubr.msk.bf16.mxu0 %vm4474_vm2, %v4473_v12  ;;  %3651 = vmatpush3.bf16.msra.mxu0 %v1839_v50  ;;  %v3420_v50 = vld [vmem:[%s5111_s4 + $0x3] ss:$0 sm:$0xff] }
 0x95a   : > { %3664 = vmatprep.subr.bf16.mxu0 %v4473_v12 }
 0xa23   : > { %v1666_v30 = vpop.f32.mrb[20].mxu0 }
 0xa24   : > { %v1672_v31 = vpack.c.bf16 %v1666_v30, %v1666_v30  ;;  %v3630_v32 = vpop.f32.mrb[21].mxu0 }
 0xa25   : > { %v1669_v33 = vpop.f32.mrb[22].mxu0 }
 0xa26   : > { %v3631_v34 = vpop.f32.mrb[23].mxu0  ;;  %3635 = vmatmul.mubr.msk.bf16.vlgmr.msra.gmra.mrb[20].mxu1 %vm1246_vm5, %v1672_v31 }
 0xa27   : > { %3646 = vmatprep.mubr.msk.bf16.mxu1 %vm4474_vm2, %v4473_v12  ;;  %v3413_v34 = vld [vmem:[%s5094_s13 + $0x1] ss:$0 sm:$0xff] }
 0xa2b   : > { %v1766_v35 = vpop.f32.mrb[24].mxu0 }
 0xa2c   : > { %v1767_v36 = vadd.f32 %v1766_v35, %v5233_v5  ;;  %v3642_v37 = vpop.f32.mrb[25].mxu0 }
 0xa2d   : > { %v1769_v38 = vpop.f32.mrb[26].mxu0 }
 0xa2e   : > { %v3643_v39 = vpop.f32.mrb[27].mxu0  ;;  %v1772_v40 = vsel %vm1246_vm5, %v1767_v36, -inf }
 0xa2f   : > { %1773 = vmax.xlane.f32.xlu0 %v1772_v40  ;;  %v3429_v40 = vld [vmem:[%s5111_s4 + $0x4] ss:$0 sm:$0xff] }
 0xa45   : > { %1784 = vrot.lane.b32.xlu0 %v5210_v53, %s4479_s29 }
 0xabc   : > { %v1774_v41 = vpop.xlane.xlu0 %1773 }
 0xabd   : > { %v1775_v42 = vsub.f32 %v1767_v36, %v1774_v41  ;;  %v3414_v36 = vld [vmem:[%s5101_s0 + $0x1] ss:$0 sm:$0xff] }
 0xabf   : > { %v1776_v44 = vmul.f32 1.442695, %v1775_v42 }
 0xac0   : > { %v1785_v45 = vpop.permute.xlu0 %1784 }
 0xac1   : > { %3981 = vpow2.f32 %v1776_v44  ;;  %v1790_v46 = vsel %vm1308_vm6, %v1785_v45, 0 }
 0xac2   : > { %3645 = vmatpush3.bf16.msra.mxu1 %v1790_v46 }
 0xac3   : > { %3656 = vmatprep.subr.bf16.mxu1 %v4473_v12 }
 0xacb   : > { %v3982_v5 = vpop.eup %3981 }
 0xacc   : > { %v1778_v47 = vsel %vm1246_vm5, %v3982_v5, 0.0 }
 0xacd   : > { %1779 = vadd.xlane.f32.xlu1 %v1778_v47 }
 0xaf9   : > { %v1715_v53 = vpop.f32.mrb[20].mxu1 }
 0xafa   : > { %v1721_v51 = vadd.f32 %v1715_v53, %v5272_v2  ;;  %v3636_v52 = vpop.f32.mrb[21].mxu1 }
 0xafb   : > { %v1718_v54 = vpop.f32.mrb[22].mxu1 }
 0xafc   : > { %v3637_v55 = vpop.f32.mrb[23].mxu1 }
 0xb5a   : > { %v1780_v56 = vpop.xlane.xlu1 %1779 }
 0xb5b   : > { %3983 = vrcp.f32 %v1780_v56 }
 0xb65   : > { %v3984_v57 = vpop.eup %3983 }
 0xb66   : > { %v1782_v58 = vmul.f32 %v3984_v57, %v3982_v5 }
 0xb68   : > { %v1783_v59 = vpack.c.bf16 %v1782_v58, %v1782_v58 }
 0xb6a   : > { %3647 = vmatmul.mubr.msk.bf16.vlgmr.msra.gmra.mrb[24].mxu1 %vm1246_vm5, %v1783_v59 }
 0xb6b   : > { %3660 = vmatprep.mubr.msk.bf16.mxu1 %vm4474_vm2, %v4473_v12  ;;  %3657 = vmatpush3.bf16.msra.mxu1 %v3955_v22 }
 0xb6c   : > { %3658 = vmatprep.subr.bf16.mxu1 %v4473_v12 }
 0xb6f   : > { %3659 = vmatpush3.bf16.msra.mxu1 %v3956_v24 }
 0xb70   : > { %3672 = vmatprep.subr.bf16.mxu1 %v4473_v12 }
 0xc3d   : > { %v1826_v60 = vpop.f32.mrb[24].mxu1 }
 0xc3e   : > { %v1832_v63 = vpack.c.bf16 %v1826_v60, %v1826_v60  ;;  %v3648_v0 = vpop.f32.mrb[25].mxu1  ;;  %v3957_v60 = vld [vmem:[%s5103_s23 + $0x50] sm:$0xff]  }
 0xc3f   : > { %v1829_v1 = vpop.f32.mrb[26].mxu1 }
 0xc40   : > { %v3649_v6 = vpop.f32.mrb[27].mxu1  ;;  %3653 = vmatmul.mubr.msk.bf16.vlgmr.msra.gmra.mrb[28].mxu0 %vm1246_vm5, %v1832_v63  ;;  %v3958_v63 = vld [vmem:[%s5103_s23 + $0x58] sm:$0xff]   ;;  %v1004_v1 = vld [vmem:[%s5724_s18] sm:$0x1] }
 0xc41   : > { %3668 = vmatprep.mubr.msk.bf16.mxu0 %vm4474_vm2, %v4473_v12  ;;  %3665 = vmatpush3.bf16.msra.mxu0 %v3953_v21  ;;  %vm1005_vm13 = vcmp.gt.f32.partialorder %v1004_v1, 0.0  ;;  %v3438_v21 = vld [vmem:[%s5111_s4 + $0x5] ss:$0 sm:$0xff]  ;;  %s5731_s4 = sld [smem:[#allocation66_spill]] (!%p3474_p1) }
 0xc42   : > { %3666 = vmatprep.subr.bf16.mxu0 %v4473_v12  ;;  %v1006_v6 = vsel %vm1005_vm13, 0.0, %v4477_v4 }
 0xc45   : > { %3667 = vmatpush3.bf16.msra.mxu0 %v3954_v23 }
 0xc46   : > { %3680 = vmatprep.subr.bf16.mxu0 %v4473_v12 }
 0xd13   : > { %v1875_v2 = vpop.f32.mrb[28].mxu0 }
 0xd14   : > { %v1881_v8 = vadd.f32 %v1875_v2, %v1721_v51  ;;  %v3654_v9 = vpop.f32.mrb[29].mxu0  ;;  %v5376_v2 = vrot.slane %v1006_v6, %v999_v62 }
 0xd15   : > { %v1878_v10 = vpop.f32.mrb[30].mxu0 }
 0xd16   : > { %v1889_v11 = vadd.f32 %v3410_v7, %v1881_v8  ;;  %v3655_v13 = vpop.f32.mrb[31].mxu0 }
 0xd18   : > { %v5318_v14 = vadd.f32 %v1889_v11, %v5161_v3  ;;  %v987_v3 = vld [vmem:[%s5141_s11 + $0x8] sm:$0xff] }
 0xd19   : > { %v988_v25 = vpack.c.bf16 %v987_v3, %v986_v48 }
 0xd1a   : > { %v1895_v15 = vsel %vm1009_vm1, %v5318_v14, 0.0 }
 0xd1b   : > { %1896 = vadd.xlane.f32.xlu1 %v1895_v15  ;;  %3669 = vmatmul.mubr.msk.bf16.vlgmr.msra.gmra.mrb[32].mxu0 %vm1009_vm1, %v988_v25 }
 0xd1c   : > { %3682 = vmatprep.mubr.msk.bf16.mxu0 %vm4474_vm2, %v4473_v12 }
 0xda8   : > { %v1897_v16 = vpop.xlane.xlu1 %1896 }
 0xda9   : > { %v1898_v17 = vmul.f32 0.03125, %v1897_v16 }
 0xdab   : > { %v1899_v18 = vsub.f32 %v5318_v14, %v1898_v17 }
 0xdad   : > { %v1900_v19 = vmul.f32 %v1899_v18, %v1899_v18 }
 0xdaf   : > { %v1901_v20 = vsel %vm1009_vm1, %v1900_v19, 0.0 }
 0xdb0   : > { %1902 = vadd.xlane.f32.xlu1 %v1901_v20 }
 0xdee   : > { %v2060_v41 = vpop.f32.mrb[32].mxu0 }
 0xdef   : > { %v2061_v42 = vadd.f32 %v3429_v40, %v2060_v41  ;;  %v3670_v44 = vpop.f32.mrb[33].mxu0 }
 0xdf0   : > { %v2063_v45 = vpop.f32.mrb[34].mxu0 }
 0xdf1   : > { %v2064_v46 = vadd.f32 %v3429_v40, %v2063_v45  ;;  %v3671_v5 = vpop.f32.mrb[35].mxu0 }
 0xdf3   : > { %v5343_v47 = vpack.c.bf16 %v2064_v46, %v2061_v42  ;;  %v3444_v42 = vld [vmem:[%s5151_s25 + $0x10] sm:$0xf] }
 0xdf4   : > { %v2412_v46 = vsel %vm1308_vm6, %v3444_v42, 0 }
 0xdf5   : > { %2252 = vrot.lane.b32.xlu0 %v5343_v47, %s4475_s3  ;;  %v2147_v49 = vsel %vm1246_vm5, %v5343_v47, 0 }
 0xdf6   : > { %3681 = vmatpush3.bf16.xpose.msra.mxu0 %v2147_v49 }
 0xdf7   : > { %3692 = vmatprep.subr.bf16.mxu0 %v4473_v12 }
 0xe3d   : > { %v1903_v26 = vpop.xlane.xlu1 %1902 }
 0xe3e   : > { %v1904_v27 = vmul.f32 0.03125, %v1903_v26 }
 0xe40   : > { %v1905_v28 = vadd.f32 1e-06, %v1904_v27 }
 0xe42   : > { %3985 = vrsqrt.f32 %v1905_v28  ;;  %vm1908_vm11 = vcmp.eq.f32.partialorder %v1905_v28, inf  ;;  %v1911_v30 = vand.u32 2147483648, %v1905_v28  ;;  %vm1910_vm12 = vcmp.eq.f32.partialorder %v1905_v28, 0.0 }
 0xe4c   : > { %v3986_v43 = vpop.eup %3985 }
 0xe4d   : > { %v1907_v29 = vmul.f32 %v3986_v43, %v1905_v28 }
 0xe4f   : > { %v1909_v31 = vsel %vm1908_vm11, %v1905_v28, %v1907_v29 }
 0xe50   : > { %v1912_v32 = vsel %vm1910_vm12, %v1911_v30, %v1909_v31 }
 0xe51   : > { %3987 = vrcp.f32 %v1912_v32 }
 0xe5b   : > { %v3988_v33 = vpop.eup %3987 }
 0xe5c   : > { %v1914_v35 = vmul.f32 %v3988_v33, %v1899_v18 }
 0xe5e   : > { %v1921_v37 = vmul.f32 %v3413_v34, %v1914_v35 }
 0xe60   : > { %v1928_v38 = vadd.f32 %v3414_v36, %v1921_v37  ;;  %v3447_v37 = vld [vmem:[%s5151_s25 + $0x14] sm:$0xf] }
 0xe62   : > { %v1929_v39 = vpack.c.bf16 %v1928_v38, %v1928_v38  ;;  %v2366_v38 = vsel %vm1308_vm6, %v3447_v37, 0 }
 0xe64   : > { %3661 = vmatmul.mubr.msk.bf16.vlgmr.msra.gmra.mrb[28].mxu1 %vm1009_vm1, %v1929_v39 }
 0xe65   : > { %3676 = vmatprep.mubr.msk.bf16.mxu1 %vm4474_vm2, %v4473_v12  ;;  %3673 = vmatpush3.bf16.msra.mxu1 %v3957_v60 }
 0xe66   : > { %3674 = vmatprep.subr.bf16.mxu1 %v4473_v12 }
 0xe67   : > { %v2253_v55 = vpop.permute.xlu0 %2252 }
 0xe68   : > { %v2258_v59 = vsel %vm1246_vm5, %v2253_v55, 0 }
 0xe69   : > { %3675 = vmatpush3.bf16.msra.mxu1 %v3958_v63 }
 0xe6a   : > { %3686 = vmatprep.subr.bf16.mxu1 %v4473_v12 }
 0xe6c   : > { %3677 = vmatmul.mubr.msk.bf16.vlgmr.msra.gmra.mrb[32].mxu1 %vm1009_vm1, %v988_v25 }
 0xe6d   : > { %3688 = vmatprep.mubr.msk.bf16.mxu1 %vm4474_vm2, %v4473_v12 }
 0xf37   : > { %v1992_v53 = vpop.f32.mrb[28].mxu1 }
 0xf38   : > { %v1993_v51 = vadd.f32 %v3420_v50, %v1992_v53  ;;  %v3662_v52 = vpop.f32.mrb[29].mxu1 }
 0xf39   : > { %v1995_v54 = vpop.f32.mrb[30].mxu1 }
 0xf3a   : > { %v2133_v56 = vmul.f32 0.35355338, %v1993_v51  ;;  %v3663_v57 = vpop.f32.mrb[31].mxu1 }
 0xf3c   : > { %v5351_v58 = vpack.c.bf16 %v2133_v56, %v2133_v56 }
 0xf3e   : > { %2249 = vrot.lane.b32.xlu1 %v5351_v58, %s4475_s3  ;;  %3683 = vmatmul.mubr.msk.bf16.vlgmr.msra.gmra.mrb[36].mxu0 %vm1246_vm5, %v5351_v58 }
 0xf3f   : > { %3693 = vmatpush3.bf16.xpose.msra.mxu0 %v2258_v59  ;;  %3694 = vmatprep.mubr.msk.bf16.mxu0 %vm4474_vm2, %v4473_v12  ;;  %v2126_v22 = vpop.f32.mrb[32].mxu1 }
 0xf40   : > { %3704 = vmatprep.subr.bf16.mxu0 %v4473_v12  ;;  %v2127_v23 = vadd.f32 %v3438_v21, %v2126_v22  ;;  %v3678_v48 = vpop.f32.mrb[33].mxu1 }
 0xf41   : > { %v2129_v3 = vpop.f32.mrb[34].mxu1 }
 0xf42   : > { %v2130_v24 = vadd.f32 %v3438_v21, %v2129_v3  ;;  %v3679_v25 = vpop.f32.mrb[35].mxu1 }
 0xf44   : > { %v5385_v26 = vpack.c.bf16 %v2130_v24, %v2127_v23 }
 0xf46   : > { %3687 = vmatpush3.bf16.msra.mxu1 %v5385_v26 }
 0xf47   : > { %3698 = vmatprep.subr.bf16.mxu1 %v4473_v12 }
 0xfb0   : > { %v2250_v0 = vpop.permute.xlu1 %2249 }
 0xfb1   : > { %3695 = vmatmul.mubr.msk.bf16.vlgmr.msra.gmra.mrb[40].mxu0 %vm1246_vm5, %v2250_v0 }
 0xfb2   : > { %3706 = vmatprep.mubr.msk.bf16.mxu0 %vm4474_vm2, %v4473_v12  ;;  %3705 = vmatpush3.bf16.msra.mxu0 %v2366_v38 }
 0xfb3   : > { %3716 = vmatprep.subr.bf16.mxu0 %v4473_v12 }
0x1011   : > { %v2183_v7 = vpop.f32.mrb[36].mxu0 }
0x1012   : > { %v2184_v8 = vadd.f32 %v2183_v7, %v5376_v2  ;;  %v3684_v9 = vpop.f32.mrb[37].mxu0 }
0x1013   : > { %v2186_v10 = vpop.f32.mrb[38].mxu0 }
0x1014   : > { %v3685_v11 = vpop.f32.mrb[39].mxu0  ;;  %v2190_v13 = vsel %vm2189_vm14, %v2184_v8, -inf }
0x1015   : > { %2191 = vmax.xlane.f32.xlu0 %v2190_v13 }
0x1084   : > { %v2294_v15 = vpop.f32.mrb[40].mxu0 }
0x1085   : > { %v2295_v16 = vadd.f32 %v2294_v15, %v5376_v2  ;;  %v3696_v17 = vpop.f32.mrb[41].mxu0 }
0x1086   : > { %v2297_v4 = vpop.f32.mrb[42].mxu0 }
0x1087   : > { %v3697_v18 = vpop.f32.mrb[43].mxu0  ;;  %v2300_v61 = vsel %vm2189_vm14, %v2295_v16, -inf }
0x1088   : > { %2301 = vmax.xlane.f32.xlu1 %v2300_v61 }
0x1099   : > { %2456 = vrot.lane.b32.xlu1 %v5343_v47, %s4478_s26 }
0x10a2   : > { %v2192_v62 = vpop.xlane.xlu0 %2191 }
0x10a3   : > { %v2193_v19 = vsub.f32 %v2184_v8, %v2192_v62 }
0x10a5   : > { %v2194_v20 = vmul.f32 1.442695, %v2193_v19 }
0x10a7   : > { %3989 = vpow2.f32 %v2194_v20 }
0x10b1   : > { %v3990_v27 = vpop.eup %3989 }
0x10b2   : > { %v2196_v28 = vsel %vm2189_vm14, %v3990_v27, 0.0 }
0x10b3   : > { %2197 = vadd.xlane.f32.xlu0 %v2196_v28 }
0x1115   : > { %v2302_v43 = vpop.xlane.xlu1 %2301 }
0x1116   : > { %v2303_v29 = vsub.f32 %v2295_v16, %v2302_v43 }
0x1118   : > { %v2304_v30 = vmul.f32 1.442695, %v2303_v29 }
0x1119   : > { %v2457_v52 = vpop.permute.xlu1 %2456 }
0x111a   : > { %3991 = vpow2.f32 %v2304_v30  ;;  %v2462_v59 = vsel %vm1246_vm5, %v2457_v52, 0 }
0x1124   : > { %v3992_v31 = vpop.eup %3991 }
0x1125   : > { %v2306_v32 = vsel %vm2189_vm14, %v3992_v31, 0.0 }
0x1126   : > { %2307 = vadd.xlane.f32.xlu0 %v2306_v32 }
0x113c   : > { %2313 = vrot.lane.b32.xlu0 %v5385_v26, %s4475_s3 }
0x1140   : > { %v2198_v33 = vpop.xlane.xlu0 %2197  ;;  %2454 = vrot.lane.b32.xlu0 %v5351_v58, %s4478_s26 }
0x1141   : > { %3993 = vrcp.f32 %v2198_v33 }
0x114b   : > { %v3994_v34 = vpop.eup %3993 }
0x114c   : > { %v2200_v35 = vmul.f32 %v3994_v34, %v3990_v27 }
0x114e   : > { %v2201_v36 = vpack.c.bf16 %v2200_v35, %v2200_v35 }
0x1150   : > { %3689 = vmatmul.mubr.msk.bf16.vlgmr.msra.gmra.mrb[36].mxu1 %vm2189_vm14, %v2201_v36 }
0x1151   : > { %3700 = vmatprep.mubr.msk.bf16.mxu1 %vm4474_vm2, %v4473_v12 }
0x11b3   : > { %v2308_v39 = vpop.xlane.xlu0 %2307 }
0x11b4   : > { %3995 = vrcp.f32 %v2308_v39 }
0x11b7   : > { %v2314_v40 = vpop.permute.xlu0 %2313 }
0x11b8   : > { %3699 = vmatpush3.bf16.msra.mxu1 %v2314_v40 }
0x11b9   : > { %3710 = vmatprep.subr.bf16.mxu1 %v4473_v12 }
0x11bb   : > { %v2455_v63 = vpop.permute.xlu0 %2454 }
0x11be   : > { %v3996_v41 = vpop.eup %3995 }
0x11bf   : > { %v2310_v44 = vmul.f32 %v3996_v41, %v3992_v31 }
0x11c1   : > { %v2311_v45 = vpack.c.bf16 %v2310_v44, %v2310_v44 }
0x11c3   : > { %3701 = vmatmul.mubr.msk.bf16.vlgmr.msra.gmra.mrb[40].mxu1 %vm2189_vm14, %v2311_v45 }
0x11c4   : > { %3711 = vmatpush3.bf16.msra.mxu1 %v2412_v46  ;;  %3712 = vmatprep.mubr.msk.bf16.mxu1 %vm4474_vm2, %v4473_v12  ;;  %v3456_v46 = vld [vmem:[%s5151_s25 + $0x1c] sm:$0xf] }
0x11c5   : > { %3722 = vmatprep.subr.bf16.mxu1 %v4473_v12 }
0x1223   : > { %v2239_v5 = vpop.f32.mrb[36].mxu1 }
0x1224   : > { %v2245_v49 = vpack.c.bf16 %v2239_v5, %v2239_v5  ;;  %v3690_v50 = vpop.f32.mrb[37].mxu1 }
0x1225   : > { %v2242_v53 = vpop.f32.mrb[38].mxu1 }
0x1226   : > { %v3691_v51 = vpop.f32.mrb[39].mxu1  ;;  %3713 = vmatmul.mubr.msk.bf16.vlgmr.msra.gmra.mrb[44].mxu1 %vm1246_vm5, %v2245_v49 }
0x1227   : > { %3724 = vmatprep.mubr.msk.bf16.mxu1 %vm4474_vm2, %v4473_v12 }
0x1296   : > { %v2353_v54 = vpop.f32.mrb[40].mxu1 }
0x1297   : > { %v2359_v55 = vpack.c.bf16 %v2353_v54, %v2353_v54  ;;  %v3702_v56 = vpop.f32.mrb[41].mxu1 }
0x1298   : > { %v2356_v57 = vpop.f32.mrb[42].mxu1 }
0x1299   : > { %v3703_v60 = vpop.f32.mrb[43].mxu1  ;;  %3707 = vmatmul.mubr.msk.bf16.vlgmr.msra.gmra.mrb[44].mxu0 %vm1246_vm5, %v2359_v55 }
0x129a   : > { %3717 = vmatpush3.bf16.xpose.msra.mxu0 %v2462_v59  ;;  %3718 = vmatprep.mubr.msk.bf16.mxu0 %vm4474_vm2, %v4473_v12 }
0x129b   : > { %3728 = vmatprep.subr.bf16.mxu0 %v4473_v12 }
0x12a1   : > { %3719 = vmatmul.mubr.msk.bf16.vlgmr.msra.gmra.mrb[48].mxu0 %vm1246_vm5, %v2455_v63 }
0x12a2   : > { %3730 = vmatprep.mubr.msk.bf16.mxu0 %vm4474_vm2, %v4473_v12 }
0x12f9   : > { %v2448_v0 = vpop.f32.mrb[44].mxu1 }
0x12fa   : > { %v3714_v1 = vpop.f32.mrb[45].mxu1 }
0x12fb   : > { %v2451_v6 = vpop.f32.mrb[46].mxu1 }
0x12fc   : > { %v3715_v7 = vpop.f32.mrb[47].mxu1  ;;  %v3459_v6 = vld [vmem:[%s5113_s9 + $0x1] ss:$0 sm:$0xff] }
0x136c   : > { %v2402_v8 = vpop.f32.mrb[44].mxu0 }
0x136d   : > { %v5419_v9 = vadd.f32 %v2448_v0, %v2402_v8  ;;  %v3708_v10 = vpop.f32.mrb[45].mxu0 }
0x136e   : > { %v2405_v11 = vpop.f32.mrb[46].mxu0 }
0x136f   : > { %v3709_v13 = vpop.f32.mrb[47].mxu0 }
0x1374   : > { %v2498_v15 = vpop.f32.mrb[48].mxu0 }
0x1375   : > { %v2499_v16 = vadd.f32 %v2498_v15, %v5376_v2  ;;  %v3720_v17 = vpop.f32.mrb[49].mxu0 }
0x1376   : > { %v2501_v4 = vpop.f32.mrb[50].mxu0 }
0x1377   : > { %v3721_v18 = vpop.f32.mrb[51].mxu0  ;;  %v2504_v61 = vsel %vm2189_vm14, %v2499_v16, -inf }
0x1378   : > { %2505 = vmax.xlane.f32.xlu0 %v2504_v61 }
0x138e   : > { %2516 = vrot.lane.b32.xlu0 %v5385_v26, %s4478_s26 }
0x1392   : > { %2612 = vrot.lane.b32.xlu0 %v5351_v58, %s4479_s29 }
0x1405   : > { %v2506_v62 = vpop.xlane.xlu0 %2505 }
0x1406   : > { %v2507_v19 = vsub.f32 %v2499_v16, %v2506_v62  ;;  %v3959_v62 = vld [vmem:[%s5725_s1] sm:$0xff]  }
0x1408   : > { %v2508_v20 = vmul.f32 1.442695, %v2507_v19  ;;  %v3960_v19 = vld [vmem:[%s5725_s1 + $0x8] sm:$0xff]  }
0x1409   : > { %v2517_v21 = vpop.permute.xlu0 %2516 }
0x140a   : > { %3997 = vpow2.f32 %v2508_v20  ;;  %3723 = vmatpush3.bf16.msra.mxu1 %v2517_v21  ;;  %v3961_v20 = vld [vmem:[%s5156_s8] sm:$0xff]  }
0x140b   : > { %3734 = vmatprep.subr.bf16.mxu1 %v4473_v12 }
0x140d   : > { %v2613_v28 = vpop.permute.xlu0 %2612 }
0x1414   : > { %v3998_v22 = vpop.eup %3997 }
0x1415   : > { %v2510_v23 = vsel %vm2189_vm14, %v3998_v22, 0.0 }
0x1416   : > { %2511 = vadd.xlane.f32.xlu1 %v2510_v23 }
0x1427   : > { %2614 = vrot.lane.b32.xlu1 %v5343_v47, %s4479_s29  ;;  %v3452_v47 = vld [vmem:[%s5151_s25 + $0x18] sm:$0xf]  ;;  %s5726_s25 = sld [smem:[#allocation48_spill]] }
0x1428   : > { %v2569_v43 = vsel %vm1308_vm6, %v3452_v47, 0 }
0x1429   : > { %3729 = vmatpush3.bf16.msra.mxu0 %v2569_v43  ;;  %v3463_v43 = vld [vmem:[%s5101_s0 + $0x2] ss:$0 sm:$0xff] }
0x142a   : > { %3740 = vmatprep.subr.bf16.mxu0 %v4473_v12 }
0x142d   : > { %s5727_s27 = scalar_lea.vmem [#allocation18], %s5726_s25 }
0x14a3   : > { %v2512_v48 = vpop.xlane.xlu1 %2511 }
0x14a4   : > { %3999 = vrcp.f32 %v2512_v48 }
0x14a7   : > { %v2615_v24 = vpop.permute.xlu1 %2614 }
0x14a8   : > { %v2620_v27 = vsel %vm1246_vm5, %v2615_v24, 0 }
0x14ae   : > { %v4000_v3 = vpop.eup %3999 }
0x14af   : > { %v2514_v58 = vmul.f32 %v4000_v3, %v3998_v22 }
0x14b1   : > { %v2515_v25 = vpack.c.bf16 %v2514_v58, %v2514_v58 }
0x14b3   : > { %3725 = vmatmul.mubr.msk.bf16.vlgmr.msra.gmra.mrb[48].mxu1 %vm2189_vm14, %v2515_v25 }
0x14b4   : > { %3735 = vmatpush3.bf16.xpose.msra.mxu1 %v2620_v27  ;;  %3736 = vmatprep.mubr.msk.bf16.mxu1 %vm4474_vm2, %v4473_v12 }
0x14b5   : > { %3746 = vmatprep.subr.bf16.mxu1 %v4473_v12 }
0x14bb   : > { %3737 = vmatmul.mubr.msk.bf16.vlgmr.msra.gmra.mrb[52].mxu1 %vm1246_vm5, %v2613_v28  ;;  %v3462_v28 = vld [vmem:[%s5094_s13 + $0x2] ss:$0 sm:$0xff]  ;;  %s5730_s13 = sld [smem:[#allocation65_spill]] (!%p3474_p1) }
0x14bc   : > { %3748 = vmatprep.mubr.msk.bf16.mxu1 %vm4474_vm2, %v4473_v12 }
0x1586   : > { %v2556_v29 = vpop.f32.mrb[48].mxu1 }
0x1587   : > { %v2562_v30 = vpack.c.bf16 %v2556_v29, %v2556_v29  ;;  %v3726_v31 = vpop.f32.mrb[49].mxu1 }
0x1588   : > { %v2559_v32 = vpop.f32.mrb[50].mxu1 }
0x1589   : > { %v3727_v33 = vpop.f32.mrb[51].mxu1  ;;  %3731 = vmatmul.mubr.msk.bf16.vlgmr.msra.gmra.mrb[52].mxu0 %vm1246_vm5, %v2562_v30  ;;  %v3963_v32 = vld [vmem:[%s5156_s8 + $0x10] sm:$0xff]  }
0x158a   : > { %3742 = vmatprep.mubr.msk.bf16.mxu0 %vm4474_vm2, %v4473_v12  ;;  %v3964_v33 = vld [vmem:[%s5156_s8 + $0x18] sm:$0xff]  }
0x158e   : > { %v2656_v34 = vpop.f32.mrb[52].mxu1 }
0x158f   : > { %v2657_v35 = vadd.f32 %v2656_v34, %v5376_v2  ;;  %v3738_v36 = vpop.f32.mrb[53].mxu1  ;;  %v2727_v2 = vsel %vm1308_vm6, %v3456_v46, 0  ;;  %v3464_v34 = vld [vmem:[%s5727_s27] ss:$0 sm:$0xff] }
0x1590   : > { %v2659_v37 = vpop.f32.mrb[54].mxu1  ;;  %3747 = vmatpush3.bf16.msra.mxu1 %v2727_v2 }
0x1591   : > { %v3739_v38 = vpop.f32.mrb[55].mxu1  ;;  %v2662_v39 = vsel %vm2189_vm14, %v2657_v35, -inf  ;;  %3760 = vmatprep.subr.bf16.mxu1 %v4473_v12 }
0x1592   : > { %2663 = vmax.xlane.f32.xlu1 %v2662_v39 }
0x161f   : > { %v2664_v40 = vpop.xlane.xlu1 %2663 }
0x1620   : > { %v2665_v41 = vsub.f32 %v2657_v35, %v2664_v40 }
0x1622   : > { %v2666_v42 = vmul.f32 1.442695, %v2665_v41 }
0x1624   : > { %4001 = vpow2.f32 %v2666_v42  ;;  %v3468_v42 = vld [vmem:[%s974_s28] ss:$0 sm:$0xff] }
0x162e   : > { %v4002_v44 = vpop.eup %4001 }
0x162f   : > { %v2668_v45 = vsel %vm2189_vm14, %v4002_v44, 0.0 }
0x1630   : > { %2669 = vadd.xlane.f32.xlu0 %v2668_v45 }
0x1646   : > { %2674 = vrot.lane.b32.xlu0 %v5385_v26, %s4479_s29 }
0x165c   : > { %v2605_v5 = vpop.f32.mrb[52].mxu0 }
0x165d   : > { %v2611_v49 = vadd.f32 %v2605_v5, %v5419_v9  ;;  %v3732_v50 = vpop.f32.mrb[53].mxu0 }
0x165e   : > { %v2608_v53 = vpop.f32.mrb[54].mxu0 }
0x165f   : > { %v3733_v51 = vpop.f32.mrb[55].mxu0 }
0x16bd   : > { %v2670_v52 = vpop.xlane.xlu0 %2669 }
0x16be   : > { %4003 = vrcp.f32 %v2670_v52 }
0x16c1   : > { %v2675_v54 = vpop.permute.xlu0 %2674 }
0x16c2   : > { %3741 = vmatpush3.bf16.msra.mxu0 %v2675_v54 }
0x16c3   : > { %3752 = vmatprep.subr.bf16.mxu0 %v4473_v12 }
0x16c8   : > { %v4004_v26 = vpop.eup %4003 }
0x16c9   : > { %v2672_v55 = vmul.f32 %v4004_v26, %v4002_v44 }
0x16cb   : > { %v2673_v56 = vpack.c.bf16 %v2672_v55, %v2672_v55 }
0x16cd   : > { %3743 = vmatmul.mubr.msk.bf16.vlgmr.msra.gmra.mrb[56].mxu0 %vm2189_vm14, %v2673_v56 }
0x16ce   : > { %3756 = vmatprep.mubr.msk.bf16.mxu0 %vm4474_vm2, %v4473_v12  ;;  %3753 = vmatpush3.bf16.msra.mxu0 %v3959_v62 }
0x16cf   : > { %3754 = vmatprep.subr.bf16.mxu0 %v4473_v12 }
0x16d2   : > { %3755 = vmatpush3.bf16.msra.mxu0 %v3960_v19 }
0x17a0   : > { %v2714_v57 = vpop.f32.mrb[56].mxu0 }
0x17a1   : > { %v2720_v59 = vpack.c.bf16 %v2714_v57, %v2714_v57  ;;  %v3744_v60 = vpop.f32.mrb[57].mxu0 }
0x17a2   : > { %v2717_v63 = vpop.f32.mrb[58].mxu0 }
0x17a3   : > { %v3745_v0 = vpop.f32.mrb[59].mxu0  ;;  %3749 = vmatmul.mubr.msk.bf16.vlgmr.msra.gmra.mrb[56].mxu1 %vm1246_vm5, %v2720_v59 }
0x17a4   : > { %3768 = vmatprep.mubr.msk.bf16.mxu1 %vm4474_vm2, %v4473_v12  ;;  %3761 = vmatpush3.bf16.msra.mxu1 %v3961_v20  ;;  %vm2926_vm2 = vcmask 523264  }
0x17a5   : > { %3762 = vmatprep.subr.bf16.mxu1 %v4473_v12 }
0x1876   : > { %v2763_v1 = vpop.f32.mrb[56].mxu1 }
0x1877   : > { %v2769_v7 = vadd.f32 %v2763_v1, %v2611_v49  ;;  %v3750_v8 = vpop.f32.mrb[57].mxu1 }
0x1878   : > { %v2766_v9 = vpop.f32.mrb[58].mxu1  ;;  %v3476_v8 = vld [vmem:[%s5731_s4] ss:$0 sm:$0xff] (!%p3474_p1) }
0x1879   : > { %v2778_v10 = vadd.f32 %v3459_v6, %v2769_v7  ;;  %v3751_v11 = vpop.f32.mrb[59].mxu1  ;;  %v3475_v6 = vld [vmem:[%s5730_s13] ss:$0 sm:$0xff] (!%p3474_p1) }
0x187b   : > { %v2779_v13 = vadd.f32 %v2778_v10, %v5318_v14  ;;  %v3962_v14 = vld [vmem:[%s5156_s8 + $0x8] sm:$0xff]  }
0x187c   : > { %3763 = vmatpush3.bf16.msra.mxu1 %v3962_v14 }
0x187d   : > { %v2784_v15 = vsel %vm1009_vm1, %v2779_v13, 0.0  ;;  %3764 = vmatprep.subr.bf16.mxu1 %v4473_v12 }
0x187e   : > { %2785 = vadd.xlane.f32.xlu1 %v2784_v15 }
0x1880   : > { %3765 = vmatpush3.bf16.msra.mxu1 %v3963_v32 }
0x1881   : > { %3766 = vmatprep.subr.bf16.mxu1 %v4473_v12 }
0x1884   : > { %3767 = vmatpush3.bf16.msra.mxu1 %v3964_v33 }
0x190b   : > { %v2786_v16 = vpop.xlane.xlu1 %2785 }
0x190c   : > { %v2787_v17 = vmul.f32 0.03125, %v2786_v16 }
0x190e   : > { %v2788_v4 = vsub.f32 %v2779_v13, %v2787_v17 }
0x1910   : > { %v2789_v18 = vmul.f32 %v2788_v4, %v2788_v4 }
0x1912   : > { %v2790_v61 = vsel %vm1009_vm1, %v2789_v18, 0.0 }
0x1913   : > { %2791 = vadd.xlane.f32.xlu1 %v2790_v61 }
0x19a0   : > { %v2792_v21 = vpop.xlane.xlu1 %2791 }
0x19a1   : > { %v2793_v22 = vmul.f32 0.03125, %v2792_v21 }
0x19a3   : > { %v2794_v23 = vadd.f32 1e-06, %v2793_v22 }
0x19a5   : > { %4005 = vrsqrt.f32 %v2794_v23  ;;  %vm2797_vm15 = vcmp.eq.f32.partialorder %v2794_v23, inf  ;;  %v2800_v58 = vand.u32 2147483648, %v2794_v23  ;;  %vm2799_vm0 = vcmp.eq.f32.partialorder %v2794_v23, 0.0 }
0x19af   : > { %v4006_v48 = vpop.eup %4005 }
0x19b0   : > { %v2796_v3 = vmul.f32 %v4006_v48, %v2794_v23 }
0x19b2   : > { %v2798_v24 = vsel %vm2797_vm15, %v2794_v23, %v2796_v3 }
0x19b3   : > { %v2801_v25 = vsel %vm2799_vm0, %v2800_v58, %v2798_v24 }
0x19b4   : > { %4007 = vrcp.f32 %v2801_v25 }
0x19be   : > { %v4008_v27 = vpop.eup %4007 }
0x19bf   : > { %v2803_v47 = vmul.f32 %v4008_v27, %v2788_v4 }
0x19c1   : > { %v2810_v29 = vmul.f32 %v3462_v28, %v2803_v47 }
0x19c3   : > { %v2817_v30 = vadd.f32 %v3463_v43, %v2810_v29 }
0x19c5   : > { %v2818_v31 = vpack.c.bf16 %v2817_v30, %v2817_v30 }
0x19c7   : > { %3757 = vmatmul.mubr.msk.bf16.vlgmr.msra.gmra.mrb[60].mxu0 %vm1009_vm1, %v2818_v31 }
0x1a9a   : > { %v2879_v35 = vpop.f32.mrb[60].mxu0 }
0x1a9b   : > { %v2880_v36 = vadd.f32 %v3464_v34, %v2879_v35  ;;  %v3758_v37 = vpop.f32.mrb[61].mxu0 }
0x1a9c   : > { %v2882_v38 = vpop.f32.mrb[62].mxu0 }
0x1a9d   : > { %v2885_v39 = vmax.f32 %v2880_v36, 0.0  ;;  %v3759_v40 = vpop.f32.mrb[63].mxu0 }
0x1a9f   : > { %v2886_v41 = vpack.c.bf16 %v2885_v39, %v2885_v39 }
0x1aa1   : > { %3769 = vmatmul.mubr.msk.bf16.vlgmr.msra.gmra.mrb[60].mxu1 %vm2926_vm2, %v2886_v41 }
0x1b73   : > { %2975 = sbr.rel (%p3474_p1) target bundleno = 7362 (0x1cc2), region = 136 }
0x1b74   : > { %v2964_v44 = vpop.f32.mrb[60].mxu1 }
0x1b75   : > { %v2965_v12 = vadd.f32 %v3468_v42, %v2964_v44  ;;  %v3770_v45 = vpop.f32.mrb[61].mxu1 }
0x1b76   : > { %v2967_v46 = vpop.f32.mrb[62].mxu1 }
0x1b77   : > { %v2970_v2 = vadd.f32 %v2965_v12, %v2779_v13  ;;  %v3771_v5 = vpop.f32.mrb[63].mxu1 }
0x1b79   : > { %2971 = vst.msk [vmem:[#allocation2] sm:$0xff] %vm1009_vm1, %v2970_v2  ;;  %v2978_v49 = vsel (!%p3474_p1), %vm1009_vm1, %v2970_v2, 0.0 }
0x1b7a   : > { %2979 = vadd.xlane.f32.xlu0 %v2978_v49 }
0x1c07   : > { %v2980_v50 = vpop.xlane.xlu0 %2979 }
0x1c08   : > { %v2981_v53 = vmul.f32 0.03125, %v2980_v50 }
0x1c0a   : > { %v2982_v51 = vsub.f32 %v2970_v2, %v2981_v53 }
0x1c0c   : > { %v2983_v52 = vmul.f32 %v2982_v51, %v2982_v51 }
0x1c0e   : > { %v2984_v54 = vsel %vm1009_vm1, %v2983_v52, 0.0 }
0x1c0f   : > { %2985 = vadd.xlane.f32.xlu0 %v2984_v54 }
0x1c9c   : > { %v2986_v26 = vpop.xlane.xlu0 %2985 }
0x1c9d   : > { %v2987_v55 = vmul.f32 0.03125, %v2986_v26 }
0x1c9f   : > { %v2988_v56 = vadd.f32 1e-06, %v2987_v55 }
0x1ca1   : > { %4009 = vrsqrt.f32 %v2988_v56  ;;  %vm2991_vm3 = vcmp.eq.f32.partialorder %v2988_v56, inf  ;;  %v2994_v60 = vand.u32 2147483648, %v2988_v56  ;;  %vm2993_vm4 = vcmp.eq.f32.partialorder %v2988_v56, 0.0 }
0x1cab   : > { %v4010_v57 = vpop.eup %4009 }
0x1cac   : > { %v2990_v59 = vmul.f32 %v4010_v57, %v2988_v56 }
0x1cae   : > { %v2992_v63 = vsel %vm2991_vm3, %v2988_v56, %v2990_v59 }
0x1caf   : > { %v2995_v0 = vsel %vm2993_vm4, %v2994_v60, %v2992_v63 }
0x1cb0   : > { %4011 = vrcp.f32 %v2995_v0 }
0x1cba   : > { %v4012_v1 = vpop.eup %4011 }
0x1cbb   : > { %v2997_v7 = vmul.f32 %v4012_v1, %v2982_v51 }
0x1cbd   : > { %v3004_v9 = vmul.f32 %v3475_v6, %v2997_v7 }
0x1cbf   : > { %v3011_v10 = vadd.f32 %v3476_v8, %v3004_v9 }
0x1cc1   : > { %3012 = vst.msk [vmem:[%s5158_s2] sm:$0xff] %vm1009_vm1, %v3011_v10 }
0x1cc2 PF: > { %s5732_s9 = sld [smem:[#allocation35_spill]]  ;;  %s5733_s10 = sld [smem:[#allocation44_spill]] }
0x1cc3   : > { %s5734_s22 = sld [smem:[#allocation67_spill]]  ;;  %s3027_s7 = sshll.u32 %s5158_s2, 4  ;;  %s3028_s7 = int_to_ptr.vmem [resolvable:$true] %s3027_s7 }
0x1cc4   : > { %s3014_s17 = scalar_lea.sflag [#allocation5], %s5072_s21  ;;  %s4311_s24 = scalar_lea.vmem %s3028_s7, 128 }
0x1cc5   : > { %p4312_p9 = scmp.ne.s32.totalorder %s3028_s7, %s4311_s24  ;;  %s4480_s8 = smov [#allocation20]  }
0x1cc6   : > { %s4315_s3 = sshll.u32 %s4480_s8, 4  ;;  %s4316_s3 = int_to_ptr.vmem [resolvable:$false] %s4315_s3 }
0x1cc7   : > { %s4317_s6 = scalar_lea.vmem %s4316_s3, 256  ;;  %p4318_p11 = scmp.lt.s32.totalorder %s3028_s7, %s4316_s3 }
0x1cc8   : > { %s3478_s20 = sshll.u32 %s5732_s9, 7  ;;  %p5735_p2 = scmp.ne.s32.totalorder %s5733_s10, 0 }
0x1cc9   : > { %s5501_s16 = scalar_lea.hbm %s5734_s22, %s3478_s20  ;;  %p4319_p7 = scmp.lt.s32.totalorder %s4317_s6, %s4311_s24 }
0x1cca   : > { %p4313_p5 = pnand %p4312_p9, %p5735_p2 }
0x1ccb   : > { %p4320_p3 = por %p4319_p7, %p4318_p11 }
0x1ccc   : > { %p4314_p0 = pneg %p4313_p5 }
0x1cce   : > { %p4321_p10 = pnand %p4320_p3, %p4314_p0 }
0x1cd0   : > { %4324 = shalt.err (!%p4321_p10)
}
0x1cd1   : > { %s4325_s21 = scalar_lea.hbm %s5501_s16, 128  ;;  %s4329_s29 = scalar_lea.hbm %s5734_s22, 256 }
0x1cd2   : > { %p4326_p6 = scmp.ne.s32.totalorder %s5501_s16, %s4325_s21  ;;  %p4330_p13 = scmp.lt.u32.totalorder %s5501_s16, %s5734_s22 }
0x1cd3   : > { %p4331_p12 = scmp.lt.u32.totalorder %s4329_s29, %s4325_s21  ;;  %p4333_p9 = scmp.lt.u32.totalorder %s4325_s21, %s5501_s16 }
0x1cd4   : > { %p4327_p8 = pnand %p4326_p6, %p5735_p2 }
0x1cd5   : > { %p4332_p1 = por %p4331_p12, %p4330_p13 }
0x1cd6   : > { %p4328_p4 = pneg %p4327_p8 }
0x1cd7   : > { %p4334_p5 = por %p4333_p9, %p4332_p1 }
0x1cd9   : > { %p4335_p0 = pnand %p4334_p5, %p4328_p4 }
0x1cdb   : > { %4338 = shalt.err (!%p4335_p0)
}
0x1cdc   : > { %3805 = dma.vmem_to_hbm [thread:$0]  (%p5735_p2), %s3028_s7, 128, %s5501_s16, %s3014_s17  }
0x1cdd PF: > { %s5736_s25 = sld [smem:[#allocation38_spill]]  ;;  %s5737_s27 = sld [smem:[#allocation31_spill]] }
0x1cde   : > { %s5738_s14 = sld [smem:[#allocation41_spill]] }
0x1ce3   : > { %p3846_p11 = scmp.ge.s32.totalorder %s5736_s25, 2  ;;  %s3039_s12 = sand.u32 1, %s5737_s27  }
0x1ce4   : > { %p5739_p7 = scmp.ne.s32.totalorder %s5738_s14, 0  ;;  %s3040_s11 = scalar_lea.sflag [#allocation5], %s3039_s12 }
0x1ce6   : > { %p3840_p3 = pnand %p3846_p11, %p5739_p7 }
0x1ce8   : > { %4412 = dma.done.wait (!%p3840_p3), %s3040_s11, 128  }
0x1ce9   : > { %4414 = vsyncadd (!%p3840_p3), %s3040_s11, 4294967168  ;;  %s48_s1 = sadd.s32 1, %s5736_s25   ;;  %s5740_s24 = sld [smem:[#allocation29_spill]] }
0x1cea   : > { %p45_p10 = scmp.ge.s32.totalorder %s48_s1, 6   ;;  %s5741_s25 = sld [smem:[#allocation30_spill]] }
0x1ceb   : > { %s5742_s26 = sld [smem:[#allocation46_spill]]  ;;  %s5743_s27 = sld [smem:[#allocation32_spill]] }
0x1cec   : > { %s5744_s28 = sld [smem:[#allocation33_spill]]  ;;  %s5745_s29 = sld [smem:[#allocation47_spill]] }
0x1ced   : > { %s5746_s0 = sld [smem:[#allocation36_spill]]  ;;  %s5747_s30 = sld [smem:[#allocation37_spill]] }
0x1cee   : > { %s5748_s18 = sld [smem:[#allocation43_spill]]  ;;  %s5749_s19 = sld [smem:[#allocation45_spill]] }
0x1cef   :  { %47 = sbr.rel (!%p45_p10) target bundleno = 38 (0x26), region = 280 }
0x1cf6   :  { %3045 = vsyncpa [#allocation4], 1 }
0x1cf7   :  { %3047 = vsyncpa [#allocation4 + $0x1], 1 }
0x1cf8   :  { %3048 = vsyncpa [#allocation7], 1 }
0x1cf9   :  { %3050 = vsyncpa [#allocation7 + $0x1], 1 }
0x1cfa   :  { %3051 = vsyncpa [#allocation10], 1 }
0x1cfb   :  { %3053 = vsyncpa [#allocation10 + $0x1], 1 }
0x1cfc   :  { %3054 = vsyncpa [#allocation13], 1 }
0x1cfd   :  { %3056 = vsyncpa [#allocation13 + $0x1], 1 }
0x1cfe   :  { %3057 = vsyncpa [#allocation16], 1 }
0x1cff   :  { %3059 = vsyncpa [#allocation16 + $0x1], 1 }
0x1d00   :  { %3060 = vsyncpa [#allocation19], 1 }
0x1d01   :  { %3062 = vsyncpa [#allocation19 + $0x1], 1 }
0x1d02   :  { %3063 = vsyncpa [#allocation5], 1 }
0x1d03   :  { %3065 = vsyncpa [#allocation5 + $0x1], 1 }

</bundles_post_ra>
